<compile_context>
chip_gen: v7x
topology: tpu7x:2x2x1
jax: 0.10.0
libtpu: 0.0.40
codegen_flags: <defaults>
</compile_context>

<pallas_src>
import jax
import jax.numpy as jnp
from jax.experimental import pallas as pl
from jax.experimental.pallas import tpu as pltpu

LN_EPS = 1e-5          # nn.LayerNorm default eps
BN_EPS = 1e-3          # NextViT NORM_EPS used by MHCA's BatchNorm2d
_VMEM_LIMIT = 32 * 1024 * 1024


def _make_divisible(v, divisor, min_value=None):
    if min_value is None:
        min_value = divisor
    new_v = max(min_value, int(v + divisor / 2) // divisor * divisor)
    if new_v < 0.9 * v:
        new_v += divisor
    return new_v


def _pick_rows(n):
    """Row-tile size for the 2-D kernels: multiple of 8 that divides n, ~256 preferred."""
    for cand in (256, 512, 1024, 128, 64, 32, 16, 8):
        if n % cand == 0:
            return cand
    return n


# --------------------------------------------------------------------------------------
# Kernel 1: fused norm1 + grouped 3x3 conv (+ streaming BatchNorm statistics)
# --------------------------------------------------------------------------------------
def _ln_conv_kernel(xm_ref, x0_ref, xp_ref, g_ref, b_ref, w3_ref,
                    conv_ref, sum_ref, ssq_ref):
    # block shapes: x*_ref/conv_ref (1, 1, W, C); g/b (W, 1); w3 (9, G, hd, hd)
    _, _, W, C = conv_ref.shape
    _, G, hd, _ = w3_ref.shape
    i = pl.program_id(1)
    nh = pl.num_programs(1)

    def _ln(ref):
        # tile[w, ch] = x[b, ch, h, w]; norm1 normalizes over x's last axis (= tile axis 0)
        v = ref[...].reshape(W, C)
        mu = jnp.mean(v, axis=0, keepdims=True)
        var = jnp.mean((v - mu) ** 2, axis=0, keepdims=True)
        return (v - mu) * jax.lax.rsqrt(var + LN_EPS) * g_ref[...] + b_ref[...]

    # dy-row validity: out-of-image rows contribute zero (== the conv's zero padding).
    rows = (
        _ln(xm_ref) * (i > 0).astype(jnp.float32),
        _ln(x0_ref),
        _ln(xp_ref) * (i < nh - 1).astype(jnp.float32),
    )

    # dx (W-axis) shift masks: drop the single wrapped-around position of each rolled row.
    widx = jax.lax.broadcasted_iota(jnp.int32, (W, 1), 0)
    mask_l = (widx >= 1).astype(jnp.float32)       # for shift dx = -1
    mask_r = (widx <= W - 2).astype(jnp.float32)   # for shift dx = +1

    acc = jnp.zeros((G, W, hd), jnp.float32)
    for dy in range(3):
        r = rows[dy]
        for dx in range(3):
            d = dx - 1
            if d == 0:
                rs = r
            elif d == 1:
                # jnp.roll (guaranteed semantics); pltpu.roll would keep this on the XLU.
                rs = jnp.roll(r, shift=-1, axis=0) * mask_r
            else:
                rs = jnp.roll(r, shift=1, axis=0) * mask_l
            rg = rs.astype(jnp.bfloat16).reshape(W, G, hd)
            # block-diagonal grouped matmul: batch over groups, contract over within-group ci.
            acc = acc + jax.lax.dot_general(
                rg, w3_ref[dy * 3 + dx],
                dimension_numbers=(((2,), (1,)), ((1,), (0,))),
                preferred_element_type=jnp.float32)          # (G, W, hd)

    # channel ordering co = g * hd + o, channels-last row of the conv output
    conv = jnp.concatenate([acc[g] for g in range(G)], axis=1)    # (W, C)
    conv_ref[...] = conv.reshape(conv_ref.shape)

    # streaming BatchNorm batch statistics (per conv channel), one accumulator per batch image
    @pl.when(i == 0)
    def _init():
        sum_ref[...] = jnp.zeros_like(sum_ref)
        ssq_ref[...] = jnp.zeros_like(ssq_ref)

    sum_ref[...] += jnp.sum(conv, axis=0, keepdims=True).reshape(sum_ref.shape)
    ssq_ref[...] += jnp.sum(conv * conv, axis=0, keepdims=True).reshape(ssq_ref.shape)


# --------------------------------------------------------------------------------------
# Kernel 2: BN + ReLU + 1x1 projection + attn residual, fused with norm2 + Mlp
# --------------------------------------------------------------------------------------
def _bn_proj_mlp_kernel(conv_ref, res_ref, sc_ref, sh_ref, wp_ref,
                        g2_ref, bt2_ref, w1_ref, b1_ref, w2_ref, b2_ref,
                        x3_ref, m_ref):
    # MHCA epilogue
    a = jnp.maximum(conv_ref[...] * sc_ref[...] + sh_ref[...], 0.0)
    proj = jnp.dot(a.astype(jnp.bfloat16), wp_ref[...],
                   preferred_element_type=jnp.float32)
    x3 = res_ref[...] + proj
    x3_ref[...] = x3

    # norm2 + NextViT Mlp (1x1 conv -> ReLU -> 1x1 conv); permuted residual added outside.
    mu = jnp.mean(x3, axis=-1, keepdims=True)
    var = jnp.mean((x3 - mu) ** 2, axis=-1, keepdims=True)
    n2 = (x3 - mu) * jax.lax.rsqrt(var + LN_EPS) * g2_ref[...] + bt2_ref[...]
    h = jnp.dot(n2.astype(jnp.bfloat16), w1_ref[...],
                preferred_element_type=jnp.float32) + b1_ref[...]
    h = jnp.maximum(h, 0.0)
    m = jnp.dot(h.astype(jnp.bfloat16), w2_ref[...],
                preferred_element_type=jnp.float32) + b2_ref[...]
    m_ref[...] = m


# --------------------------------------------------------------------------------------
# forward wrapper
# --------------------------------------------------------------------------------------
def next_hiera_block_forward(x, p):
    """Pallas version of NextHieraBlock.forward (dim == dim_out, drop_path = 0)."""
    B, A1, A2, C = x.shape
    assert A1 == A2 == C == p["dim"], "the literal PyTorch forward only runs for cubic grids"
    # TODO(synk): the dim != dim_out branch needs `self.attn.q_stride`, which NextViT MHCA
    # does not define, so that path is not modeled.
    S = A1
    hd = p["heads"]
    G = C // hd
    H = p["hidden"]
    N = B * S * S

    # MHCA interprets x_norm's axis 1 as channels; put that axis last once (single XLA
    # transpose), everything downstream works on lane-dense channels-last tiles.
    xt = jnp.transpose(x, (0, 2, 3, 1))        # xt[b, h, w, ch] = x[b, ch, h, w]

    def _xrow_spec(dy):
        def imap(b, i):
            return (b, jnp.clip(i + dy - 1, 0, S - 1), 0, 0)
        return pl.BlockSpec((1, 1, S, C), imap)

    conv, ssum, ssq = pl.pallas_call(
        _ln_conv_kernel,
        out_shape=(jax.ShapeDtypeStruct((B, S, S, C), jnp.float32),
                   jax.ShapeDtypeStruct((B, 1, C), jnp.float32),
                   jax.ShapeDtypeStruct((B, 1, C), jnp.float32)),
        grid=(B, S),
        in_specs=[
            _xrow_spec(0), _xrow_spec(1), _xrow_spec(2),
            pl.BlockSpec((C, 1), lambda b, i: (0, 0)),              # norm1 gamma (len dim)
            pl.BlockSpec((C, 1), lambda b, i: (0, 0)),              # norm1 beta
            pl.BlockSpec((9, G, hd, hd), lambda b, i: (0, 0, 0, 0)),
        ],
        out_specs=(
            pl.BlockSpec((1, 1, S, C), lambda b, i: (b, i, 0, 0)),
            pl.BlockSpec((1, 1, C), lambda b, i: (b, 0, 0)),
            pl.BlockSpec((1, 1, C), lambda b, i: (b, 0, 0)),
        ),
        compiler_params=pltpu.CompilerParams(
            dimension_semantics=("parallel", "arbitrary"),
            vmem_limit_bytes=_VMEM_LIMIT),
    )(xt, xt, xt,
      p["ln1_g"].reshape(C, 1), p["ln1_b"].reshape(C, 1), p["w3g"])

    # tiny BatchNorm finalize (training-mode batch statistics, biased variance)
    cnt = jnp.float32(N)
    mu = jnp.sum(ssum[:, 0, :], axis=0) / cnt
    var = jnp.maximum(jnp.sum(ssq[:, 0, :], axis=0) / cnt - mu * mu, 0.0)
    bn_scale = p["bn_g"] * jax.lax.rsqrt(var + BN_EPS)
    bn_shift = p["bn_b"] - mu * bn_scale

    RT = _pick_rows(N)
    x3_2d, m_2d = pl.pallas_call(
        _bn_proj_mlp_kernel,
        out_shape=(jax.ShapeDtypeStruct((N, C), jnp.float32),
                   jax.ShapeDtypeStruct((N, C), jnp.float32)),
        grid=(N // RT,),
        in_specs=[
            pl.BlockSpec((RT, C), lambda i: (i, 0)),   # conv rows
            pl.BlockSpec((RT, C), lambda i: (i, 0)),   # attn residual (= x rows)
            pl.BlockSpec((1, C), lambda i: (0, 0)),    # BN scale
            pl.BlockSpec((1, C), lambda i: (0, 0)),    # BN shift
            pl.BlockSpec((C, C), lambda i: (0, 0)),    # 1x1 projection (bf16)
            pl.BlockSpec((1, C), lambda i: (0, 0)),    # norm2 gamma
            pl.BlockSpec((1, C), lambda i: (0, 0)),    # norm2 beta
            pl.BlockSpec((C, H), lambda i: (0, 0)),    # Mlp conv1 (bf16)
            pl.BlockSpec((1, H), lambda i: (0, 0)),    # Mlp bias1
            pl.BlockSpec((H, C), lambda i: (0, 0)),    # Mlp conv2 (bf16)
            pl.BlockSpec((1, C), lambda i: (0, 0)),    # Mlp bias2
        ],
        out_specs=(
            pl.BlockSpec((RT, C), lambda i: (i, 0)),
            pl.BlockSpec((RT, C), lambda i: (i, 0)),
        ),
        compiler_params=pltpu.CompilerParams(
            dimension_semantics=("parallel",),
            vmem_limit_bytes=_VMEM_LIMIT),
    )(conv.reshape(N, C), x.reshape(N, C),
      bn_scale.reshape(1, C), bn_shift.reshape(1, C), p["wp"],
      p["ln2_g"].reshape(1, C), p["ln2_b"].reshape(1, C),
      p["w1"], p["b1"].reshape(1, H), p["w2"], p["b2"].reshape(1, C))

    x3 = x3_2d.reshape(B, S, S, C)
    m = m_2d.reshape(B, S, S, C)
    # x = x3 + mlp.permute(0,3,1,2); return x.permute(0,2,3,1)  -- permute algebra folded.
    return jnp.transpose(x3, (0, 2, 3, 1)) + jnp.transpose(m, (0, 3, 1, 2))


# --------------------------------------------------------------------------------------
# pure-JAX reference (literal torch semantics, f32)
# --------------------------------------------------------------------------------------
def reference_forward(x, p):
    C, hd = p["dim"], p["heads"]
    dn = ("NCHW", "OIHW", "NCHW")

    def ln(v, g, b):
        mu = v.mean(-1, keepdims=True)
        var = ((v - mu) ** 2).mean(-1, keepdims=True)
        return (v - mu) / jnp.sqrt(var + LN_EPS) * g + b

    x_norm = ln(x, p["ln1_g"], p["ln1_b"])
    x1 = jnp.transpose(x, (0, 3, 1, 2))
    conv = jax.lax.conv_general_dilated(x_norm, p["w3_torch"], (1, 1), "SAME",
                                        dimension_numbers=dn, feature_group_count=C // hd)
    mu = conv.mean(axis=(0, 2, 3), keepdims=True)
    var = ((conv - mu) ** 2).mean(axis=(0, 2, 3), keepdims=True)
    bn = (conv - mu) / jnp.sqrt(var + BN_EPS) * p["bn_g"].reshape(1, C, 1, 1) \
        + p["bn_b"].reshape(1, C, 1, 1)
    act = jnp.maximum(bn, 0.0)
    attn = jax.lax.conv_general_dilated(act, p["wp_torch"], (1, 1), "SAME", dimension_numbers=dn)
    x2 = x1 + attn
    x3 = jnp.transpose(x2, (0, 2, 3, 1))
    norm = jnp.transpose(ln(x3, p["ln2_g"], p["ln2_b"]), (0, 3, 1, 2))
    h = jax.lax.conv_general_dilated(norm, p["w1_torch"], (1, 1), "SAME", dimension_numbers=dn)
    h = jnp.maximum(h + p["b1"].reshape(1, -1, 1, 1), 0.0)
    m = jax.lax.conv_general_dilated(h, p["w2_torch"], (1, 1), "SAME", dimension_numbers=dn)
    m = m + p["b2"].reshape(1, -1, 1, 1)
    mlp = jnp.transpose(m, (0, 3, 1, 2))
    return jnp.transpose(x3 + mlp, (0, 2, 3, 1))


# --------------------------------------------------------------------------------------
# parameters
# --------------------------------------------------------------------------------------
def init_params(key, dim, heads, mlp_ratio=4.0):
    C, hd = dim, heads
    assert C % hd == 0
    G = C // hd
    hidden = _make_divisible(C * mlp_ratio, 32)
    ks = jax.random.split(key, 12)
    w3_torch = 0.25 * jax.random.normal(ks[0], (C, hd, 3, 3), jnp.float32)     # grouped 3x3 OIHW
    bn_g = 1.0 + 0.1 * jax.random.normal(ks[1], (C,), jnp.float32)
    bn_b = 0.1 * jax.random.normal(ks[2], (C,), jnp.float32)
    wp_torch = 0.25 * jax.random.normal(ks[3], (C, C, 1, 1), jnp.float32)      # 1x1 projection
    ln1_g = 1.0 + 0.1 * jax.random.normal(ks[4], (C,), jnp.float32)
    ln1_b = 0.1 * jax.random.normal(ks[5], (C,), jnp.float32)
    ln2_g = 1.0 + 0.1 * jax.random.normal(ks[6], (C,), jnp.float32)
    ln2_b = 0.1 * jax.random.normal(ks[7], (C,), jnp.float32)
    w1_torch = 0.2 * jax.random.normal(ks[8], (hidden, C, 1, 1), jnp.float32)  # Mlp conv1
    b1 = 0.1 * jax.random.normal(ks[9], (hidden,), jnp.float32)
    w2_torch = 0.2 * jax.random.normal(ks[10], (C, hidden, 1, 1), jnp.float32)  # Mlp conv2
    b2 = 0.1 * jax.random.normal(ks[11], (C,), jnp.float32)

    # kernel-side layouts: grouped 3x3 weight as (tap, group, ci, co) block-diagonal form
    # (no dense-with-zeros CxC densification); 1x1 convs as (in, out) matrices; bf16 operands.
    w3g = jnp.transpose(w3_torch.reshape(G, hd, hd, 3, 3),
                        (3, 4, 0, 2, 1)).reshape(9, G, hd, hd).astype(jnp.bfloat16)

    return dict(
        dim=C, heads=hd, hidden=hidden,
        ln1_g=ln1_g, ln1_b=ln1_b, ln2_g=ln2_g, ln2_b=ln2_b,
        bn_g=bn_g, bn_b=bn_b, b1=b1, b2=b2,
        w3_torch=w3_torch, wp_torch=wp_torch, w1_torch=w1_torch, w2_torch=w2_torch,
        w3g=w3g,
        wp=wp_torch[:, :, 0, 0].T.astype(jnp.bfloat16),   # (C_in, C_out)
        w1=w1_torch[:, :, 0, 0].T.astype(jnp.bfloat16),   # (C, hidden)
        w2=w2_torch[:, :, 0, 0].T.astype(jnp.bfloat16),   # (hidden, C)
    )


if __name__ == "__main__":
    B, dim, heads = 2, 16, 8   # dim == dim_out; heads is MHCA head_dim (groups = dim // heads)
    key = jax.random.PRNGKey(0)
    kx, kp = jax.random.split(key)
    x = jax.random.normal(kx, (B, dim, dim, dim), jnp.float32)
    params = init_params(kp, dim, heads, mlp_ratio=4.0)

    out = jax.jit(lambda a: next_hiera_block_forward(a, params))(x)
    out = jax.block_until_ready(out)

    ref = jax.block_until_ready(reference_forward(x, params))
    assert out.shape == ref.shape == x.shape
    # bf16 matmul operands (f32 accumulation) => slightly looser tolerance than pure f32
    if not jnp.allclose(out, ref, rtol=5e-2, atol=5e-2):
        raise AssertionError(
            f"kernel/reference mismatch, max abs diff = {float(jnp.max(jnp.abs(out - ref)))}")
    print("KERNEL_OK")
</pallas_src>

<mosaic_0001>
module attributes {stable_mosaic.version = 11 : i64} {
  func.func @_ln_conv_kernel(%arg0: i32, %arg1: i32, %arg2: memref<1x1x16x16xf32, #tpu.memory_space<vmem>>, %arg3: memref<1x1x16x16xf32, #tpu.memory_space<vmem>>, %arg4: memref<1x1x16x16xf32, #tpu.memory_space<vmem>>, %arg5: memref<16x1xf32, #tpu.memory_space<vmem>>, %arg6: memref<16x1xf32, #tpu.memory_space<vmem>>, %arg7: memref<9x2x8x8xbf16, #tpu.memory_space<vmem>>, %arg8: memref<1x1x16x16xf32, #tpu.memory_space<vmem>>, %arg9: memref<1x1x16xf32, #tpu.memory_space<vmem>>, %arg10: memref<1x1x16xf32, #tpu.memory_space<vmem>>) attributes {dimension_semantics = [#tpu.dimension_semantics<parallel>, #tpu.dimension_semantics<arbitrary>], iteration_bounds = array<i64: 2, 16>, scalar_prefetch = 0 : i64, scratch_operands = 0 : i64, tpu.core_type = #tpu.core_type<tc>, window_params = [{transform_indices = @transform_0, window_bounds = array<i64: 1, 1, 16, 16>}, {transform_indices = @transform_1, window_bounds = array<i64: 1, 1, 16, 16>}, {transform_indices = @transform_2, window_bounds = array<i64: 1, 1, 16, 16>}, {pipeline_mode = #tpu.pipeline_mode<synchronous>, transform_indices = @transform_3, window_bounds = array<i64: 16, 1>}, {pipeline_mode = #tpu.pipeline_mode<synchronous>, transform_indices = @transform_4, window_bounds = array<i64: 16, 1>}, {pipeline_mode = #tpu.pipeline_mode<synchronous>, transform_indices = @transform_5, window_bounds = array<i64: 9, 2, 8, 8>}, {transform_indices = @transform_6, window_bounds = array<i64: 1, 1, 16, 16>}, {transform_indices = @transform_7, window_bounds = array<i64: 1, 1, 16>}, {transform_indices = @transform_8, window_bounds = array<i64: 1, 1, 16>}]} {
    %c0 = arith.constant 0 : index
    %c0_0 = arith.constant 0 : index
    %c0_1 = arith.constant 0 : index
    %c0_2 = arith.constant 0 : index
    %0 = vector.load %arg2[%c0, %c0_0, %c0_1, %c0_2] : memref<1x1x16x16xf32, #tpu.memory_space<vmem>>, vector<1x1x16x16xf32>
    %1 = vector.shape_cast %0 : vector<1x1x16x16xf32> to vector<16x16xf32>
    %cst = arith.constant dense<0.000000e+00> : vector<16xf32>
    %2 = vector.multi_reduction <add>, %1, %cst [0] : vector<16x16xf32> to vector<16xf32>
    %3 = vector.shape_cast %2 : vector<16xf32> to vector<1x16xf32>
    %cst_3 = arith.constant 1.600000e+01 : f32
    %4 = vector.broadcast %cst_3 : f32 to vector<1x16xf32>
    %5 = arith.divf %3, %4 : vector<1x16xf32>
    %6 = vector.broadcast %5 : vector<1x16xf32> to vector<16x16xf32>
    %7 = arith.subf %1, %6 : vector<16x16xf32>
    %8 = arith.mulf %7, %7 : vector<16x16xf32>
    %cst_4 = arith.constant dense<0.000000e+00> : vector<16xf32>
    %9 = vector.multi_reduction <add>, %8, %cst_4 [0] : vector<16x16xf32> to vector<16xf32>
    %10 = vector.shape_cast %9 : vector<16xf32> to vector<1x16xf32>
    %cst_5 = arith.constant 1.600000e+01 : f32
    %11 = vector.broadcast %cst_5 : f32 to vector<1x16xf32>
    %12 = arith.divf %10, %11 : vector<1x16xf32>
    %13 = vector.broadcast %5 : vector<1x16xf32> to vector<16x16xf32>
    %14 = arith.subf %1, %13 : vector<16x16xf32>
    %cst_6 = arith.constant 9.99999974E-6 : f32
    %15 = vector.broadcast %cst_6 : f32 to vector<1x16xf32>
    %16 = arith.addf %12, %15 : vector<1x16xf32>
    %17 = math.rsqrt %16 : vector<1x16xf32>
    %18 = vector.broadcast %17 : vector<1x16xf32> to vector<16x16xf32>
    %19 = arith.mulf %14, %18 : vector<16x16xf32>
    %c0_7 = arith.constant 0 : index
    %c0_8 = arith.constant 0 : index
    %20 = vector.load %arg5[%c0_7, %c0_8] : memref<16x1xf32, #tpu.memory_space<vmem>>, vector<16x1xf32>
    %21 = vector.broadcast %20 : vector<16x1xf32> to vector<16x16xf32>
    %22 = arith.mulf %19, %21 : vector<16x16xf32>
    %c0_9 = arith.constant 0 : index
    %c0_10 = arith.constant 0 : index
    %23 = vector.load %arg6[%c0_9, %c0_10] : memref<16x1xf32, #tpu.memory_space<vmem>>, vector<16x1xf32>
    %24 = vector.broadcast %23 : vector<16x1xf32> to vector<16x16xf32>
    %25 = arith.addf %22, %24 : vector<16x16xf32>
    %c0_i32 = arith.constant 0 : i32
    %26 = arith.cmpi sgt, %arg1, %c0_i32 : i32
    %27 = arith.extui %26 : i1 to i32
    %28 = arith.sitofp %27 : i32 to f32
    %29 = vector.broadcast %28 : f32 to vector<16x16xf32>
    %30 = arith.mulf %25, %29 : vector<16x16xf32>
    %c0_11 = arith.constant 0 : index
    %c0_12 = arith.constant 0 : index
    %c0_13 = arith.constant 0 : index
    %c0_14 = arith.constant 0 : index
    %31 = vector.load %arg3[%c0_11, %c0_12, %c0_13, %c0_14] : memref<1x1x16x16xf32, #tpu.memory_space<vmem>>, vector<1x1x16x16xf32>
    %32 = vector.shape_cast %31 : vector<1x1x16x16xf32> to vector<16x16xf32>
    %cst_15 = arith.constant dense<0.000000e+00> : vector<16xf32>
    %33 = vector.multi_reduction <add>, %32, %cst_15 [0] : vector<16x16xf32> to vector<16xf32>
    %34 = vector.shape_cast %33 : vector<16xf32> to vector<1x16xf32>
    %cst_16 = arith.constant 1.600000e+01 : f32
    %35 = vector.broadcast %cst_16 : f32 to vector<1x16xf32>
    %36 = arith.divf %34, %35 : vector<1x16xf32>
    %37 = vector.broadcast %36 : vector<1x16xf32> to vector<16x16xf32>
    %38 = arith.subf %32, %37 : vector<16x16xf32>
    %39 = arith.mulf %38, %38 : vector<16x16xf32>
    %cst_17 = arith.constant dense<0.000000e+00> : vector<16xf32>
    %40 = vector.multi_reduction <add>, %39, %cst_17 [0] : vector<16x16xf32> to vector<16xf32>
    %41 = vector.shape_cast %40 : vector<16xf32> to vector<1x16xf32>
    %cst_18 = arith.constant 1.600000e+01 : f32
    %42 = vector.broadcast %cst_18 : f32 to vector<1x16xf32>
    %43 = arith.divf %41, %42 : vector<1x16xf32>
    %44 = vector.broadcast %36 : vector<1x16xf32> to vector<16x16xf32>
    %45 = arith.subf %32, %44 : vector<16x16xf32>
    %cst_19 = arith.constant 9.99999974E-6 : f32
    %46 = vector.broadcast %cst_19 : f32 to vector<1x16xf32>
    %47 = arith.addf %43, %46 : vector<1x16xf32>
    %48 = math.rsqrt %47 : vector<1x16xf32>
    %49 = vector.broadcast %48 : vector<1x16xf32> to vector<16x16xf32>
    %50 = arith.mulf %45, %49 : vector<16x16xf32>
    %c0_20 = arith.constant 0 : index
    %c0_21 = arith.constant 0 : index
    %51 = vector.load %arg5[%c0_20, %c0_21] : memref<16x1xf32, #tpu.memory_space<vmem>>, vector<16x1xf32>
    %52 = vector.broadcast %51 : vector<16x1xf32> to vector<16x16xf32>
    %53 = arith.mulf %50, %52 : vector<16x16xf32>
    %c0_22 = arith.constant 0 : index
    %c0_23 = arith.constant 0 : index
    %54 = vector.load %arg6[%c0_22, %c0_23] : memref<16x1xf32, #tpu.memory_space<vmem>>, vector<16x1xf32>
    %55 = vector.broadcast %54 : vector<16x1xf32> to vector<16x16xf32>
    %56 = arith.addf %53, %55 : vector<16x16xf32>
    %c0_24 = arith.constant 0 : index
    %c0_25 = arith.constant 0 : index
    %c0_26 = arith.constant 0 : index
    %c0_27 = arith.constant 0 : index
    %57 = vector.load %arg4[%c0_24, %c0_25, %c0_26, %c0_27] : memref<1x1x16x16xf32, #tpu.memory_space<vmem>>, vector<1x1x16x16xf32>
    %58 = vector.shape_cast %57 : vector<1x1x16x16xf32> to vector<16x16xf32>
    %cst_28 = arith.constant dense<0.000000e+00> : vector<16xf32>
    %59 = vector.multi_reduction <add>, %58, %cst_28 [0] : vector<16x16xf32> to vector<16xf32>
    %60 = vector.shape_cast %59 : vector<16xf32> to vector<1x16xf32>
    %cst_29 = arith.constant 1.600000e+01 : f32
    %61 = vector.broadcast %cst_29 : f32 to vector<1x16xf32>
    %62 = arith.divf %60, %61 : vector<1x16xf32>
    %63 = vector.broadcast %62 : vector<1x16xf32> to vector<16x16xf32>
    %64 = arith.subf %58, %63 : vector<16x16xf32>
    %65 = arith.mulf %64, %64 : vector<16x16xf32>
    %cst_30 = arith.constant dense<0.000000e+00> : vector<16xf32>
    %66 = vector.multi_reduction <add>, %65, %cst_30 [0] : vector<16x16xf32> to vector<16xf32>
    %67 = vector.shape_cast %66 : vector<16xf32> to vector<1x16xf32>
    %cst_31 = arith.constant 1.600000e+01 : f32
    %68 = vector.broadcast %cst_31 : f32 to vector<1x16xf32>
    %69 = arith.divf %67, %68 : vector<1x16xf32>
    %70 = vector.broadcast %62 : vector<1x16xf32> to vector<16x16xf32>
    %71 = arith.subf %58, %70 : vector<16x16xf32>
    %cst_32 = arith.constant 9.99999974E-6 : f32
    %72 = vector.broadcast %cst_32 : f32 to vector<1x16xf32>
    %73 = arith.addf %69, %72 : vector<1x16xf32>
    %74 = math.rsqrt %73 : vector<1x16xf32>
    %75 = vector.broadcast %74 : vector<1x16xf32> to vector<16x16xf32>
    %76 = arith.mulf %71, %75 : vector<16x16xf32>
    %c0_33 = arith.constant 0 : index
    %c0_34 = arith.constant 0 : index
    %77 = vector.load %arg5[%c0_33, %c0_34] : memref<16x1xf32, #tpu.memory_space<vmem>>, vector<16x1xf32>
    %78 = vector.broadcast %77 : vector<16x1xf32> to vector<16x16xf32>
    %79 = arith.mulf %76, %78 : vector<16x16xf32>
    %c0_35 = arith.constant 0 : index
    %c0_36 = arith.constant 0 : index
    %80 = vector.load %arg6[%c0_35, %c0_36] : memref<16x1xf32, #tpu.memory_space<vmem>>, vector<16x1xf32>
    %81 = vector.broadcast %80 : vector<16x1xf32> to vector<16x16xf32>
    %82 = arith.addf %79, %81 : vector<16x16xf32>
    %c15_i32 = arith.constant 15 : i32
    %83 = arith.cmpi slt, %arg1, %c15_i32 : i32
    %84 = arith.extui %83 : i1 to i32
    %85 = arith.sitofp %84 : i32 to f32
    %86 = vector.broadcast %85 : f32 to vector<16x16xf32>
    %87 = arith.mulf %82, %86 : vector<16x16xf32>
    %88 = tpu.iota {dimensions = array<i32: 0>} : vector<16x1xi32>
    %c1_i32 = arith.constant 1 : i32
    %89 = vector.broadcast %c1_i32 : i32 to vector<16x1xi32>
    %90 = arith.cmpi sge, %88, %89 : vector<16x1xi32>
    %91 = arith.extui %90 : vector<16x1xi1> to vector<16x1xi32>
    %92 = arith.sitofp %91 : vector<16x1xi32> to vector<16x1xf32>
    %c14_i32 = arith.constant 14 : i32
    %93 = vector.broadcast %c14_i32 : i32 to vector<16x1xi32>
    %94 = arith.cmpi sle, %88, %93 : vector<16x1xi32>
    %95 = arith.extui %94 : vector<16x1xi1> to vector<16x1xi32>
    %96 = arith.sitofp %95 : vector<16x1xi32> to vector<16x1xf32>
    %cst_37 = arith.constant 0.000000e+00 : f32
    %97 = vector.broadcast %cst_37 : f32 to vector<2x16x8xf32>
    %98 = vector.extract_strided_slice %30 {offsets = [15, 0], sizes = [1, 16], strides = [1, 1]} : vector<16x16xf32> to vector<1x16xf32>
    %99 = vector.extract_strided_slice %30 {offsets = [0, 0], sizes = [15, 16], strides = [1, 1]} : vector<16x16xf32> to vector<15x16xf32>
    %100 = tpu.concatenate %98, %99 in 0 : vector<1x16xf32>, vector<15x16xf32> -> vector<16x16xf32>
    %101 = vector.broadcast %92 : vector<16x1xf32> to vector<16x16xf32>
    %102 = arith.mulf %100, %101 : vector<16x16xf32>
    %103 = arith.truncf %102 : vector<16x16xf32> to vector<16x16xbf16>
    %104 = vector.shape_cast %103 : vector<16x16xbf16> to vector<16x2x8xbf16>
    %c0_38 = arith.constant 0 : index
    %c0_39 = arith.constant 0 : index
    %c0_40 = arith.constant 0 : index
    %c0_41 = arith.constant 0 : index
    %105 = vector.load %arg7[%c0_38, %c0_39, %c0_40, %c0_41] : memref<9x2x8x8xbf16, #tpu.memory_space<vmem>>, vector<1x2x8x8xbf16>
    %106 = vector.shape_cast %105 : vector<1x2x8x8xbf16> to vector<2x8x8xbf16>
    %cst_42 = arith.constant dense<0.000000e+00> : vector<2x16x8xf32>
    %107 = tpu.matmul %104, %106, %cst_42 {dimension_numbers = #tpu.dot_dimension_numbers<[2], [1], [0], [2], [0, 1, 0, 0, 1, 2], [1], [0]>} : vector<16x2x8xbf16>, vector<2x8x8xbf16>, vector<2x16x8xf32> -> vector<2x16x8xf32>
    %108 = arith.addf %97, %107 : vector<2x16x8xf32>
    %109 = arith.truncf %30 : vector<16x16xf32> to vector<16x16xbf16>
    %110 = vector.shape_cast %109 : vector<16x16xbf16> to vector<16x2x8xbf16>
    %c1 = arith.constant 1 : index
    %c0_43 = arith.constant 0 : index
    %c0_44 = arith.constant 0 : index
    %c0_45 = arith.constant 0 : index
    %111 = vector.load %arg7[%c1, %c0_43, %c0_44, %c0_45] : memref<9x2x8x8xbf16, #tpu.memory_space<vmem>>, vector<1x2x8x8xbf16>
    %112 = vector.shape_cast %111 : vector<1x2x8x8xbf16> to vector<2x8x8xbf16>
    %cst_46 = arith.constant dense<0.000000e+00> : vector<2x16x8xf32>
    %113 = tpu.matmul %110, %112, %cst_46 {dimension_numbers = #tpu.dot_dimension_numbers<[2], [1], [0], [2], [0, 1, 0, 0, 1, 2], [1], [0]>} : vector<16x2x8xbf16>, vector<2x8x8xbf16>, vector<2x16x8xf32> -> vector<2x16x8xf32>
    %114 = arith.addf %108, %113 : vector<2x16x8xf32>
    %115 = vector.extract_strided_slice %30 {offsets = [1, 0], sizes = [15, 16], strides = [1, 1]} : vector<16x16xf32> to vector<15x16xf32>
    %116 = vector.extract_strided_slice %30 {offsets = [0, 0], sizes = [1, 16], strides = [1, 1]} : vector<16x16xf32> to vector<1x16xf32>
    %117 = tpu.concatenate %115, %116 in 0 : vector<15x16xf32>, vector<1x16xf32> -> vector<16x16xf32>
    %118 = vector.broadcast %96 : vector<16x1xf32> to vector<16x16xf32>
    %119 = arith.mulf %117, %118 : vector<16x16xf32>
    %120 = arith.truncf %119 : vector<16x16xf32> to vector<16x16xbf16>
    %121 = vector.shape_cast %120 : vector<16x16xbf16> to vector<16x2x8xbf16>
    %c2 = arith.constant 2 : index
    %c0_47 = arith.constant 0 : index
    %c0_48 = arith.constant 0 : index
    %c0_49 = arith.constant 0 : index
    %122 = vector.load %arg7[%c2, %c0_47, %c0_48, %c0_49] : memref<9x2x8x8xbf16, #tpu.memory_space<vmem>>, vector<1x2x8x8xbf16>
    %123 = vector.shape_cast %122 : vector<1x2x8x8xbf16> to vector<2x8x8xbf16>
    %cst_50 = arith.constant dense<0.000000e+00> : vector<2x16x8xf32>
    %124 = tpu.matmul %121, %123, %cst_50 {dimension_numbers = #tpu.dot_dimension_numbers<[2], [1], [0], [2], [0, 1, 0, 0, 1, 2], [1], [0]>} : vector<16x2x8xbf16>, vector<2x8x8xbf16>, vector<2x16x8xf32> -> vector<2x16x8xf32>
    %125 = arith.addf %114, %124 : vector<2x16x8xf32>
    %126 = vector.extract_strided_slice %56 {offsets = [15, 0], sizes = [1, 16], strides = [1, 1]} : vector<16x16xf32> to vector<1x16xf32>
    %127 = vector.extract_strided_slice %56 {offsets = [0, 0], sizes = [15, 16], strides = [1, 1]} : vector<16x16xf32> to vector<15x16xf32>
    %128 = tpu.concatenate %126, %127 in 0 : vector<1x16xf32>, vector<15x16xf32> -> vector<16x16xf32>
    %129 = vector.broadcast %92 : vector<16x1xf32> to vector<16x16xf32>
    %130 = arith.mulf %128, %129 : vector<16x16xf32>
    %131 = arith.truncf %130 : vector<16x16xf32> to vector<16x16xbf16>
    %132 = vector.shape_cast %131 : vector<16x16xbf16> to vector<16x2x8xbf16>
    %c3 = arith.constant 3 : index
    %c0_51 = arith.constant 0 : index
    %c0_52 = arith.constant 0 : index
    %c0_53 = arith.constant 0 : index
    %133 = vector.load %arg7[%c3, %c0_51, %c0_52, %c0_53] : memref<9x2x8x8xbf16, #tpu.memory_space<vmem>>, vector<1x2x8x8xbf16>
    %134 = vector.shape_cast %133 : vector<1x2x8x8xbf16> to vector<2x8x8xbf16>
    %cst_54 = arith.constant dense<0.000000e+00> : vector<2x16x8xf32>
    %135 = tpu.matmul %132, %134, %cst_54 {dimension_numbers = #tpu.dot_dimension_numbers<[2], [1], [0], [2], [0, 1, 0, 0, 1, 2], [1], [0]>} : vector<16x2x8xbf16>, vector<2x8x8xbf16>, vector<2x16x8xf32> -> vector<2x16x8xf32>
    %136 = arith.addf %125, %135 : vector<2x16x8xf32>
    %137 = arith.truncf %56 : vector<16x16xf32> to vector<16x16xbf16>
    %138 = vector.shape_cast %137 : vector<16x16xbf16> to vector<16x2x8xbf16>
    %c4 = arith.constant 4 : index
    %c0_55 = arith.constant 0 : index
    %c0_56 = arith.constant 0 : index
    %c0_57 = arith.constant 0 : index
    %139 = vector.load %arg7[%c4, %c0_55, %c0_56, %c0_57] : memref<9x2x8x8xbf16, #tpu.memory_space<vmem>>, vector<1x2x8x8xbf16>
    %140 = vector.shape_cast %139 : vector<1x2x8x8xbf16> to vector<2x8x8xbf16>
    %cst_58 = arith.constant dense<0.000000e+00> : vector<2x16x8xf32>
    %141 = tpu.matmul %138, %140, %cst_58 {dimension_numbers = #tpu.dot_dimension_numbers<[2], [1], [0], [2], [0, 1, 0, 0, 1, 2], [1], [0]>} : vector<16x2x8xbf16>, vector<2x8x8xbf16>, vector<2x16x8xf32> -> vector<2x16x8xf32>
    %142 = arith.addf %136, %141 : vector<2x16x8xf32>
    %143 = vector.extract_strided_slice %56 {offsets = [1, 0], sizes = [15, 16], strides = [1, 1]} : vector<16x16xf32> to vector<15x16xf32>
    %144 = vector.extract_strided_slice %56 {offsets = [0, 0], sizes = [1, 16], strides = [1, 1]} : vector<16x16xf32> to vector<1x16xf32>
    %145 = tpu.concatenate %143, %144 in 0 : vector<15x16xf32>, vector<1x16xf32> -> vector<16x16xf32>
    %146 = vector.broadcast %96 : vector<16x1xf32> to vector<16x16xf32>
    %147 = arith.mulf %145, %146 : vector<16x16xf32>
    %148 = arith.truncf %147 : vector<16x16xf32> to vector<16x16xbf16>
    %149 = vector.shape_cast %148 : vector<16x16xbf16> to vector<16x2x8xbf16>
    %c5 = arith.constant 5 : index
    %c0_59 = arith.constant 0 : index
    %c0_60 = arith.constant 0 : index
    %c0_61 = arith.constant 0 : index
    %150 = vector.load %arg7[%c5, %c0_59, %c0_60, %c0_61] : memref<9x2x8x8xbf16, #tpu.memory_space<vmem>>, vector<1x2x8x8xbf16>
    %151 = vector.shape_cast %150 : vector<1x2x8x8xbf16> to vector<2x8x8xbf16>
    %cst_62 = arith.constant dense<0.000000e+00> : vector<2x16x8xf32>
    %152 = tpu.matmul %149, %151, %cst_62 {dimension_numbers = #tpu.dot_dimension_numbers<[2], [1], [0], [2], [0, 1, 0, 0, 1, 2], [1], [0]>} : vector<16x2x8xbf16>, vector<2x8x8xbf16>, vector<2x16x8xf32> -> vector<2x16x8xf32>
    %153 = arith.addf %142, %152 : vector<2x16x8xf32>
    %154 = vector.extract_strided_slice %87 {offsets = [15, 0], sizes = [1, 16], strides = [1, 1]} : vector<16x16xf32> to vector<1x16xf32>
    %155 = vector.extract_strided_slice %87 {offsets = [0, 0], sizes = [15, 16], strides = [1, 1]} : vector<16x16xf32> to vector<15x16xf32>
    %156 = tpu.concatenate %154, %155 in 0 : vector<1x16xf32>, vector<15x16xf32> -> vector<16x16xf32>
    %157 = vector.broadcast %92 : vector<16x1xf32> to vector<16x16xf32>
    %158 = arith.mulf %156, %157 : vector<16x16xf32>
    %159 = arith.truncf %158 : vector<16x16xf32> to vector<16x16xbf16>
    %160 = vector.shape_cast %159 : vector<16x16xbf16> to vector<16x2x8xbf16>
    %c6 = arith.constant 6 : index
    %c0_63 = arith.constant 0 : index
    %c0_64 = arith.constant 0 : index
    %c0_65 = arith.constant 0 : index
    %161 = vector.load %arg7[%c6, %c0_63, %c0_64, %c0_65] : memref<9x2x8x8xbf16, #tpu.memory_space<vmem>>, vector<1x2x8x8xbf16>
    %162 = vector.shape_cast %161 : vector<1x2x8x8xbf16> to vector<2x8x8xbf16>
    %cst_66 = arith.constant dense<0.000000e+00> : vector<2x16x8xf32>
    %163 = tpu.matmul %160, %162, %cst_66 {dimension_numbers = #tpu.dot_dimension_numbers<[2], [1], [0], [2], [0, 1, 0, 0, 1, 2], [1], [0]>} : vector<16x2x8xbf16>, vector<2x8x8xbf16>, vector<2x16x8xf32> -> vector<2x16x8xf32>
    %164 = arith.addf %153, %163 : vector<2x16x8xf32>
    %165 = arith.truncf %87 : vector<16x16xf32> to vector<16x16xbf16>
    %166 = vector.shape_cast %165 : vector<16x16xbf16> to vector<16x2x8xbf16>
    %c7 = arith.constant 7 : index
    %c0_67 = arith.constant 0 : index
    %c0_68 = arith.constant 0 : index
    %c0_69 = arith.constant 0 : index
    %167 = vector.load %arg7[%c7, %c0_67, %c0_68, %c0_69] : memref<9x2x8x8xbf16, #tpu.memory_space<vmem>>, vector<1x2x8x8xbf16>
    %168 = vector.shape_cast %167 : vector<1x2x8x8xbf16> to vector<2x8x8xbf16>
    %cst_70 = arith.constant dense<0.000000e+00> : vector<2x16x8xf32>
    %169 = tpu.matmul %166, %168, %cst_70 {dimension_numbers = #tpu.dot_dimension_numbers<[2], [1], [0], [2], [0, 1, 0, 0, 1, 2], [1], [0]>} : vector<16x2x8xbf16>, vector<2x8x8xbf16>, vector<2x16x8xf32> -> vector<2x16x8xf32>
    %170 = arith.addf %164, %169 : vector<2x16x8xf32>
    %171 = vector.extract_strided_slice %87 {offsets = [1, 0], sizes = [15, 16], strides = [1, 1]} : vector<16x16xf32> to vector<15x16xf32>
    %172 = vector.extract_strided_slice %87 {offsets = [0, 0], sizes = [1, 16], strides = [1, 1]} : vector<16x16xf32> to vector<1x16xf32>
    %173 = tpu.concatenate %171, %172 in 0 : vector<15x16xf32>, vector<1x16xf32> -> vector<16x16xf32>
    %174 = vector.broadcast %96 : vector<16x1xf32> to vector<16x16xf32>
    %175 = arith.mulf %173, %174 : vector<16x16xf32>
    %176 = arith.truncf %175 : vector<16x16xf32> to vector<16x16xbf16>
    %177 = vector.shape_cast %176 : vector<16x16xbf16> to vector<16x2x8xbf16>
    %c8 = arith.constant 8 : index
    %c0_71 = arith.constant 0 : index
    %c0_72 = arith.constant 0 : index
    %c0_73 = arith.constant 0 : index
    %178 = vector.load %arg7[%c8, %c0_71, %c0_72, %c0_73] : memref<9x2x8x8xbf16, #tpu.memory_space<vmem>>, vector<1x2x8x8xbf16>
    %179 = vector.shape_cast %178 : vector<1x2x8x8xbf16> to vector<2x8x8xbf16>
    %cst_74 = arith.constant dense<0.000000e+00> : vector<2x16x8xf32>
    %180 = tpu.matmul %177, %179, %cst_74 {dimension_numbers = #tpu.dot_dimension_numbers<[2], [1], [0], [2], [0, 1, 0, 0, 1, 2], [1], [0]>} : vector<16x2x8xbf16>, vector<2x8x8xbf16>, vector<2x16x8xf32> -> vector<2x16x8xf32>
    %181 = arith.addf %170, %180 : vector<2x16x8xf32>
    %182 = vector.extract_strided_slice %181 {offsets = [0, 0, 0], sizes = [1, 16, 8], strides = [1, 1, 1]} : vector<2x16x8xf32> to vector<1x16x8xf32>
    %183 = vector.shape_cast %182 : vector<1x16x8xf32> to vector<16x8xf32>
    %184 = vector.extract_strided_slice %181 {offsets = [1, 0, 0], sizes = [1, 16, 8], strides = [1, 1, 1]} : vector<2x16x8xf32> to vector<1x16x8xf32>
    %185 = vector.shape_cast %184 : vector<1x16x8xf32> to vector<16x8xf32>
    %186 = tpu.concatenate %183, %185 in 1 : vector<16x8xf32>, vector<16x8xf32> -> vector<16x16xf32>
    %187 = vector.shape_cast %186 : vector<16x16xf32> to vector<1x1x16x16xf32>
    %c0_75 = arith.constant 0 : index
    %c0_76 = arith.constant 0 : index
    %c0_77 = arith.constant 0 : index
    %c0_78 = arith.constant 0 : index
    %188 = vector.load %arg8[%c0_75, %c0_76, %c0_77, %c0_78] : memref<1x1x16x16xf32, #tpu.memory_space<vmem>>, vector<1x1x16x16xf32>
    tpu.vector_store %arg8[%c0_75, %c0_76, %c0_77, %c0_78], %187 {strides = array<i32>} : memref<1x1x16x16xf32, #tpu.memory_space<vmem>>, vector<1x1x16x16xf32>,
    %c0_i32_79 = arith.constant 0 : i32
    %189 = arith.cmpi eq, %arg1, %c0_i32_79 : i32
    %190 = arith.extui %189 : i1 to i32
    %c0_i32_80 = arith.constant 0 : i32
    %191 = arith.cmpi ne, %190, %c0_i32_80 : i32
    scf.if %191 {
      %cst_95 = arith.constant 0.000000e+00 : f32
      %205 = vector.broadcast %cst_95 : f32 to vector<1x1x16xf32>
      %c0_96 = arith.constant 0 : index
      %c0_97 = arith.constant 0 : index
      %c0_98 = arith.constant 0 : index
      %206 = vector.load %arg9[%c0_96, %c0_97, %c0_98] : memref<1x1x16xf32, #tpu.memory_space<vmem>>, vector<1x1x16xf32>
      tpu.vector_store %arg9[%c0_96, %c0_97, %c0_98], %205 {strides = array<i32>} : memref<1x1x16xf32, #tpu.memory_space<vmem>>, vector<1x1x16xf32>,
      %cst_99 = arith.constant 0.000000e+00 : f32
      %207 = vector.broadcast %cst_99 : f32 to vector<1x1x16xf32>
      %c0_100 = arith.constant 0 : index
      %c0_101 = arith.constant 0 : index
      %c0_102 = arith.constant 0 : index
      %208 = vector.load %arg10[%c0_100, %c0_101, %c0_102] : memref<1x1x16xf32, #tpu.memory_space<vmem>>, vector<1x1x16xf32>
      tpu.vector_store %arg10[%c0_100, %c0_101, %c0_102], %207 {strides = array<i32>} : memref<1x1x16xf32, #tpu.memory_space<vmem>>, vector<1x1x16xf32>,
    } else {
    }
    %c0_81 = arith.constant 0 : index
    %c0_82 = arith.constant 0 : index
    %c0_83 = arith.constant 0 : index
    %192 = vector.load %arg9[%c0_81, %c0_82, %c0_83] : memref<1x1x16xf32, #tpu.memory_space<vmem>>, vector<1x1x16xf32>
    %cst_84 = arith.constant dense<0.000000e+00> : vector<16xf32>
    %193 = vector.multi_reduction <add>, %186, %cst_84 [0] : vector<16x16xf32> to vector<16xf32>
    %194 = vector.shape_cast %193 : vector<16xf32> to vector<1x16xf32>
    %195 = vector.shape_cast %194 : vector<1x16xf32> to vector<1x1x16xf32>
    %196 = arith.addf %192, %195 : vector<1x1x16xf32>
    %c0_85 = arith.constant 0 : index
    %c0_86 = arith.constant 0 : index
    %c0_87 = arith.constant 0 : index
    %197 = vector.load %arg9[%c0_85, %c0_86, %c0_87] : memref<1x1x16xf32, #tpu.memory_space<vmem>>, vector<1x1x16xf32>
    tpu.vector_store %arg9[%c0_85, %c0_86, %c0_87], %196 {strides = array<i32>} : memref<1x1x16xf32, #tpu.memory_space<vmem>>, vector<1x1x16xf32>,
    %c0_88 = arith.constant 0 : index
    %c0_89 = arith.constant 0 : index
    %c0_90 = arith.constant 0 : index
    %198 = vector.load %arg10[%c0_88, %c0_89, %c0_90] : memref<1x1x16xf32, #tpu.memory_space<vmem>>, vector<1x1x16xf32>
    %199 = arith.mulf %186, %186 : vector<16x16xf32>
    %cst_91 = arith.constant dense<0.000000e+00> : vector<16xf32>
    %200 = vector.multi_reduction <add>, %199, %cst_91 [0] : vector<16x16xf32> to vector<16xf32>
    %201 = vector.shape_cast %200 : vector<16xf32> to vector<1x16xf32>
    %202 = vector.shape_cast %201 : vector<1x16xf32> to vector<1x1x16xf32>
    %203 = arith.addf %198, %202 : vector<1x1x16xf32>
    %c0_92 = arith.constant 0 : index
    %c0_93 = arith.constant 0 : index
    %c0_94 = arith.constant 0 : index
    %204 = vector.load %arg10[%c0_92, %c0_93, %c0_94] : memref<1x1x16xf32, #tpu.memory_space<vmem>>, vector<1x1x16xf32>
    tpu.vector_store %arg10[%c0_92, %c0_93, %c0_94], %203 {strides = array<i32>} : memref<1x1x16xf32, #tpu.memory_space<vmem>>, vector<1x1x16xf32>,
    return
  }
  func.func @transform_0(%arg0: i32, %arg1: i32) -> (i32, i32, i32, i32) {
    %c0_i32 = arith.constant 0 : i32
    %0 = arith.addi %arg1, %c0_i32 : i32
    %c1_i32 = arith.constant 1 : i32
    %1 = arith.subi %0, %c1_i32 : i32
    %c0_i32_0 = arith.constant 0 : i32
    %c15_i32 = arith.constant 15 : i32
    %2 = arith.maxsi %c0_i32_0, %1 : i32
    %3 = arith.minsi %c15_i32, %2 : i32
    %c0_i32_1 = arith.constant 0 : i32
    %c0_i32_2 = arith.constant 0 : i32
    %c0_i32_3 = arith.constant 0 : i32
    return %arg0, %3, %c0_i32_1, %c0_i32_2 : i32, i32, i32, i32
  }
  func.func @transform_1(%arg0: i32, %arg1: i32) -> (i32, i32, i32, i32) {
    %c1_i32 = arith.constant 1 : i32
    %0 = arith.addi %arg1, %c1_i32 : i32
    %c1_i32_0 = arith.constant 1 : i32
    %1 = arith.subi %0, %c1_i32_0 : i32
    %c0_i32 = arith.constant 0 : i32
    %c15_i32 = arith.constant 15 : i32
    %2 = arith.maxsi %c0_i32, %1 : i32
    %3 = arith.minsi %c15_i32, %2 : i32
    %c0_i32_1 = arith.constant 0 : i32
    %c0_i32_2 = arith.constant 0 : i32
    %c0_i32_3 = arith.constant 0 : i32
    return %arg0, %3, %c0_i32_1, %c0_i32_2 : i32, i32, i32, i32
  }
  func.func @transform_2(%arg0: i32, %arg1: i32) -> (i32, i32, i32, i32) {
    %c2_i32 = arith.constant 2 : i32
    %0 = arith.addi %arg1, %c2_i32 : i32
    %c1_i32 = arith.constant 1 : i32
    %1 = arith.subi %0, %c1_i32 : i32
    %c0_i32 = arith.constant 0 : i32
    %c15_i32 = arith.constant 15 : i32
    %2 = arith.maxsi %c0_i32, %1 : i32
    %3 = arith.minsi %c15_i32, %2 : i32
    %c0_i32_0 = arith.constant 0 : i32
    %c0_i32_1 = arith.constant 0 : i32
    %c0_i32_2 = arith.constant 0 : i32
    return %arg0, %3, %c0_i32_0, %c0_i32_1 : i32, i32, i32, i32
  }
  func.func @transform_3(%arg0: i32, %arg1: i32) -> (i32, i32) {
    %c0_i32 = arith.constant 0 : i32
    %c0_i32_0 = arith.constant 0 : i32
    %c0_i32_1 = arith.constant 0 : i32
    return %c0_i32, %c0_i32_0 : i32, i32
  }
  func.func @transform_4(%arg0: i32, %arg1: i32) -> (i32, i32) {
    %c0_i32 = arith.constant 0 : i32
    %c0_i32_0 = arith.constant 0 : i32
    %c0_i32_1 = arith.constant 0 : i32
    return %c0_i32, %c0_i32_0 : i32, i32
  }
  func.func @transform_5(%arg0: i32, %arg1: i32) -> (i32, i32, i32, i32) {
    %c0_i32 = arith.constant 0 : i32
    %c0_i32_0 = arith.constant 0 : i32
    %c0_i32_1 = arith.constant 0 : i32
    %c0_i32_2 = arith.constant 0 : i32
    %c0_i32_3 = arith.constant 0 : i32
    return %c0_i32, %c0_i32_0, %c0_i32_1, %c0_i32_2 : i32, i32, i32, i32
  }
  func.func @transform_6(%arg0: i32, %arg1: i32) -> (i32, i32, i32, i32) {
    %c0_i32 = arith.constant 0 : i32
    %c0_i32_0 = arith.constant 0 : i32
    %c0_i32_1 = arith.constant 0 : i32
    return %arg0, %arg1, %c0_i32, %c0_i32_0 : i32, i32, i32, i32
  }
  func.func @transform_7(%arg0: i32, %arg1: i32) -> (i32, i32, i32) {
    %c0_i32 = arith.constant 0 : i32
    %c0_i32_0 = arith.constant 0 : i32
    %c0_i32_1 = arith.constant 0 : i32
    return %arg0, %c0_i32, %c0_i32_0 : i32, i32, i32
  }
  func.func @transform_8(%arg0: i32, %arg1: i32) -> (i32, i32, i32) {
    %c0_i32 = arith.constant 0 : i32
    %c0_i32_0 = arith.constant 0 : i32
    %c0_i32_1 = arith.constant 0 : i32
    return %arg0, %c0_i32, %c0_i32_0 : i32, i32, i32
  }
}

module attributes {stable_mosaic.version = 11 : i64} {
  func.func @_bn_proj_mlp_kernel(%arg0: i32, %arg1: memref<256x16xf32, #tpu.memory_space<vmem>>, %arg2: memref<256x16xf32, #tpu.memory_space<vmem>>, %arg3: memref<1x16xf32, #tpu.memory_space<vmem>>, %arg4: memref<1x16xf32, #tpu.memory_space<vmem>>, %arg5: memref<16x16xbf16, #tpu.memory_space<vmem>>, %arg6: memref<1x16xf32, #tpu.memory_space<vmem>>, %arg7: memref<1x16xf32, #tpu.memory_space<vmem>>, %arg8: memref<16x64xbf16, #tpu.memory_space<vmem>>, %arg9: memref<1x64xf32, #tpu.memory_space<vmem>>, %arg10: memref<64x16xbf16, #tpu.memory_space<vmem>>, %arg11: memref<1x16xf32, #tpu.memory_space<vmem>>, %arg12: memref<256x16xf32, #tpu.memory_space<vmem>>, %arg13: memref<256x16xf32, #tpu.memory_space<vmem>>) attributes {dimension_semantics = [#tpu.dimension_semantics<parallel>], iteration_bounds = array<i64: 2>, scalar_prefetch = 0 : i64, scratch_operands = 0 : i64, tpu.core_type = #tpu.core_type<tc>, window_params = [{transform_indices = @transform_0, window_bounds = array<i64: 256, 16>}, {transform_indices = @transform_1, window_bounds = array<i64: 256, 16>}, {pipeline_mode = #tpu.pipeline_mode<synchronous>, transform_indices = @transform_2, window_bounds = array<i64: 1, 16>}, {pipeline_mode = #tpu.pipeline_mode<synchronous>, transform_indices = @transform_3, window_bounds = array<i64: 1, 16>}, {pipeline_mode = #tpu.pipeline_mode<synchronous>, transform_indices = @transform_4, window_bounds = array<i64: 16, 16>}, {pipeline_mode = #tpu.pipeline_mode<synchronous>, transform_indices = @transform_5, window_bounds = array<i64: 1, 16>}, {pipeline_mode = #tpu.pipeline_mode<synchronous>, transform_indices = @transform_6, window_bounds = array<i64: 1, 16>}, {pipeline_mode = #tpu.pipeline_mode<synchronous>, transform_indices = @transform_7, window_bounds = array<i64: 16, 64>}, {pipeline_mode = #tpu.pipeline_mode<synchronous>, transform_indices = @transform_8, window_bounds = array<i64: 1, 64>}, {pipeline_mode = #tpu.pipeline_mode<synchronous>, transform_indices = @transform_9, window_bounds = array<i64: 64, 16>}, {pipeline_mode = #tpu.pipeline_mode<synchronous>, transform_indices = @transform_10, window_bounds = array<i64: 1, 16>}, {transform_indices = @transform_11, window_bounds = array<i64: 256, 16>}, {transform_indices = @transform_12, window_bounds = array<i64: 256, 16>}]} {
    %c0 = arith.constant 0 : index
    %c0_0 = arith.constant 0 : index
    %0 = vector.load %arg1[%c0, %c0_0] : memref<256x16xf32, #tpu.memory_space<vmem>>, vector<256x16xf32>
    %c0_1 = arith.constant 0 : index
    %c0_2 = arith.constant 0 : index
    %1 = vector.load %arg3[%c0_1, %c0_2] : memref<1x16xf32, #tpu.memory_space<vmem>>, vector<1x16xf32>
    %2 = vector.broadcast %1 : vector<1x16xf32> to vector<256x16xf32>
    %3 = arith.mulf %0, %2 : vector<256x16xf32>
    %c0_3 = arith.constant 0 : index
    %c0_4 = arith.constant 0 : index
    %4 = vector.load %arg4[%c0_3, %c0_4] : memref<1x16xf32, #tpu.memory_space<vmem>>, vector<1x16xf32>
    %5 = vector.broadcast %4 : vector<1x16xf32> to vector<256x16xf32>
    %6 = arith.addf %3, %5 : vector<256x16xf32>
    %cst = arith.constant 0.000000e+00 : f32
    %7 = vector.broadcast %cst : f32 to vector<256x16xf32>
    %8 = arith.maximumf %6, %7 : vector<256x16xf32>
    %9 = arith.truncf %8 : vector<256x16xf32> to vector<256x16xbf16>
    %c0_5 = arith.constant 0 : index
    %c0_6 = arith.constant 0 : index
    %10 = vector.load %arg5[%c0_5, %c0_6] : memref<16x16xbf16, #tpu.memory_space<vmem>>, vector<16x16xbf16>
    %cst_7 = arith.constant dense<0.000000e+00> : vector<256x16xf32>
    %11 = tpu.matmul %9, %10, %cst_7 {dimension_numbers = #tpu.dot_dimension_numbers<[1], [0], [0], [1], [0, 0, 1, 1], [], []>} : vector<256x16xbf16>, vector<16x16xbf16>, vector<256x16xf32> -> vector<256x16xf32>
    %c0_8 = arith.constant 0 : index
    %c0_9 = arith.constant 0 : index
    %12 = vector.load %arg2[%c0_8, %c0_9] : memref<256x16xf32, #tpu.memory_space<vmem>>, vector<256x16xf32>
    %13 = arith.addf %12, %11 : vector<256x16xf32>
    %c0_10 = arith.constant 0 : index
    %c0_11 = arith.constant 0 : index
    %14 = vector.load %arg12[%c0_10, %c0_11] : memref<256x16xf32, #tpu.memory_space<vmem>>, vector<256x16xf32>
    tpu.vector_store %arg12[%c0_10, %c0_11], %13 {strides = array<i32>} : memref<256x16xf32, #tpu.memory_space<vmem>>, vector<256x16xf32>,
    %cst_12 = arith.constant dense<0.000000e+00> : vector<256xf32>
    %15 = vector.multi_reduction <add>, %13, %cst_12 [1] : vector<256x16xf32> to vector<256xf32>
    %16 = vector.shape_cast %15 : vector<256xf32> to vector<256x1xf32>
    %cst_13 = arith.constant 1.600000e+01 : f32
    %17 = vector.broadcast %cst_13 : f32 to vector<256x1xf32>
    %18 = arith.divf %16, %17 : vector<256x1xf32>
    %19 = vector.broadcast %18 : vector<256x1xf32> to vector<256x16xf32>
    %20 = arith.subf %13, %19 : vector<256x16xf32>
    %21 = arith.mulf %20, %20 : vector<256x16xf32>
    %cst_14 = arith.constant dense<0.000000e+00> : vector<256xf32>
    %22 = vector.multi_reduction <add>, %21, %cst_14 [1] : vector<256x16xf32> to vector<256xf32>
    %23 = vector.shape_cast %22 : vector<256xf32> to vector<256x1xf32>
    %cst_15 = arith.constant 1.600000e+01 : f32
    %24 = vector.broadcast %cst_15 : f32 to vector<256x1xf32>
    %25 = arith.divf %23, %24 : vector<256x1xf32>
    %26 = vector.broadcast %18 : vector<256x1xf32> to vector<256x16xf32>
    %27 = arith.subf %13, %26 : vector<256x16xf32>
    %cst_16 = arith.constant 9.99999974E-6 : f32
    %28 = vector.broadcast %cst_16 : f32 to vector<256x1xf32>
    %29 = arith.addf %25, %28 : vector<256x1xf32>
    %30 = math.rsqrt %29 : vector<256x1xf32>
    %31 = vector.broadcast %30 : vector<256x1xf32> to vector<256x16xf32>
    %32 = arith.mulf %27, %31 : vector<256x16xf32>
    %c0_17 = arith.constant 0 : index
    %c0_18 = arith.constant 0 : index
    %33 = vector.load %arg6[%c0_17, %c0_18] : memref<1x16xf32, #tpu.memory_space<vmem>>, vector<1x16xf32>
    %34 = vector.broadcast %33 : vector<1x16xf32> to vector<256x16xf32>
    %35 = arith.mulf %32, %34 : vector<256x16xf32>
    %c0_19 = arith.constant 0 : index
    %c0_20 = arith.constant 0 : index
    %36 = vector.load %arg7[%c0_19, %c0_20] : memref<1x16xf32, #tpu.memory_space<vmem>>, vector<1x16xf32>
    %37 = vector.broadcast %36 : vector<1x16xf32> to vector<256x16xf32>
    %38 = arith.addf %35, %37 : vector<256x16xf32>
    %39 = arith.truncf %38 : vector<256x16xf32> to vector<256x16xbf16>
    %c0_21 = arith.constant 0 : index
    %c0_22 = arith.constant 0 : index
    %40 = vector.load %arg8[%c0_21, %c0_22] : memref<16x64xbf16, #tpu.memory_space<vmem>>, vector<16x64xbf16>
    %cst_23 = arith.constant dense<0.000000e+00> : vector<256x64xf32>
    %41 = tpu.matmul %39, %40, %cst_23 {dimension_numbers = #tpu.dot_dimension_numbers<[1], [0], [0], [1], [0, 0, 1, 1], [], []>} : vector<256x16xbf16>, vector<16x64xbf16>, vector<256x64xf32> -> vector<256x64xf32>
    %c0_24 = arith.constant 0 : index
    %c0_25 = arith.constant 0 : index
    %42 = vector.load %arg9[%c0_24, %c0_25] : memref<1x64xf32, #tpu.memory_space<vmem>>, vector<1x64xf32>
    %43 = vector.broadcast %42 : vector<1x64xf32> to vector<256x64xf32>
    %44 = arith.addf %41, %43 : vector<256x64xf32>
    %cst_26 = arith.constant 0.000000e+00 : f32
    %45 = vector.broadcast %cst_26 : f32 to vector<256x64xf32>
    %46 = arith.maximumf %44, %45 : vector<256x64xf32>
    %47 = arith.truncf %46 : vector<256x64xf32> to vector<256x64xbf16>
    %c0_27 = arith.constant 0 : index
    %c0_28 = arith.constant 0 : index
    %48 = vector.load %arg10[%c0_27, %c0_28] : memref<64x16xbf16, #tpu.memory_space<vmem>>, vector<64x16xbf16>
    %cst_29 = arith.constant dense<0.000000e+00> : vector<256x16xf32>
    %49 = tpu.matmul %47, %48, %cst_29 {dimension_numbers = #tpu.dot_dimension_numbers<[1], [0], [0], [1], [0, 0, 1, 1], [], []>} : vector<256x64xbf16>, vector<64x16xbf16>, vector<256x16xf32> -> vector<256x16xf32>
    %c0_30 = arith.constant 0 : index
    %c0_31 = arith.constant 0 : index
    %50 = vector.load %arg11[%c0_30, %c0_31] : memref<1x16xf32, #tpu.memory_space<vmem>>, vector<1x16xf32>
    %51 = vector.broadcast %50 : vector<1x16xf32> to vector<256x16xf32>
    %52 = arith.addf %49, %51 : vector<256x16xf32>
    %c0_32 = arith.constant 0 : index
    %c0_33 = arith.constant 0 : index
    %53 = vector.load %arg13[%c0_32, %c0_33] : memref<256x16xf32, #tpu.memory_space<vmem>>, vector<256x16xf32>
    tpu.vector_store %arg13[%c0_32, %c0_33], %52 {strides = array<i32>} : memref<256x16xf32, #tpu.memory_space<vmem>>, vector<256x16xf32>,
    return
  }
  func.func @transform_0(%arg0: i32) -> (i32, i32) {
    %c0_i32 = arith.constant 0 : i32
    %c0_i32_0 = arith.constant 0 : i32
    return %arg0, %c0_i32 : i32, i32
  }
  func.func @transform_1(%arg0: i32) -> (i32, i32) {
    %c0_i32 = arith.constant 0 : i32
    %c0_i32_0 = arith.constant 0 : i32
    return %arg0, %c0_i32 : i32, i32
  }
  func.func @transform_2(%arg0: i32) -> (i32, i32) {
    %c0_i32 = arith.constant 0 : i32
    %c0_i32_0 = arith.constant 0 : i32
    %c0_i32_1 = arith.constant 0 : i32
    return %c0_i32, %c0_i32_0 : i32, i32
  }
  func.func @transform_3(%arg0: i32) -> (i32, i32) {
    %c0_i32 = arith.constant 0 : i32
    %c0_i32_0 = arith.constant 0 : i32
    %c0_i32_1 = arith.constant 0 : i32
    return %c0_i32, %c0_i32_0 : i32, i32
  }
  func.func @transform_4(%arg0: i32) -> (i32, i32) {
    %c0_i32 = arith.constant 0 : i32
    %c0_i32_0 = arith.constant 0 : i32
    %c0_i32_1 = arith.constant 0 : i32
    return %c0_i32, %c0_i32_0 : i32, i32
  }
  func.func @transform_5(%arg0: i32) -> (i32, i32) {
    %c0_i32 = arith.constant 0 : i32
    %c0_i32_0 = arith.constant 0 : i32
    %c0_i32_1 = arith.constant 0 : i32
    return %c0_i32, %c0_i32_0 : i32, i32
  }
  func.func @transform_6(%arg0: i32) -> (i32, i32) {
    %c0_i32 = arith.constant 0 : i32
    %c0_i32_0 = arith.constant 0 : i32
    %c0_i32_1 = arith.constant 0 : i32
    return %c0_i32, %c0_i32_0 : i32, i32
  }
  func.func @transform_7(%arg0: i32) -> (i32, i32) {
    %c0_i32 = arith.constant 0 : i32
    %c0_i32_0 = arith.constant 0 : i32
    %c0_i32_1 = arith.constant 0 : i32
    return %c0_i32, %c0_i32_0 : i32, i32
  }
  func.func @transform_8(%arg0: i32) -> (i32, i32) {
    %c0_i32 = arith.constant 0 : i32
    %c0_i32_0 = arith.constant 0 : i32
    %c0_i32_1 = arith.constant 0 : i32
    return %c0_i32, %c0_i32_0 : i32, i32
  }
  func.func @transform_9(%arg0: i32) -> (i32, i32) {
    %c0_i32 = arith.constant 0 : i32
    %c0_i32_0 = arith.constant 0 : i32
    %c0_i32_1 = arith.constant 0 : i32
    return %c0_i32, %c0_i32_0 : i32, i32
  }
  func.func @transform_10(%arg0: i32) -> (i32, i32) {
    %c0_i32 = arith.constant 0 : i32
    %c0_i32_0 = arith.constant 0 : i32
    %c0_i32_1 = arith.constant 0 : i32
    return %c0_i32, %c0_i32_0 : i32, i32
  }
  func.func @transform_11(%arg0: i32) -> (i32, i32) {
    %c0_i32 = arith.constant 0 : i32
    %c0_i32_0 = arith.constant 0 : i32
    return %arg0, %c0_i32 : i32, i32
  }
  func.func @transform_12(%arg0: i32) -> (i32, i32) {
    %c0_i32 = arith.constant 0 : i32
    %c0_i32_0 = arith.constant 0 : i32
    return %arg0, %c0_i32 : i32, i32
  }
}

</mosaic_0001>

<bundles_post_ra>
// kernel: _lambda_.2
= control target key start
LH: loop header
LB: loop body
LE: loop exit
PB: predicated region body
PF: predicated region fallthrough
CT: control target
= control target key end

     0   :  { %s2386_s27 = smov 0   ;;  %s2388_s28 = smov 0   ;;  %s2700_s0 = inlined_call_operand.vmem [shape: f32[2,16,16,16], index: 0, kind: input, shape index: {}, may-alias: {0,1,2}]   ;;  %s2701_s1 = inlined_call_operand.vmem [shape: f32[2,16,16,16], index: 1, kind: input, shape index: {}, may-alias: {0,1,2}]   ;;  %s2702_s2 = inlined_call_operand.vmem [shape: f32[2,16,16,16], index: 2, kind: input, shape index: {}, may-alias: {0,1,2}]   ;;  %s2703_s3 = inlined_call_operand.vmem [shape: f32[16,1], index: 3, kind: input, shape index: {}]   ;;  %s2704_s4 = inlined_call_operand.vmem [shape: f32[16,1], index: 4, kind: input, shape index: {}]   ;;  %s2705_s5 = inlined_call_operand.vmem [shape: bf16[9,2,8,8], index: 5, kind: input, shape index: {}]   ;;  %s2706_s6 = inlined_call_operand.vmem [shape: f32[2,16,16,16], index: 6, kind: output, shape index: {0}]   ;;  %s2707_s7 = inlined_call_operand.vmem [shape: f32[2,1,16], index: 7, kind: output, shape index: {1}]   ;;  %s2708_s8 = inlined_call_operand.vmem [shape: f32[2,1,16], index: 8, kind: output, shape index: {2}]  }
   0x1   :  { %2709 = sst [smem:[#allocation2_spill]] %s2703_s3  ;;  %s2390_s29 = smov 0  }
   0x2   :  { %2710 = sst [smem:[#allocation3_spill]] %s2704_s4  ;;  %s2392_s30 = smov 0  }
   0x3   :  { %2711 = sst [smem:[#allocation4_spill]] %s2707_s7  ;;  %s2394_s9 = smov 0  }
   0x4 LB: > { %s28_s10 = sadd.s32 1, %s2325_s29  ;;  %s31_s11 = sadd.s32 1, %s2329_s30  ;;  %s2333_s9 = sphi %s2394_s9, %s19_s9   ;;  %s2329_s30 = sphi %s2392_s30, %s2718_s30   ;;  %s2325_s29 = sphi %s2390_s29, %s2717_s29   ;;  %s2321_s28 = sphi %s2388_s28, %s2716_s28   ;;  %s2317_s27 = sphi %s2386_s27, %s2715_s27  }
   0x5   : > { %p29_p0 = scmp.ge.s32.totalorder %s28_s10, 16  ;;  %p1948_p1 = scmp.ge.s32.totalorder %s2333_s9, 1 }
   0x6   : > { %p375_p2 = scmp.lt.s32.totalorder %s2333_s9, 33 }
   0x7   : > { %s2720_s10 = smov (%p29_p0, %s28_s10), 0  ;;  %s2722_s11 = smov (!%p29_p0, %s31_s11), %s2329_s30 }
   0x8   : > { %p376_p3 = pnand %p1948_p1, %p375_p2  ;;  %p33_p4 = scmp.ge.s32.totalorder %s2722_s11, 2 }
   0x9   : > { %s2712_s4 = sld [smem:[#allocation3_spill]] (!%p376_p3)  ;;  %s2713_s3 = sld [smem:[#allocation2_spill]] (!%p376_p3)  ;;  %v2335_v2 = vmov (!%p376_p3), 0   ;;  %v1978_v5 = vld [vmem:[%s2705_s5 + $0x8] sm:$0xf] (!%p376_p3)  ;;  %vm710_vm0 = vcmask (!%p376_p3), 1043456  }
   0xa   : > { %s2724_s11 = smov (%p33_p4, %s2722_s11), 0  ;;  %379 = sbr.rel (%p376_p3) target bundleno = 719 (0x2cf), region = 44 }
   0xb   : > { %s455_s16 = sadd.s32 (!%p376_p3), 4294967295, %s2317_s27  ;;  %p460_p5 = scmp.lt.s32.totalorder (!%p376_p3), %s2321_s28, 1  ;;  %2288 = vset.pattern.permute.xlu1 (!%p376_p3), %v2335_v2  ;;  %2287 = vset.pattern.permute.xlu0 (!%p376_p3), %v2335_v2  ;;  %v2336_v6 = vmov (!%p376_p3), 0.0   ;;  %v712_v7 = vsel (!%p376_p3), %vm710_vm0, %v1978_v5, 0  ;;  %vm2337_vm1 = vmmov (!%p376_p3), 0   ;;  %vm528_vm2 = vcmask (!%p376_p3), 130048  }
   0xc   : > { %p456_p6 = scmp.gt.s32.totalorder (!%p376_p3), %s455_s16, 0  ;;  %p1949_p7 = scmp.lt.s32.totalorder (!%p376_p3), %s455_s16, 15  ;;  %2069 = vmatprep.subr.bf16.mxu0 (!%p376_p3), %v2336_v6  ;;  %2075 = vmatprep.subr.bf16.mxu1 (!%p376_p3), %v2336_v6  ;;  %vm706_vm4 = vcmask (!%p376_p3), 64512   ;;  %vm685_vm6 = vcmask (!%p376_p3), 1040384   ;;  %vm896_vm7 = vcmask (!%p376_p3), 1046528  }
   0xd   : > { %p474_p8 = scmp.gt.s32.totalorder (!%p376_p3), %s2317_s27, 0  ;;  %p1957_p10 = scmp.lt.s32.totalorder (!%p376_p3), %s2317_s27, 15  ;;  %2070 = vmatpush3.bf16.msra.mxu0 (!%p376_p3), %v712_v7  ;;  %2071 = vmatprep.mubr.msk.bf16.mxu0 (!%p376_p3), %vm2337_vm1, %v2336_v6 }
   0xe   : > { %s491_s22 = sadd.s32 (!%p376_p3), 1, %s2317_s27  ;;  %s2714_s7 = sld [smem:[#allocation4_spill]] (!%p376_p3)  ;;  %2081 = vmatprep.subr.bf16.mxu0 (!%p376_p3), %v2336_v6  ;;  %2077 = vmatprep.mubr.msk.bf16.mxu1 (!%p376_p3), %vm2337_vm1, %v2336_v6 }
   0xf   : > { %v572_v0 = vld [vmem:[%s2712_s4] sm:$0xff] (!%p376_p3)  ;;  %v573_v3 = vld [vmem:[%s2712_s4 + $0x8] sm:$0xff] (!%p376_p3)  ;;  %p492_p12 = scmp.gt.s32.totalorder (!%p376_p3), %s491_s22, 0  ;;  %p1965_p13 = scmp.lt.s32.totalorder (!%p376_p3), %s491_s22, 15 }
  0x10   : > { %v558_v1 = vld [vmem:[%s2713_s3] sm:$0xff] (!%p376_p3)  ;;  %576 = vperm.xlu1 (!%p376_p3), %2288, %v572_v0   ;;  %v559_v4 = vld [vmem:[%s2713_s3 + $0x8] sm:$0xff] (!%p376_p3)  ;;  %s2339_s12 = smov (!%p376_p3), 8   ;;  %p2012_p1 = scmp.ne.s32.totalorder (!%p376_p3), %s2317_s27, 0 }
  0x11   : > { %562 = vperm.xlu0 %2287, %v558_v1   ;;  %s2726_s28 = smov (!%p460_p5, %s2321_s28), 1  ;;  %s2728_s16 = smov (!%p456_p6, %s455_s16), 0 }
  0x12   : > { %s2730_s16 = smov (!%p1949_p7, %s2728_s16), 15  ;;  %s2451_s14 = sshll.u32 %s2726_s28, 5  ;;  %vm1697_vm8 = vcmask (!%p2012_p1), 122880  }
  0x13   : > { %s475_s21 = scalar_select %p474_p8, %s2317_s27, 0 }
  0x14   : > { %581 = vperm.xlu1 %2288, %v573_v3   ;;  %p462_p9 = scmp.lt.s32.totalorder %s2730_s16, 15  ;;  %s2443_s25 = scalar_lea.vmem %s2714_s7, %s2726_s28 }
  0x15   : > { %567 = vperm.xlu0 %2287, %v559_v4   ;;  %s2734_s21 = smov (!%p1957_p10, %s475_s21), 15  ;;  %s2466_s18 = scalar_lea.vmem %s2708_s8, %s2726_s28 }
  0x16   : > { %s2732_s16 = smov (!%p462_p9, %s2730_s16), 15  ;;  %p480_p11 = scmp.lt.s32.totalorder %s2734_s21, 15 }
  0x17   : > { %s1954_s13 = sshll.u32 %s2732_s16, 1 }
  0x18   : > { %s466_s15 = sadd.s32 %s2451_s14, %s1954_s13  ;;  %s2736_s21 = smov (!%p480_p11, %s2734_s21), 15 }
  0x19   : > { %s493_s19 = scalar_select %p492_p12, %s491_s22, 0 }
  0x1a   : > { %s1962_s20 = sshll.u32 %s2736_s21, 1  ;;  %s1956_s23 = sshll.u32 %s466_s15, 3 }
  0x1b   : > { %s484_s24 = sadd.s32 %s1962_s20, %s2451_s14  ;;  %s2738_s19 = smov (!%p1965_p13, %s493_s19), 15 }
  0x1c   : > { %p498_p0 = scmp.lt.s32.totalorder %s2738_s19, 15  ;;  %s468_s3 = scalar_lea.vmem %s2700_s0, %s1956_s23 }
  0x1d   : > { %s1964_s4 = sshll.u32 %s484_s24, 3  ;;  %v526_v8 = vld [vmem:[%s468_s3] sm:$0xff]  ;;  %v527_v9 = vld [vmem:[%s468_s3 + $0x8] sm:$0xff]  ;;  %s2338_s13 = smov 120  }
  0x1e   : > { %s2740_s19 = smov (!%p498_p0, %s2738_s19), 15  ;;  %s486_s16 = scalar_lea.vmem %s2701_s1, %s1964_s4  ;;  %v529_v11 = vsel %vm528_vm2, %v526_v8, 0.0  ;;  %v530_v12 = vsel %vm528_vm2, %v527_v9, 0.0 }
  0x1f   : > { %s1970_s28 = sshll.u32 %s2740_s19, 1  ;;  %v592_v10 = vld [vmem:[%s486_s16] sm:$0xff]  ;;  %v593_v13 = vld [vmem:[%s486_s16 + $0x8] sm:$0xff]  ;;  %v531_v18 = vadd.f32 %v530_v12, %v529_v11 }
  0x20   : > { %s502_s17 = sadd.s32 %s1970_s28, %s2451_s14  ;;  %v594_v19 = vsel %vm528_vm2, %v592_v10, 0.0  ;;  %v595_v20 = vsel %vm528_vm2, %v593_v13, 0.0 }
  0x21   : > { %s1972_s21 = sshll.u32 %s502_s17, 3  ;;  %v596_v22 = vadd.f32 %v595_v20, %v594_v19  ;;  %v532_v23 = vrot.slane %v531_v18, 4 }
  0x22   : > { %s504_s20 = scalar_lea.vmem %s2702_s2, %s1972_s21 }
  0x23   : > { %v626_v14 = vld [vmem:[%s504_s20] sm:$0xff]  ;;  %v627_v15 = vld [vmem:[%s504_s20 + $0x8] sm:$0xff]  ;;  %v597_v25 = vrot.slane %v596_v22, 4  ;;  %v533_v26 = vadd.f32 %v532_v23, %v531_v18  ;;  %s587_s7 = scalar_select %p474_p8, 1, 0 }
  0x24   : > { %v628_v16 = vsel %vm528_vm2, %v626_v14, 0.0  ;;  %v629_v17 = vsel %vm528_vm2, %v627_v15, 0.0  ;;  %s661_s19 = scalar_select %p1957_p10, 1, 0 }
  0x25   : > { %v630_v21 = vadd.f32 %v629_v17, %v628_v16  ;;  %v598_v28 = vadd.f32 %v597_v25, %v596_v22  ;;  %v534_v29 = vrot.slane %v533_v26, 2  ;;  %v1979_v25 = vld [vmem:[%s2705_s5 + $0xc] sm:$0xf]  ;;  %s588_s23 = scvt.s32.f32 %s587_s7 }
  0x26   : > { %s662_s24 = scvt.s32.f32 %s661_s19 }
  0x27   : > { %v631_v24 = vrot.slane %v630_v21, 4  ;;  %v599_v31 = vrot.slane %v598_v28, 2  ;;  %v535_v32 = vadd.f32 %v534_v29, %v533_v26  ;;  %v759_v26 = vsel %vm710_vm0, %v1979_v25, 0 }
  0x28   : > { %2076 = vmatpush3.bf16.msra.mxu1 %v759_v26 }
  0x29   : > { %v632_v27 = vadd.f32 %v631_v24, %v630_v21  ;;  %v600_v34 = vadd.f32 %v599_v31, %v598_v28  ;;  %v536_v35 = vrot.slane %v535_v32, 1  ;;  %2087 = vmatprep.subr.bf16.mxu1 %v2336_v6 }
  0x2b   : > { %v633_v30 = vrot.slane %v632_v27, 2  ;;  %v601_v37 = vrot.slane %v600_v34, 1  ;;  %v537_v38 = vadd.f32 %v536_v35, %v535_v32 }
  0x2d   : > { %v634_v33 = vadd.f32 %v633_v30, %v632_v27  ;;  %v602_v40 = vadd.f32 %v601_v37, %v600_v34  ;;  %v539_v41 = vmul.f32 0.0625, %v537_v38  ;;  %v666_v30 = vlaneseq }
  0x2f   : > { %v635_v36 = vrot.slane %v634_v33, 1  ;;  %v603_v43 = vmul.f32 0.0625, %v602_v40  ;;  %v540_v44 = vsub.f32 %v526_v8, %v539_v41  ;;  %v2485_v45 = vsub.f32 %v527_v9, %v539_v41 }
  0x30   : > { %v667_v37 = vshrl.u32 %v666_v30, 7 }
  0x31   : > { %v636_v39 = vadd.f32 %v635_v36, %v634_v33  ;;  %v604_v48 = vsub.f32 %v592_v10, %v603_v43  ;;  %v605_v49 = vsub.f32 %v593_v13, %v603_v43  ;;  %v542_v50 = vmul.f32 %v540_v44, %v540_v44 }
  0x32   : > { %v543_v51 = vmul.f32 %v2485_v45, %v2485_v45  ;;  %vm669_vm5 = vcmp.ge.s32.totalorder %v667_v37, 1 }
  0x33   : > { %v637_v42 = vmul.f32 0.0625, %v636_v39  ;;  %v606_v54 = vmul.f32 %v604_v48, %v604_v48  ;;  %v607_v55 = vmul.f32 %v605_v49, %v605_v49  ;;  %v544_v56 = vsel %vm528_vm2, %v542_v50, 0.0 }
  0x34   : > { %v545_v57 = vsel %vm528_vm2, %v543_v51, 0.0  ;;  %v589_v50 = vstv %s588_s23 }
  0x35   : > { %v638_v46 = vsub.f32 %v626_v14, %v637_v42  ;;  %v2487_v47 = vsub.f32 %v627_v15, %v637_v42  ;;  %v546_v60 = vadd.f32 %v545_v57, %v544_v56  ;;  %v608_v61 = vsel %vm528_vm2, %v606_v54, 0.0 }
  0x36   : > { %v609_v62 = vsel %vm528_vm2, %v607_v55, 0.0  ;;  %v663_v57 = vstv %s662_s24 }
  0x37   : > { %v640_v52 = vmul.f32 %v638_v46, %v638_v46  ;;  %v641_v53 = vmul.f32 %v2487_v47, %v2487_v47  ;;  %v610_v0 = vadd.f32 %v609_v62, %v608_v61  ;;  %v547_v1 = vrot.slane %v546_v60, 4 }
  0x39   : > { %v642_v58 = vsel %vm528_vm2, %v640_v52, 0.0  ;;  %v643_v59 = vsel %vm528_vm2, %v641_v53, 0.0  ;;  %v611_v3 = vrot.slane %v610_v0, 4  ;;  %v548_v4 = vadd.f32 %v547_v1, %v546_v60 }
  0x3a   : > { %v644_v63 = vadd.f32 %v643_v59, %v642_v58 }
  0x3b   : > { %v612_v7 = vadd.f32 %v611_v3, %v610_v0  ;;  %v549_v8 = vrot.slane %v548_v4, 2 }
  0x3c   : > { %v645_v2 = vrot.slane %v644_v63, 4 }
  0x3d   : > { %v613_v10 = vrot.slane %v612_v7, 2  ;;  %v550_v11 = vadd.f32 %v549_v8, %v548_v4 }
  0x3e   : > { %v646_v5 = vadd.f32 %v645_v2, %v644_v63 }
  0x3f   : > { %v614_v13 = vadd.f32 %v613_v10, %v612_v7  ;;  %v551_v14 = vrot.slane %v550_v11, 1  ;;  %v1976_v10 = vsel %vm669_vm5, 1.0, %v2336_v6 }
  0x40   : > { %v647_v9 = vrot.slane %v646_v5, 2 }
  0x41   : > { %v615_v16 = vrot.slane %v614_v13, 1  ;;  %v552_v17 = vadd.f32 %v551_v14, %v550_v11 }
  0x42   : > { %v648_v12 = vadd.f32 %v647_v9, %v646_v5 }
  0x43   : > { %v616_v19 = vadd.f32 %v615_v16, %v614_v13  ;;  %v553_v20 = vmul.f32 0.0625, %v552_v17 }
  0x44   : > { %v649_v15 = vrot.slane %v648_v12, 1 }
  0x45   : > { %v617_v22 = vmul.f32 0.0625, %v616_v19  ;;  %v554_v23 = vadd.f32 1e-05, %v553_v20 }
  0x46   : > { %v650_v18 = vadd.f32 %v649_v15, %v648_v12 }
  0x47   : > { %v618_v27 = vadd.f32 1e-05, %v617_v22  ;;  %2289 = vrsqrt.f32 %v554_v23 }
  0x48   : > { %v651_v21 = vmul.f32 0.0625, %v650_v18 }
  0x4a   : > { %v652_v24 = vadd.f32 1e-05, %v651_v21 }
  0x4c   : > { %2291 = vrsqrt.f32 %v652_v24 }
  0x4d   : > { %2293 = vrsqrt.f32 %v618_v27 }
  0x51   : > { %v2290_v28 = vpop.eup %2289 }
  0x52   : > { %v556_v32 = vmul.f32 %v2290_v28, %v540_v44  ;;  %v557_v39 = vmul.f32 %v2290_v28, %v2485_v45  ;;  %v697_v45 = vld [vmem:[%s2705_s5] sm:$0xf] }
  0x53   : > { %v806_v63 = vsel %vm710_vm0, %v697_v45, 0 }
  0x56   : > { %v2292_v29 = vpop.eup %2291 }
  0x57   : > { %v2294_v31 = vpop.eup %2293  ;;  %v654_v33 = vmul.f32 %v2292_v29, %v638_v46  ;;  %v655_v42 = vmul.f32 %v2292_v29, %v2487_v47  ;;  %v668_v46 = vadd.s32 8, %v667_v37 }
  0x58   : > { %v620_v36 = vmul.f32 %v2294_v31, %v604_v48  ;;  %v621_v40 = vmul.f32 %v2294_v31, %v605_v49  ;;  %v1984_v31 = vld [vmem:[%s2705_s5 + $0x10] sm:$0xf] }
  0x59   : > { %vm676_vm3 = vcmp.le.s32.totalorder %v668_v46, 14 }
  0x5a   : > { %v1977_v8 = vsel %vm676_vm3, 1.0, %v2336_v6 }
  0x8f   : > { %v577_v34 = vpop.permute.xlu1 %576 }
  0x90   : > { %v563_v35 = vpop.permute.xlu0 %562 }
  0x91   : > { %v570_v38 = vmul.f32 %v563_v35, %v556_v32  ;;  %v656_v41 = vmul.f32 %v654_v33, %v563_v35  ;;  %v622_v51 = vmul.f32 %v620_v36, %v563_v35  ;;  %v917_v36 = vsel %vm710_vm0, %v1984_v31, 0 }
  0x93   : > { %v584_v43 = vadd.f32 %v577_v34, %v570_v38  ;;  %v658_v54 = vadd.f32 %v656_v41, %v577_v34  ;;  %v582_v55 = vpop.permute.xlu1 %581  ;;  %v624_v47 = vadd.f32 %v622_v51, %v577_v34 }
  0x94   : > { %v568_v44 = vpop.permute.xlu0 %567 }
  0x95   : > { %v571_v52 = vmul.f32 %v568_v44, %v557_v39  ;;  %v623_v53 = vmul.f32 %v621_v40, %v568_v44  ;;  %v657_v56 = vmul.f32 %v655_v42, %v568_v44  ;;  %v590_v48 = vmul.f32 %v589_v50, %v584_v43  ;;  %v1992_v44 = vld [vmem:[%s2705_s5 + $0x20] sm:$0xf] }
  0x96   : > { %v664_v61 = vmul.f32 %v663_v57, %v658_v54  ;;  %v1015_v7 = vrot.slane %v624_v47, 7  ;;  %v1232_v21 = vrot.slane %v624_v47, 1  ;;  %v1138_v46 = vsel %vm710_vm0, %v1992_v44, 0  ;;  %v2000_v54 = vld [vmem:[%s2705_s5 + $0x30] sm:$0xf] }
  0x97   : > { %v585_v58 = vadd.f32 %v582_v55, %v571_v52  ;;  %v625_v59 = vadd.f32 %v623_v53, %v582_v55  ;;  %v659_v49 = vadd.f32 %v657_v56, %v582_v55  ;;  %v897_v2 = vrot.slane %v590_v48, 1  ;;  %v1996_v52 = vld [vmem:[%s2705_s5 + $0x28] sm:$0xf]  ;;  %v2004_v56 = vld [vmem:[%s2705_s5 + $0x38] sm:$0xf] }
  0x98   : > { %v686_v5 = vrot.slane %v590_v48, 7  ;;  %v1350_v18 = vrot.slane %v664_v61, 7  ;;  %v1567_v27 = vrot.slane %v664_v61, 1  ;;  %v1252_v53 = vsel %vm710_vm0, %v1996_v52, 0 }
  0x99   : > { %v591_v60 = vmul.f32 %v589_v50, %v585_v58  ;;  %v665_v62 = vmul.f32 %v663_v57, %v659_v49  ;;  %v1012_v0 = vrot.slane %v625_v59, 7  ;;  %v1233_v15 = vrot.slane %v625_v59, 1  ;;  %v1988_v50 = vld [vmem:[%s2705_s5 + $0x18] sm:$0xf]  ;;  %v2008_v57 = vld [vmem:[%s2705_s5 + $0x40] sm:$0xf] }
  0x9a   : > { %v1127_v28 = vpack.c.bf16 %v625_v59, %v624_v47  ;;  %v1033_v51 = vsel %vm710_vm0, %v1988_v50, 0  ;;  %v1368_v55 = vsel %vm710_vm0, %v2000_v54, 0  ;;  %v1587_v58 = vsel %vm710_vm0, %v2008_v57, 0  ;;  %v698_v59 = vld [vmem:[%s2705_s5 + $0x4] sm:$0xf] }
  0x9b   : > { %v699_v1 = vpack.c.bf16 %v591_v60, %v590_v48  ;;  %v898_v3 = vrot.slane %v591_v60, 1  ;;  %v682_v4 = vrot.slane %v591_v60, 7  ;;  %v1347_v11 = vrot.slane %v665_v62, 7  ;;  %v1985_v49 = vld [vmem:[%s2705_s5 + $0x14] sm:$0xf] }
  0x9c   : > { %v1019_v14 = vsel %vm685_vm6, %v1012_v0, %v1015_v7  ;;  %v1568_v25 = vrot.slane %v665_v62, 1  ;;  %v1238_v26 = vsel %vm896_vm7, %v1233_v15, %v1232_v21  ;;  %v1016_v29 = vsel %vm685_vm6, %v1015_v7, %v1012_v0 }
  0x9d   : > { %701 = vrot.lane.b32.xlu0 %v699_v1, %s2338_s13  ;;  %2072 = vmatmul.mubr.msk.bf16.vlgmr.msra.gmra.mrb[0].mxu0 %vm706_vm4, %v699_v1  ;;  %v903_v9 = vsel %vm896_vm7, %v898_v3, %v897_v2  ;;  %v690_v13 = vsel %vm685_vm6, %v682_v4, %v686_v5  ;;  %v899_v16 = vsel %vm896_vm7, %v897_v2, %v898_v3  ;;  %v1473_v48 = vsel %vm710_vm0, %v2004_v56, 0  ;;  %v1993_v1 = vld [vmem:[%s2705_s5 + $0x24] sm:$0xf] }
  0x9e   : > { %v905_v12 = vmul.f32 %v1977_v8, %v903_v9  ;;  %2082 = vmatpush3.bf16.msra.mxu0 %v806_v63  ;;  %2083 = vmatprep.mubr.msk.bf16.mxu0 %vm2337_vm1, %v2336_v6  ;;  %v691_v17 = vmul.f32 %v1976_v10, %v690_v13  ;;  %v687_v20 = vsel %vm685_vm6, %v686_v5, %v682_v4  ;;  %v853_v45 = vsel %vm710_vm0, %v698_v59, 0  ;;  %v1997_v4 = vld [vmem:[%s2705_s5 + $0x2c] sm:$0xf] }
  0x9f   : > { %2093 = vmatprep.subr.bf16.mxu0 %v2336_v6  ;;  %v1020_v23 = vmul.f32 %v1976_v10, %v1019_v14  ;;  %v1354_v24 = vsel %vm685_vm6, %v1347_v11, %v1350_v18  ;;  %v1240_v33 = vmul.f32 %v1977_v8, %v1238_v26  ;;  %v1573_v34 = vsel %vm896_vm7, %v1568_v25, %v1567_v27  ;;  %v2009_v14 = vld [vmem:[%s2705_s5 + $0x44] sm:$0xf] }
  0xa0   : > { %v906_v19 = vpack.c.bf16 %v905_v12, %v899_v16  ;;  %v693_v22 = vpack.c.bf16 %v687_v20, %v691_v17  ;;  %v1355_v30 = vmul.f32 %v1976_v10, %v1354_v24  ;;  %v1351_v35 = vsel %vm685_vm6, %v1350_v18, %v1347_v11  ;;  %v2005_v11 = vld [vmem:[%s2705_s5 + $0x3c] sm:$0xf] }
  0xa1   : > { %v1022_v32 = vpack.c.bf16 %v1016_v29, %v1020_v23  ;;  %v1234_v38 = vsel %vm896_vm7, %v1232_v21, %v1233_v15  ;;  %v1575_v39 = vmul.f32 %v1977_v8, %v1573_v34  ;;  %v1569_v41 = vsel %vm896_vm7, %v1567_v27, %v1568_v25  ;;  %v2001_v8 = vld [vmem:[%s2705_s5 + $0x34] sm:$0xf] }
  0xa2   : > { %908 = vrot.lane.b32.xlu0 %v906_v19, %s2338_s13  ;;  %695 = vrot.lane.b32.xlu1 %v693_v22, %s2338_s13  ;;  %v1357_v37 = vpack.c.bf16 %v1351_v35, %v1355_v30  ;;  %v1241_v40 = vpack.c.bf16 %v1240_v33, %v1234_v38  ;;  %v1462_v43 = vpack.c.bf16 %v665_v62, %v664_v61  ;;  %v964_v60 = vsel %vm710_vm0, %v1985_v49, 0  ;;  %v1989_v62 = vld [vmem:[%s2705_s5 + $0x1c] sm:$0xf] }
  0xa3   : > { %v1576_v42 = vpack.c.bf16 %v1575_v39, %v1569_v41  ;;  %v1080_v63 = vsel %vm710_vm0, %v1989_v62, 0  ;;  %v1185_v2 = vsel %vm710_vm0, %v1993_v1, 0  ;;  %v1299_v5 = vsel %vm710_vm0, %v1997_v4, 0 }
  0xa4   : > { %v1415_v9 = vsel %vm710_vm0, %v2001_v8, 0  ;;  %v1520_v12 = vsel %vm710_vm0, %v2005_v11, 0  ;;  %v1634_v15 = vsel %vm710_vm0, %v2009_v14, 0  ;;  %v2340_v29 = vmov (!%p2012_p1), 0.0  }
  0xa5   : > { %1698 = vst.msk [vmem:[%s2443_s25] sm:$0x1] (!%p2012_p1), %vm1697_vm8, %v2340_v29  ;;  %1699 = vst.msk [vmem:[%s2466_s18] sm:$0x1] (!%p2012_p1), %vm1697_vm8, %v2340_v29 }
  0xa6   : > { %1129 = vrot.lane.b32.xlu0 %v1127_v28, %s2338_s13  ;;  %1024 = vrot.lane.b32.xlu1 %v1022_v32, %s2338_s13 }
  0xa9   : > { %2084 = vmatmul.mubr.msk.bf16.vlgmr.msra.gmra.mrb[0].mxu0 %vm706_vm4, %v693_v22 }
  0xaa   : > { %1359 = vrot.lane.b32.xlu0 %v1357_v37, %s2338_s13  ;;  %2094 = vmatpush3.bf16.msra.mxu0 %v917_v36 }
  0xab   : > { %1243 = vrot.lane.b32.xlu1 %v1241_v40, %s2338_s13  ;;  %2095 = vmatprep.mubr.msk.bf16.mxu0 %vm2337_vm1, %v2336_v6 }
  0xac   : > { %2105 = vmatprep.subr.bf16.mxu0 %v2336_v6 }
  0xae   : > { %1578 = vrot.lane.b32.xlu0 %v1576_v42, %s2338_s13 }
  0xaf   : > { %1464 = vrot.lane.b32.xlu1 %v1462_v43, %s2338_s13  ;;  %s513_s13 = scalar_select %p1957_p10, %s2317_s27, 15 }
  0xb1   : > { %s1973_s16 = sshll.u32 %s513_s13, 1 }
  0xb2   : > { %s516_s28 = sadd.s32 %s1973_s16, %s2451_s14 }
  0xb3   : > { %s1975_s17 = sshll.u32 %s516_s28, 3 }
  0xb4   : > { %s518_s15 = scalar_lea.vmem %s2706_s6, %s1975_s17 }
  0xb5   : > { %2096 = vmatmul.mubr.msk.bf16.vlgmr.msra.gmra.mrb[0].mxu0 %vm706_vm4, %v906_v19 }
  0xb6   : > { %2106 = vmatpush3.bf16.msra.mxu0 %v1033_v51  ;;  %2107 = vmatprep.mubr.msk.bf16.mxu0 %vm2337_vm1, %v2336_v6 }
  0xb7   : > { %2117 = vmatprep.subr.bf16.mxu0 %v2336_v6 }
  0xc1   : > { %2108 = vmatmul.mubr.msk.bf16.vlgmr.msra.gmra.mrb[0].mxu0 %vm706_vm4, %v1022_v32 }
  0xc2   : > { %2118 = vmatpush3.bf16.msra.mxu0 %v1138_v46  ;;  %2119 = vmatprep.mubr.msk.bf16.mxu0 %vm2337_vm1, %v2336_v6 }
  0xc3   : > { %2129 = vmatprep.subr.bf16.mxu0 %v2336_v6 }
  0xcd   : > { %2120 = vmatmul.mubr.msk.bf16.vlgmr.msra.gmra.mrb[0].mxu0 %vm706_vm4, %v1127_v28 }
  0xce   : > { %2130 = vmatpush3.bf16.msra.mxu0 %v1252_v53  ;;  %2131 = vmatprep.mubr.msk.bf16.mxu0 %vm2337_vm1, %v2336_v6 }
  0xcf   : > { %2141 = vmatprep.subr.bf16.mxu0 %v2336_v6 }
  0xd9   : > { %2132 = vmatmul.mubr.msk.bf16.vlgmr.msra.gmra.mrb[0].mxu0 %vm706_vm4, %v1241_v40 }
  0xda   : > { %2142 = vmatpush3.bf16.msra.mxu0 %v1368_v55  ;;  %2143 = vmatprep.mubr.msk.bf16.mxu0 %vm2337_vm1, %v2336_v6 }
  0xdb   : > { %2153 = vmatprep.subr.bf16.mxu0 %v2336_v6 }
  0xe5   : > { %2144 = vmatmul.mubr.msk.bf16.vlgmr.msra.gmra.mrb[0].mxu0 %vm706_vm4, %v1357_v37 }
  0xe6   : > { %2154 = vmatpush3.bf16.msra.mxu0 %v1473_v48  ;;  %2155 = vmatprep.mubr.msk.bf16.mxu0 %vm2337_vm1, %v2336_v6 }
  0xe7   : > { %2165 = vmatprep.subr.bf16.mxu0 %v2336_v6 }
  0xf1   : > { %2156 = vmatmul.mubr.msk.bf16.vlgmr.msra.gmra.mrb[0].mxu0 %vm706_vm4, %v1462_v43 }
  0xf2   : > { %2166 = vmatpush3.bf16.msra.mxu0 %v1587_v58  ;;  %2167 = vmatprep.mubr.msk.bf16.mxu0 %vm2337_vm1, %v2336_v6 }
  0xfd   : > { %2168 = vmatmul.mubr.msk.bf16.vlgmr.msra.gmra.mrb[0].mxu0 %vm706_vm4, %v1576_v42 }
 0x10f   : > { %v702_v47 = vpop.permute.xlu0 %701 }
 0x110   : > { %2078 = vmatmul.mubr.msk.bf16.vlgmr.msra.gmra.mrb[0].mxu1 %vm706_vm4, %v702_v47 }
 0x111   : > { %2088 = vmatpush3.bf16.msra.mxu1 %v853_v45  ;;  %2089 = vmatprep.mubr.msk.bf16.mxu1 %vm2337_vm1, %v2336_v6 }
 0x112   : > { %2099 = vmatprep.subr.bf16.mxu1 %v2336_v6 }
 0x114   : > { %v696_v61 = vpop.permute.xlu1 %695  ;;  %v909_v0 = vpop.permute.xlu0 %908 }
 0x118   : > { %v1025_v3 = vpop.permute.xlu1 %1024  ;;  %v1130_v7 = vpop.permute.xlu0 %1129 }
 0x11c   : > { %2090 = vmatmul.mubr.msk.bf16.vlgmr.msra.gmra.mrb[0].mxu1 %vm706_vm4, %v696_v61  ;;  %v1360_v13 = vpop.permute.xlu0 %1359 }
 0x11d   : > { %2100 = vmatpush3.bf16.msra.mxu1 %v964_v60  ;;  %2101 = vmatprep.mubr.msk.bf16.mxu1 %vm2337_vm1, %v2336_v6  ;;  %v1244_v10 = vpop.permute.xlu1 %1243 }
 0x11e   : > { %2111 = vmatprep.subr.bf16.mxu1 %v2336_v6 }
 0x120   : > { %v1579_v17 = vpop.permute.xlu0 %1578 }
 0x121   : > { %v1465_v16 = vpop.permute.xlu1 %1464 }
 0x128   : > { %2102 = vmatmul.mubr.msk.bf16.vlgmr.msra.gmra.mrb[0].mxu1 %vm706_vm4, %v909_v0 }
 0x129   : > { %2112 = vmatpush3.bf16.msra.mxu1 %v1080_v63  ;;  %2113 = vmatprep.mubr.msk.bf16.mxu1 %vm2337_vm1, %v2336_v6 }
 0x12a   : > { %2123 = vmatprep.subr.bf16.mxu1 %v2336_v6 }
 0x134   : > { %2114 = vmatmul.mubr.msk.bf16.vlgmr.msra.gmra.mrb[0].mxu1 %vm706_vm4, %v1025_v3 }
 0x135   : > { %2124 = vmatpush3.bf16.msra.mxu1 %v1185_v2  ;;  %2125 = vmatprep.mubr.msk.bf16.mxu1 %vm2337_vm1, %v2336_v6 }
 0x136   : > { %2135 = vmatprep.subr.bf16.mxu1 %v2336_v6 }
 0x140   : > { %2126 = vmatmul.mubr.msk.bf16.vlgmr.msra.gmra.mrb[0].mxu1 %vm706_vm4, %v1130_v7 }
 0x141   : > { %2136 = vmatpush3.bf16.msra.mxu1 %v1299_v5  ;;  %2137 = vmatprep.mubr.msk.bf16.mxu1 %vm2337_vm1, %v2336_v6 }
 0x142   : > { %2147 = vmatprep.subr.bf16.mxu1 %v2336_v6 }
 0x14c   : > { %2138 = vmatmul.mubr.msk.bf16.vlgmr.msra.gmra.mrb[0].mxu1 %vm706_vm4, %v1244_v10 }
 0x14d   : > { %2148 = vmatpush3.bf16.msra.mxu1 %v1415_v9  ;;  %2149 = vmatprep.mubr.msk.bf16.mxu1 %vm2337_vm1, %v2336_v6 }
 0x14e   : > { %2159 = vmatprep.subr.bf16.mxu1 %v2336_v6 }
 0x158   : > { %2150 = vmatmul.mubr.msk.bf16.vlgmr.msra.gmra.mrb[0].mxu1 %vm706_vm4, %v1360_v13 }
 0x159   : > { %2160 = vmatpush3.bf16.msra.mxu1 %v1520_v12  ;;  %2161 = vmatprep.mubr.msk.bf16.mxu1 %vm2337_vm1, %v2336_v6 }
 0x15a   : > { %2171 = vmatprep.subr.bf16.mxu1 %v2336_v6 }
 0x164   : > { %2162 = vmatmul.mubr.msk.bf16.vlgmr.msra.gmra.mrb[0].mxu1 %vm706_vm4, %v1465_v16 }
 0x165   : > { %2172 = vmatpush3.bf16.msra.mxu1 %v1634_v15  ;;  %2173 = vmatprep.mubr.msk.bf16.mxu1 %vm2337_vm1, %v2336_v6 }
 0x170   : > { %2174 = vmatmul.mubr.msk.bf16.vlgmr.msra.gmra.mrb[0].mxu1 %vm706_vm4, %v1579_v17 }
 0x1d0   : > { %v1623_v18 = vpop.f32.mrb[0].mxu0 }
 0x1d1   : > { %v2169_v19 = vpop.f32.mrb[1].mxu0 }
 0x1d2   : > { %v1626_v20 = vpop.f32.mrb[2].mxu0 }
 0x1d3   : > { %v2170_v21 = vpop.f32.mrb[3].mxu0 }
 0x243   : > { %v1670_v22 = vpop.f32.mrb[0].mxu1 }
 0x244   : > { %1683 = vrot.lane.b32.xlu1 %v1670_v22, %s2339_s12  ;;  %v2175_v23 = vpop.f32.mrb[1].mxu1 }
 0x245   : > { %v1673_v24 = vpop.f32.mrb[2].mxu1 }
 0x246   : > { %1685 = vrot.lane.b32.xlu0 %v1673_v24, %s2339_s12  ;;  %v2176_v25 = vpop.f32.mrb[3].mxu1 }
 0x2b4   : > { %1696 = sbr.rel (%p2012_p1) target bundleno = 699 (0x2bb), region = 48 }
 0x2b6   : > { %v1684_v6 = vpop.permute.xlu1 %1683 }
 0x2b7   : > { %v1689_v26 = vsel %vm706_vm4, %v1623_v18, %v1684_v6 }
 0x2b8   : > { %1691 = vst.msk [vmem:[%s518_s15] sm:$0xff] %vm528_vm2, %v1689_v26  ;;  %v1686_v27 = vpop.permute.xlu0 %1685 }
 0x2b9   : > { %v1690_v28 = vsel %vm706_vm4, %v1626_v20, %v1686_v27 }
 0x2ba   : > { %1692 = vst.msk [vmem:[%s518_s15 + $0x8] sm:$0xff] %vm528_vm2, %v1690_v28 }
 0x2bb PF: > { %v1701_v30 = vsel %vm528_vm2, %v1689_v26, 0.0  ;;  %v1702_v31 = vsel %vm528_vm2, %v1690_v28, 0.0  ;;  %v1714_v32 = vmul.f32 %v1689_v26, %v1689_v26  ;;  %v1715_v34 = vmul.f32 %v1690_v28, %v1690_v28  ;;  %v1700_v44 = vld [vmem:[%s2443_s25] sm:$0x1] }
 0x2bc   : > { %v1703_v33 = vadd.f32 %v1702_v31, %v1701_v30  ;;  %vm1711_vm9 = vcmask 122880   ;;  %v1713_v55 = vld [vmem:[%s2466_s18] sm:$0x1] }
 0x2bd   : > { %v1716_v35 = vsel %vm528_vm2, %v1714_v32, 0.0  ;;  %v1717_v37 = vsel %vm528_vm2, %v1715_v34, 0.0 }
 0x2be   : > { %v1704_v36 = vrot.slane %v1703_v33, 4  ;;  %v1718_v38 = vadd.f32 %v1717_v37, %v1716_v35 }
 0x2c0   : > { %v1705_v39 = vadd.f32 %v1704_v36, %v1703_v33  ;;  %v1719_v40 = vrot.slane %v1718_v38, 4 }
 0x2c2   : > { %v1706_v41 = vrot.slane %v1705_v39, 2  ;;  %v1720_v42 = vadd.f32 %v1719_v40, %v1718_v38 }
 0x2c4   : > { %v1707_v43 = vadd.f32 %v1706_v41, %v1705_v39  ;;  %v1721_v50 = vrot.slane %v1720_v42, 2 }
 0x2c6   : > { %v1708_v51 = vrot.slane %v1707_v43, 1  ;;  %v1722_v46 = vadd.f32 %v1721_v50, %v1720_v42 }
 0x2c8   : > { %v1709_v52 = vadd.f32 %v1708_v51, %v1707_v43  ;;  %v1723_v53 = vrot.slane %v1722_v46, 1 }
 0x2ca   : > { %v1710_v54 = vadd.f32 %v1709_v52, %v1700_v44  ;;  %v1724_v56 = vadd.f32 %v1723_v53, %v1722_v46 }
 0x2cc   : > { %1712 = vst.msk [vmem:[%s2443_s25] sm:$0x1] %vm1711_vm9, %v1710_v54  ;;  %v1725_v48 = vadd.f32 %v1724_v56, %v1713_v55 }
 0x2ce   : > { %1726 = vst.msk [vmem:[%s2466_s18] sm:$0x1] %vm1711_vm9, %v1725_v48 }
 0x2cf PF: > { %s19_s9 = sadd.s32 1, %s2333_s9   ;;  %s2715_s27 = smov %s2325_s29 }
 0x2d0   : > { %p16_p2 = scmp.ge.s32.totalorder %s19_s9, 34   ;;  %s2716_s28 = smov %s2329_s30 }
 0x2d1   : > { %s2717_s29 = smov %s2720_s10  ;;  %s2718_s30 = smov %s2724_s11 }
 0x2d2   :  { %18 = sbr.rel (!%p16_p2) target bundleno = 4 (0x4), region = 116 }

// kernel: _lambda_.3
= control target key start
LH: loop header
LB: loop body
LE: loop exit
PB: predicated region body
PF: predicated region fallthrough
CT: control target
= control target key end

     0   :  { %s2482_s21 = smov 0   ;;  %s3386_s0 = inlined_call_operand.vmem [shape: f32[512,16], index: 0, kind: input, shape index: {}]   ;;  %s3387_s1 = inlined_call_operand.vmem [shape: f32[512,16], index: 1, kind: input, shape index: {}]   ;;  %s3388_s2 = inlined_call_operand.vmem [shape: f32[1,16], index: 2, kind: input, shape index: {}]   ;;  %s3389_s3 = inlined_call_operand.vmem [shape: f32[1,16], index: 3, kind: input, shape index: {}]   ;;  %s3390_s4 = inlined_call_operand.vmem [shape: bf16[16,16], index: 4, kind: input, shape index: {}]   ;;  %s3391_s5 = inlined_call_operand.vmem [shape: f32[1,16], index: 5, kind: input, shape index: {}]   ;;  %s3392_s6 = inlined_call_operand.vmem [shape: f32[1,16], index: 6, kind: input, shape index: {}]   ;;  %s3393_s7 = inlined_call_operand.vmem [shape: bf16[16,64], index: 7, kind: input, shape index: {}]   ;;  %s3394_s8 = inlined_call_operand.vmem [shape: f32[1,64], index: 8, kind: input, shape index: {}]   ;;  %s3395_s9 = inlined_call_operand.vmem [shape: bf16[64,16], index: 9, kind: input, shape index: {}]   ;;  %s3396_s10 = inlined_call_operand.vmem [shape: f32[1,16], index: 10, kind: input, shape index: {}]   ;;  %s3397_s11 = inlined_call_operand.vmem [shape: f32[512,16], index: 11, kind: output, shape index: {0}]   ;;  %s3398_s12 = inlined_call_operand.vmem [shape: f32[512,16], index: 12, kind: output, shape index: {1}]  }
   0x1 LB: > { %s2092_s22 = sadd.s32 4294967295, %s2415_s21   ;;  %p2096_p0 = scmp.ge.s32.totalorder %s2415_s21, 1  ;;  %s2415_s21 = sphi %s2482_s21, %s23_s21  }
   0x2   : > { %p377_p1 = scmp.lt.s32.totalorder %s2415_s21, 3 }
   0x4   : > { %p378_p2 = pnand %p2096_p0, %p377_p1 }
   0x5   : > { %v2339_v0 = vld [vmem:[%s3390_s4] sm:$0xff] (!%p378_p2)   ;;  %s2097_s25 = sshll.u32 (!%p378_p2), %s2092_s22, 5  ;;  %vm620_vm0 = vcmask (!%p378_p2), 130048   ;;  %vm1748_vm1 = vcmask (!%p378_p2), 523264  }
   0x6   : > { %381 = sbr.rel (%p378_p2) target bundleno = 1061 (0x425), region = 64  ;;  %p430_p3 = scmp.lt.s32.totalorder (!%p378_p2), %s2097_s25, 63  ;;  %2221 = vmatprep.subr.bf16.mxu0 (!%p378_p2), %v2339_v0  ;;  %2329 = vmatprep.subr.bf16.mxu1 (!%p378_p2), %v2339_v0  ;;  %v2496_v1 = vld [vmem:[%s3388_s2] ss:$0 sm:$0xff] (!%p378_p2) }
   0x7   : > { %2222 = vmatpush3.bf16.msra.mxu0 (!%p378_p2), %v2339_v0  ;;  %2330 = vmatpush3.bf16.msra.mxu1 (!%p378_p2), %v2339_v0  ;;  %v2509_v2 = vld [vmem:[%s3389_s3] ss:$0 sm:$0xff] (!%p378_p2) }
   0xd   : > { %s3400_s25 = smov (!%p430_p3, %s2097_s25), 63 }
   0xe   : > { %s2498_s28 = sshll.u32 %s3400_s25, 3 }
   0xf   : > { %s2504_s13 = scalar_lea.vmem %s3386_s0, %s2498_s28  ;;  %s2630_s18 = scalar_lea.vmem %s3387_s1, %s2498_s28 }
  0x10   : > { %v454_v3 = vld [vmem:[%s2504_s13] sm:$0xff]  ;;  %v455_v4 = vld [vmem:[%s2504_s13 + $0x8] sm:$0xff]  ;;  %v456_v5 = vld [vmem:[%s2504_s13 + $0x10] sm:$0xff]  ;;  %s2638_s22 = scalar_lea.vmem %s3397_s11, %s2498_s28  ;;  %s3285_s27 = scalar_lea.vmem %s3398_s12, %s2498_s28 }
  0x11   : > { %v493_v6 = vmul.f32 %v2496_v1, %v454_v3  ;;  %v494_v7 = vmul.f32 %v2496_v1, %v455_v4  ;;  %v457_v8 = vld [vmem:[%s2504_s13 + $0x18] sm:$0xff]  ;;  %v495_v9 = vmul.f32 %v2496_v1, %v456_v5  ;;  %v458_v10 = vld [vmem:[%s2504_s13 + $0x20] sm:$0xff]  ;;  %v459_v11 = vld [vmem:[%s2504_s13 + $0x28] sm:$0xff] }
  0x12   : > { %v496_v12 = vmul.f32 %v2496_v1, %v457_v8  ;;  %v497_v13 = vmul.f32 %v2496_v1, %v458_v10  ;;  %v498_v14 = vmul.f32 %v2496_v1, %v459_v11  ;;  %v460_v15 = vld [vmem:[%s2504_s13 + $0x30] sm:$0xff]  ;;  %v461_v16 = vld [vmem:[%s2504_s13 + $0x38] sm:$0xff]  ;;  %v462_v25 = vld [vmem:[%s2504_s13 + $0x40] sm:$0xff] }
  0x13   : > { %v532_v17 = vadd.f32 %v2509_v2, %v493_v6  ;;  %v533_v18 = vadd.f32 %v2509_v2, %v494_v7  ;;  %v534_v19 = vadd.f32 %v2509_v2, %v495_v9  ;;  %v499_v20 = vmul.f32 %v2496_v1, %v460_v15  ;;  %v463_v26 = vld [vmem:[%s2504_s13 + $0x48] sm:$0xff]  ;;  %v464_v31 = vld [vmem:[%s2504_s13 + $0x50] sm:$0xff]  ;;  %v465_v36 = vld [vmem:[%s2504_s13 + $0x58] sm:$0xff] }
  0x14   : > { %v535_v21 = vadd.f32 %v2509_v2, %v496_v12  ;;  %v536_v22 = vadd.f32 %v2509_v2, %v497_v13  ;;  %v537_v23 = vadd.f32 %v2509_v2, %v498_v14  ;;  %v500_v24 = vmul.f32 %v2496_v1, %v461_v16  ;;  %v466_v37 = vld [vmem:[%s2504_s13 + $0x60] sm:$0xff]  ;;  %v467_v42 = vld [vmem:[%s2504_s13 + $0x68] sm:$0xff]  ;;  %v468_v43 = vld [vmem:[%s2504_s13 + $0x70] sm:$0xff] }
  0x15   : > { %v564_v27 = vmax.f32 %v532_v17, 0.0  ;;  %v565_v28 = vmax.f32 %v533_v18, 0.0  ;;  %v566_v29 = vmax.f32 %v534_v19, 0.0  ;;  %v538_v30 = vadd.f32 %v2509_v2, %v499_v20  ;;  %v469_v52 = vld [vmem:[%s2504_s13 + $0x78] sm:$0xff]  ;;  %v470_v56 = vld [vmem:[%s2504_s13 + $0x80] sm:$0xff]  ;;  %v471_v61 = vld [vmem:[%s2504_s13 + $0x88] sm:$0xff] }
  0x16   : > { %v567_v32 = vmax.f32 %v535_v21, 0.0  ;;  %v568_v33 = vmax.f32 %v536_v22, 0.0  ;;  %v569_v34 = vmax.f32 %v537_v23, 0.0  ;;  %v539_v35 = vadd.f32 %v2509_v2, %v500_v24  ;;  %v472_v0 = vld [vmem:[%s2504_s13 + $0x90] sm:$0xff]  ;;  %v473_v3 = vld [vmem:[%s2504_s13 + $0x98] sm:$0xff]  ;;  %v474_v7 = vld [vmem:[%s2504_s13 + $0xa0] sm:$0xff] }
  0x17   : > { %v596_v38 = vpack.c.bf16 %v565_v28, %v564_v27  ;;  %v570_v39 = vmax.f32 %v538_v30, 0.0  ;;  %v501_v40 = vmul.f32 %v2496_v1, %v462_v25  ;;  %v502_v41 = vmul.f32 %v2496_v1, %v463_v26  ;;  %v475_v12 = vld [vmem:[%s2504_s13 + $0xa8] sm:$0xff]  ;;  %v476_v17 = vld [vmem:[%s2504_s13 + $0xb0] sm:$0xff]  ;;  %v477_v22 = vld [vmem:[%s2504_s13 + $0xb8] sm:$0xff] }
  0x18   : > { %v597_v44 = vpack.c.bf16 %v567_v32, %v566_v29  ;;  %v598_v45 = vpack.c.bf16 %v569_v34, %v568_v33  ;;  %v571_v46 = vmax.f32 %v539_v35, 0.0  ;;  %v503_v47 = vmul.f32 %v2496_v1, %v464_v31  ;;  %v478_v27 = vld [vmem:[%s2504_s13 + $0xc0] sm:$0xff]  ;;  %v479_v32 = vld [vmem:[%s2504_s13 + $0xc8] sm:$0xff] }
  0x19   : > { %2223 = vmatprep.mubr.msk.bf16.mxu0 %vm620_vm0, %v596_v38  ;;  %v540_v48 = vadd.f32 %v2509_v2, %v501_v40  ;;  %v541_v49 = vadd.f32 %v2509_v2, %v502_v41  ;;  %v504_v50 = vmul.f32 %v2496_v1, %v465_v36  ;;  %v505_v51 = vmul.f32 %v2496_v1, %v466_v37  ;;  %v480_v37 = vld [vmem:[%s2504_s13 + $0xd0] sm:$0xff] }
  0x1a   : > { %2224 = vmatmul.mubr.msk.bf16.vlgmr.msra.gmra.mrb[0].mxu0 %vm620_vm0, %v597_v44  ;;  %v542_v53 = vadd.f32 %v2509_v2, %v503_v47  ;;  %v506_v54 = vmul.f32 %v2496_v1, %v467_v42  ;;  %v507_v55 = vmul.f32 %v2496_v1, %v468_v43  ;;  %v508_v63 = vmul.f32 %v2496_v1, %v469_v52  ;;  %v481_v42 = vld [vmem:[%s2504_s13 + $0xd8] sm:$0xff]  ;;  %v482_v47 = vld [vmem:[%s2504_s13 + $0xe0] sm:$0xff] }
  0x1b   : > { %2227 = vmatprep.mubr.msk.bf16.mxu0 %vm620_vm0, %v598_v45  ;;  %v572_v57 = vmax.f32 %v540_v48, 0.0  ;;  %v573_v58 = vmax.f32 %v541_v49, 0.0  ;;  %v543_v59 = vadd.f32 %v2509_v2, %v504_v50  ;;  %v544_v60 = vadd.f32 %v2509_v2, %v505_v51  ;;  %v483_v48 = vld [vmem:[%s2504_s13 + $0xe8] sm:$0xff] }
  0x1c   : > { %v545_v62 = vadd.f32 %v2509_v2, %v506_v54  ;;  %v599_v4 = vpack.c.bf16 %v571_v46, %v570_v39  ;;  %v574_v5 = vmax.f32 %v542_v53, 0.0  ;;  %v509_v6 = vmul.f32 %v2496_v1, %v470_v56 }
  0x1d   : > { %v600_v8 = vpack.c.bf16 %v573_v58, %v572_v57  ;;  %v575_v9 = vmax.f32 %v543_v59, 0.0  ;;  %v2567_v10 = vadd.f32 %v2509_v2, %v507_v55  ;;  %v510_v11 = vmul.f32 %v2496_v1, %v471_v61 }
  0x1e   : > { %v576_v13 = vmax.f32 %v544_v60, 0.0  ;;  %v548_v14 = vadd.f32 %v2509_v2, %v509_v6  ;;  %v511_v15 = vmul.f32 %v2496_v1, %v472_v0  ;;  %v512_v16 = vmul.f32 %v2496_v1, %v473_v3 }
  0x1f   : > { %v577_v18 = vmax.f32 %v545_v62, 0.0  ;;  %v547_v19 = vadd.f32 %v2509_v2, %v508_v63  ;;  %v549_v20 = vadd.f32 %v2509_v2, %v510_v11  ;;  %v513_v21 = vmul.f32 %v2496_v1, %v474_v7  ;;  %v484_v7 = vld [vmem:[%s2504_s13 + $0xf0] sm:$0xff] }
  0x20   : > { %v580_v23 = vmax.f32 %v548_v14, 0.0  ;;  %v550_v24 = vadd.f32 %v2509_v2, %v511_v15  ;;  %v551_v25 = vadd.f32 %v2509_v2, %v512_v16  ;;  %v514_v26 = vmul.f32 %v2496_v1, %v475_v12 }
  0x21   : > { %v601_v28 = vpack.c.bf16 %v575_v9, %v574_v5  ;;  %v581_v29 = vmax.f32 %v549_v20, 0.0  ;;  %v552_v30 = vadd.f32 %v2509_v2, %v513_v21  ;;  %v515_v31 = vmul.f32 %v2496_v1, %v476_v17 }
  0x22   : > { %2228 = vmatmul.mubr.msk.bf16.gmra.mrb[4].mxu0 %vm620_vm0, %v599_v4  ;;  %v582_v33 = vmax.f32 %v550_v24, 0.0  ;;  %v583_v34 = vmax.f32 %v551_v25, 0.0  ;;  %v553_v35 = vadd.f32 %v2509_v2, %v514_v26  ;;  %v516_v36 = vmul.f32 %v2496_v1, %v477_v22  ;;  %v830_v22 = vld [vmem:[%s2630_s18] sm:$0xff]  ;;  %v833_v24 = vld [vmem:[%s2630_s18 + $0x18] sm:$0xff] }
  0x23   : > { %2231 = vmatprep.mubr.msk.bf16.mxu0 %vm620_vm0, %v600_v8  ;;  %v604_v38 = vpack.c.bf16 %v581_v29, %v580_v23  ;;  %v584_v39 = vmax.f32 %v552_v30, 0.0  ;;  %v554_v40 = vadd.f32 %v2509_v2, %v515_v31  ;;  %v517_v41 = vmul.f32 %v2496_v1, %v478_v27  ;;  %v485_v8 = vld [vmem:[%s2504_s13 + $0xf8] sm:$0xff]  ;;  %v831_v27 = vld [vmem:[%s2630_s18 + $0x8] sm:$0xff] }
  0x24   : > { %v605_v43 = vpack.c.bf16 %v583_v34, %v582_v33  ;;  %v585_v44 = vmax.f32 %v553_v35, 0.0  ;;  %v555_v45 = vadd.f32 %v2509_v2, %v516_v36  ;;  %v518_v46 = vmul.f32 %v2496_v1, %v479_v32  ;;  %v836_v35 = vld [vmem:[%s2630_s18 + $0x30] sm:$0xff] }
  0x25   : > { %v602_v49 = vpack.c.bf16 %v577_v18, %v576_v13  ;;  %2239 = vmatprep.mubr.msk.bf16.mxu1 %vm620_vm0, %v604_v38  ;;  %v586_v50 = vmax.f32 %v554_v40, 0.0  ;;  %v556_v51 = vadd.f32 %v2509_v2, %v517_v41  ;;  %v519_v52 = vmul.f32 %v2496_v1, %v480_v37  ;;  %v834_v37 = vld [vmem:[%s2630_s18 + $0x20] sm:$0xff]  ;;  %v837_v40 = vld [vmem:[%s2630_s18 + $0x38] sm:$0xff] }
  0x26   : > { %2240 = vmatmul.mubr.msk.bf16.vlgmr.msra.gmra.mrb[0].mxu1 %vm620_vm0, %v605_v43  ;;  %v606_v53 = vpack.c.bf16 %v585_v44, %v584_v39  ;;  %v587_v54 = vmax.f32 %v555_v45, 0.0  ;;  %v557_v55 = vadd.f32 %v2509_v2, %v518_v46  ;;  %v520_v56 = vmul.f32 %v2496_v1, %v481_v42  ;;  %v835_v43 = vld [vmem:[%s2630_s18 + $0x28] sm:$0xff] }
  0x27   : > { %v588_v57 = vmax.f32 %v556_v51, 0.0  ;;  %v521_v58 = vmul.f32 %v2496_v1, %v482_v47  ;;  %v522_v59 = vmul.f32 %v2496_v1, %v483_v48  ;;  %v578_v61 = vmax.f32 %v2567_v10, 0.0  ;;  %v848_v48 = vld [vmem:[%s2630_s18 + $0x90] sm:$0xff]  ;;  %v846_v51 = vld [vmem:[%s2630_s18 + $0x80] sm:$0xff] }
  0x28   : > { %2243 = vmatprep.mubr.msk.bf16.mxu1 %vm620_vm0, %v606_v53  ;;  %v589_v60 = vmax.f32 %v557_v55, 0.0  ;;  %v579_v62 = vmax.f32 %v547_v19, 0.0  ;;  %v607_v63 = vpack.c.bf16 %v587_v54, %v586_v50  ;;  %v558_v0 = vadd.f32 %v2509_v2, %v519_v52  ;;  %v849_v53 = vld [vmem:[%s2630_s18 + $0x98] sm:$0xff]  ;;  %v840_v55 = vld [vmem:[%s2630_s18 + $0x50] sm:$0xff] }
  0x29   : > { %v559_v3 = vadd.f32 %v2509_v2, %v520_v56  ;;  %v560_v5 = vadd.f32 %v2509_v2, %v521_v58  ;;  %v561_v6 = vadd.f32 %v2509_v2, %v522_v59  ;;  %v523_v12 = vmul.f32 %v2496_v1, %v484_v7  ;;  %v847_v58 = vld [vmem:[%s2630_s18 + $0x88] sm:$0xff]  ;;  %v838_v59 = vld [vmem:[%s2630_s18 + $0x40] sm:$0xff] }
  0x2a   : > { %2232 = vmatmul.mubr.msk.bf16.gmra.mrb[8].mxu0 %vm620_vm0, %v601_v28  ;;  %v608_v4 = vpack.c.bf16 %v589_v60, %v588_v57  ;;  %v603_v9 = vpack.c.bf16 %v579_v62, %v578_v61  ;;  %v590_v11 = vmax.f32 %v558_v0, 0.0  ;;  %v524_v13 = vmul.f32 %v2496_v1, %v485_v8  ;;  %v841_v0 = vld [vmem:[%s2630_s18 + $0x58] sm:$0xff]  ;;  %v839_v7 = vld [vmem:[%s2630_s18 + $0x48] sm:$0xff] }
  0x2b   : > { %2235 = vmatprep.mubr.msk.bf16.mxu0 %vm620_vm0, %v602_v49  ;;  %v591_v10 = vmax.f32 %v559_v3, 0.0  ;;  %v592_v14 = vmax.f32 %v560_v5, 0.0  ;;  %v593_v15 = vmax.f32 %v561_v6, 0.0  ;;  %v562_v17 = vadd.f32 %v2509_v2, %v523_v12 }
  0x2c   : > { %v563_v18 = vadd.f32 %v2509_v2, %v524_v13  ;;  %v832_v2 = vld [vmem:[%s2630_s18 + $0x10] sm:$0xff] }
  0x2d   : > { %v609_v16 = vpack.c.bf16 %v591_v10, %v590_v11  ;;  %v610_v19 = vpack.c.bf16 %v593_v15, %v592_v14  ;;  %v594_v20 = vmax.f32 %v562_v17, 0.0  ;;  %v852_v14 = vld [vmem:[%s2630_s18 + $0xb0] sm:$0xff]  ;;  %v850_v17 = vld [vmem:[%s2630_s18 + $0xa0] sm:$0xff] }
  0x2e   : > { %2244 = vmatmul.mubr.msk.bf16.gmra.mrb[4].mxu1 %vm620_vm0, %v607_v63  ;;  %v595_v21 = vmax.f32 %v563_v18, 0.0 }
  0x2f   : > { %2247 = vmatprep.mubr.msk.bf16.mxu1 %vm620_vm0, %v608_v4 }
  0x30   : > { %v611_v1 = vpack.c.bf16 %v595_v21, %v594_v20  ;;  %v844_v21 = vld [vmem:[%s2630_s18 + $0x70] sm:$0xff] }
  0x32   : > { %2236 = vmatmul.mubr.msk.bf16.gmra.mrb[12].mxu0 %vm620_vm0, %v603_v9 }
  0x36   : > { %2248 = vmatmul.mubr.msk.bf16.gmra.mrb[8].mxu1 %vm620_vm0, %v609_v16 }
  0x37   : > { %2251 = vmatprep.mubr.msk.bf16.mxu1 %vm620_vm0, %v610_v19  ;;  %v853_v19 = vld [vmem:[%s2630_s18 + $0xb8] sm:$0xff] }
  0x3e   : > { %2252 = vmatmul.mubr.msk.bf16.gmra.mrb[12].mxu1 %vm620_vm0, %v611_v1 }
  0xed   : > { %v2225_v23 = vpop.f32.mrb[0].mxu0 }
  0xee   : > { %v2641_v25 = vadd.f32 %v2225_v23, %v832_v2  ;;  %v703_v26 = vpop.f32.mrb[1].mxu0  ;;  %v842_v23 = vld [vmem:[%s2630_s18 + $0x60] sm:$0xff] }
  0xef   : > { %v2644_v28 = vadd.f32 %v830_v22, %v703_v26  ;;  %v2226_v29 = vpop.f32.mrb[2].mxu0  ;;  %v851_v22 = vld [vmem:[%s2630_s18 + $0xa8] sm:$0xff] }
  0xf0   : > { %896 = vst.msk [vmem:[%s2638_s22 + $0x10] sm:$0xff] %vm620_vm0, %v2641_v25  ;;  %v2649_v30 = vadd.f32 %v2226_v29, %v833_v24  ;;  %v706_v31 = vpop.f32.mrb[3].mxu0  ;;  %v932_v32 = vsel %vm620_vm0, %v2641_v25, 0.0 }
  0xf1   : > { %894 = vst.msk [vmem:[%s2638_s22] sm:$0xff] %vm620_vm0, %v2644_v28  ;;  %v2656_v33 = vadd.f32 %v831_v27, %v706_v31  ;;  %933 = vadd.xlane.f32.xlu1 %v932_v32  ;;  %v926_v34 = vsel %vm620_vm0, %v2644_v28, 0.0  ;;  %v845_v31 = vld [vmem:[%s2630_s18 + $0x78] sm:$0xff] }
  0xf2   : > { %897 = vst.msk [vmem:[%s2638_s22 + $0x18] sm:$0xff] %vm620_vm0, %v2649_v30  ;;  %927 = vadd.xlane.f32.xlu0 %v926_v34  ;;  %v935_v36 = vsel %vm620_vm0, %v2649_v30, 0.0 }
  0xf3   : > { %895 = vst.msk [vmem:[%s2638_s22 + $0x8] sm:$0xff] %vm620_vm0, %v2656_v33  ;;  %v929_v39 = vsel %vm620_vm0, %v2656_v33, 0.0 }
  0xf5   : > { %936 = vadd.xlane.f32.xlu1 %v935_v36  ;;  %v2229_v38 = vpop.f32.mrb[4].mxu0 }
  0xf6   : > { %v2673_v41 = vadd.f32 %v2229_v38, %v836_v35  ;;  %930 = vadd.xlane.f32.xlu0 %v929_v39  ;;  %v719_v42 = vpop.f32.mrb[5].mxu0 }
  0xf7   : > { %v2676_v44 = vadd.f32 %v834_v37, %v719_v42  ;;  %v2230_v45 = vpop.f32.mrb[6].mxu0  ;;  %v843_v37 = vld [vmem:[%s2630_s18 + $0x68] sm:$0xff] }
  0xf8   : > { %900 = vst.msk [vmem:[%s2638_s22 + $0x30] sm:$0xff] %vm620_vm0, %v2673_v41  ;;  %v2681_v46 = vadd.f32 %v2230_v45, %v837_v40  ;;  %v722_v47 = vpop.f32.mrb[7].mxu0  ;;  %v944_v63 = vsel %vm620_vm0, %v2673_v41, 0.0 }
  0xf9   : > { %898 = vst.msk [vmem:[%s2638_s22 + $0x20] sm:$0xff] %vm620_vm0, %v2676_v44  ;;  %v2687_v49 = vadd.f32 %v835_v43, %v722_v47  ;;  %v938_v50 = vsel %vm620_vm0, %v2676_v44, 0.0  ;;  %v2241_v52 = vpop.f32.mrb[0].mxu1  ;;  %v856_v47 = vld [vmem:[%s2630_s18 + $0xd0] sm:$0xff] }
  0xfa   : > { %901 = vst.msk [vmem:[%s2638_s22 + $0x38] sm:$0xff] %vm620_vm0, %v2681_v46  ;;  %939 = vadd.xlane.f32.xlu0 %v938_v50  ;;  %v2702_v56 = vadd.f32 %v2241_v52, %v848_v48  ;;  %v767_v57 = vpop.f32.mrb[1].mxu1  ;;  %v947_v10 = vsel %vm620_vm0, %v2681_v46, 0.0 }
  0xfb   : > { %899 = vst.msk [vmem:[%s2638_s22 + $0x28] sm:$0xff] %vm620_vm0, %v2687_v49  ;;  %v941_v54 = vsel %vm620_vm0, %v2687_v49, 0.0  ;;  %v2706_v60 = vadd.f32 %v846_v51, %v767_v57  ;;  %v2242_v61 = vpop.f32.mrb[2].mxu1  ;;  %v854_v51 = vld [vmem:[%s2630_s18 + $0xc0] sm:$0xff] }
  0xfc   : > { %942 = vadd.xlane.f32.xlu1 %v941_v54  ;;  %912 = vst.msk [vmem:[%s2638_s22 + $0x90] sm:$0xff] %vm620_vm0, %v2702_v56  ;;  %v2714_v3 = vadd.f32 %v2242_v61, %v849_v53  ;;  %v770_v4 = vpop.f32.mrb[3].mxu1  ;;  %v857_v53 = vld [vmem:[%s2630_s18 + $0xd8] sm:$0xff] }
  0xfd   : > { %v2233_v62 = vpop.f32.mrb[8].mxu0  ;;  %910 = vst.msk [vmem:[%s2638_s22 + $0x80] sm:$0xff] %vm620_vm0, %v2706_v60  ;;  %v2722_v8 = vadd.f32 %v847_v58, %v770_v4  ;;  %v855_v58 = vld [vmem:[%s2630_s18 + $0xc8] sm:$0xff] }
  0xfe   : > { %v2716_v5 = vadd.f32 %v2233_v62, %v840_v55  ;;  %945 = vadd.xlane.f32.xlu0 %v944_v63  ;;  %v735_v6 = vpop.f32.mrb[9].mxu0  ;;  %913 = vst.msk [vmem:[%s2638_s22 + $0x98] sm:$0xff] %vm620_vm0, %v2714_v3 }
  0xff   : > { %v2724_v9 = vadd.f32 %v838_v59, %v735_v6  ;;  %v2234_v11 = vpop.f32.mrb[10].mxu0  ;;  %911 = vst.msk [vmem:[%s2638_s22 + $0x88] sm:$0xff] %vm620_vm0, %v2722_v8 }
 0x100   : > { %904 = vst.msk [vmem:[%s2638_s22 + $0x50] sm:$0xff] %vm620_vm0, %v2716_v5  ;;  %v2734_v12 = vadd.f32 %v2234_v11, %v841_v0  ;;  %948 = vadd.xlane.f32.xlu1 %v947_v10  ;;  %v738_v13 = vpop.f32.mrb[11].mxu0  ;;  %v956_v29 = vsel %vm620_vm0, %v2716_v5, 0.0  ;;  %v860_v11 = vld [vmem:[%s2630_s18 + $0xf0] sm:$0xff]  ;;  %v977_v10 = vsel %vm620_vm0, %v2722_v8, 0.0 }
 0x101   : > { %902 = vst.msk [vmem:[%s2638_s22 + $0x40] sm:$0xff] %vm620_vm0, %v2724_v9  ;;  %v2743_v15 = vadd.f32 %v839_v7, %v738_v13  ;;  %v950_v16 = vsel %vm620_vm0, %v2724_v9, 0.0  ;;  %v2245_v18 = vpop.f32.mrb[4].mxu1  ;;  %v974_v7 = vsel %vm620_vm0, %v2706_v60, 0.0  ;;  %v858_v13 = vld [vmem:[%s2630_s18 + $0xe0] sm:$0xff] }
 0x102   : > { %905 = vst.msk [vmem:[%s2638_s22 + $0x58] sm:$0xff] %vm620_vm0, %v2734_v12  ;;  %951 = vadd.xlane.f32.xlu0 %v950_v16  ;;  %v2758_v1 = vadd.f32 %v2245_v18, %v852_v14  ;;  %v783_v2 = vpop.f32.mrb[5].mxu1  ;;  %v959_v42 = vsel %vm620_vm0, %v2734_v12, 0.0  ;;  %v861_v16 = vld [vmem:[%s2630_s18 + $0xf8] sm:$0xff] }
 0x103   : > { %903 = vst.msk [vmem:[%s2638_s22 + $0x48] sm:$0xff] %vm620_vm0, %v2743_v15  ;;  %v953_v20 = vsel %vm620_vm0, %v2743_v15, 0.0  ;;  %v2762_v24 = vadd.f32 %v850_v17, %v783_v2  ;;  %v2246_v26 = vpop.f32.mrb[6].mxu1  ;;  %v980_v2 = vsel %vm620_vm0, %v2702_v56, 0.0 }
 0x104   : > { %954 = vadd.xlane.f32.xlu1 %v953_v20  ;;  %916 = vst.msk [vmem:[%s2638_s22 + $0xb0] sm:$0xff] %vm620_vm0, %v2758_v1  ;;  %v2770_v32 = vadd.f32 %v2246_v26, %v853_v19  ;;  %v786_v34 = vpop.f32.mrb[7].mxu1  ;;  %v859_v19 = vld [vmem:[%s2630_s18 + $0xe8] sm:$0xff] }
 0x105   : > { %v2237_v27 = vpop.f32.mrb[12].mxu0  ;;  %914 = vst.msk [vmem:[%s2638_s22 + $0xa0] sm:$0xff] %vm620_vm0, %v2762_v24  ;;  %v2778_v38 = vadd.f32 %v851_v22, %v786_v34  ;;  %v992_v34 = vsel %vm620_vm0, %v2758_v1, 0.0 }
 0x106   : > { %v2772_v35 = vadd.f32 %v2237_v27, %v844_v21  ;;  %957 = vadd.xlane.f32.xlu0 %v956_v29  ;;  %v751_v36 = vpop.f32.mrb[13].mxu0  ;;  %917 = vst.msk [vmem:[%s2638_s22 + $0xb8] sm:$0xff] %vm620_vm0, %v2770_v32  ;;  %v983_v27 = vsel %vm620_vm0, %v2714_v3, 0.0  ;;  %v986_v29 = vsel %vm620_vm0, %v2762_v24, 0.0 }
 0x107   : > { %v2780_v39 = vadd.f32 %v842_v23, %v751_v36  ;;  %v2238_v40 = vpop.f32.mrb[14].mxu0  ;;  %915 = vst.msk [vmem:[%s2638_s22 + $0xa8] sm:$0xff] %vm620_vm0, %v2778_v38  ;;  %v995_v36 = vsel %vm620_vm0, %v2770_v32, 0.0 }
 0x108   : > { %908 = vst.msk [vmem:[%s2638_s22 + $0x70] sm:$0xff] %vm620_vm0, %v2772_v35  ;;  %v2790_v43 = vadd.f32 %v2238_v40, %v845_v31  ;;  %960 = vadd.xlane.f32.xlu1 %v959_v42  ;;  %v754_v45 = vpop.f32.mrb[15].mxu0  ;;  %v968_v62 = vsel %vm620_vm0, %v2772_v35, 0.0  ;;  %v989_v31 = vsel %vm620_vm0, %v2778_v38, 0.0 }
 0x109   : > { %906 = vst.msk [vmem:[%s2638_s22 + $0x60] sm:$0xff] %vm620_vm0, %v2780_v39  ;;  %v2799_v48 = vadd.f32 %v843_v37, %v754_v45  ;;  %v962_v50 = vsel %vm620_vm0, %v2780_v39, 0.0  ;;  %v2249_v52 = vpop.f32.mrb[8].mxu1 }
 0x10a   : > { %909 = vst.msk [vmem:[%s2638_s22 + $0x78] sm:$0xff] %vm620_vm0, %v2790_v43  ;;  %963 = vadd.xlane.f32.xlu0 %v962_v50  ;;  %v2813_v55 = vadd.f32 %v2249_v52, %v856_v47  ;;  %v799_v57 = vpop.f32.mrb[9].mxu1  ;;  %v971_v6 = vsel %vm620_vm0, %v2790_v43, 0.0 }
 0x10b   : > { %907 = vst.msk [vmem:[%s2638_s22 + $0x68] sm:$0xff] %vm620_vm0, %v2799_v48  ;;  %v965_v54 = vsel %vm620_vm0, %v2799_v48, 0.0  ;;  %v2816_v59 = vadd.f32 %v854_v51, %v799_v57  ;;  %v2250_v61 = vpop.f32.mrb[10].mxu1 }
 0x10c   : > { %966 = vadd.xlane.f32.xlu1 %v965_v54  ;;  %920 = vst.msk [vmem:[%s2638_s22 + $0xd0] sm:$0xff] %vm620_vm0, %v2813_v55  ;;  %v2823_v63 = vadd.f32 %v2250_v61, %v857_v53  ;;  %v802_v0 = vpop.f32.mrb[11].mxu1  ;;  %v1004_v42 = vsel %vm620_vm0, %v2813_v55, 0.0  ;;  %v2340_v53 = vld [vmem:[%s3393_s7] sm:$0xff]  }
 0x10d   : > { %918 = vst.msk [vmem:[%s2638_s22 + $0xc0] sm:$0xff] %vm620_vm0, %v2816_v59  ;;  %v2828_v4 = vadd.f32 %v855_v58, %v802_v0  ;;  %v998_v37 = vsel %vm620_vm0, %v2816_v59, 0.0  ;;  %2255 = vmatprep.subr.bf16.mxu1 %v2340_v53 }
 0x10e   : > { %969 = vadd.xlane.f32.xlu0 %v968_v62  ;;  %921 = vst.msk [vmem:[%s2638_s22 + $0xd8] sm:$0xff] %vm620_vm0, %v2823_v63  ;;  %v1007_v45 = vsel %vm620_vm0, %v2823_v63, 0.0  ;;  %2256 = vmatpush3.bf16.msra.mxu1 %v2340_v53 }
 0x10f   : > { %919 = vst.msk [vmem:[%s2638_s22 + $0xc8] sm:$0xff] %vm620_vm0, %v2828_v4  ;;  %v1001_v40 = vsel %vm620_vm0, %v2828_v4, 0.0 }
 0x110   : > { %972 = vadd.xlane.f32.xlu1 %v971_v6 }
 0x111   : > { %v2253_v14 = vpop.f32.mrb[12].mxu1 }
 0x112   : > { %975 = vadd.xlane.f32.xlu0 %v974_v7  ;;  %v2845_v17 = vadd.f32 %v2253_v14, %v860_v11  ;;  %v815_v18 = vpop.f32.mrb[13].mxu1 }
 0x113   : > { %v2848_v20 = vadd.f32 %v858_v13, %v815_v18  ;;  %v2254_v21 = vpop.f32.mrb[14].mxu1 }
 0x114   : > { %978 = vadd.xlane.f32.xlu1 %v977_v10  ;;  %924 = vst.msk [vmem:[%s2638_s22 + $0xf0] sm:$0xff] %vm620_vm0, %v2845_v17  ;;  %v2855_v22 = vadd.f32 %v2254_v21, %v861_v16  ;;  %v818_v23 = vpop.f32.mrb[15].mxu1  ;;  %v1016_v51 = vsel %vm620_vm0, %v2845_v17, 0.0 }
 0x115   : > { %922 = vst.msk [vmem:[%s2638_s22 + $0xe0] sm:$0xff] %vm620_vm0, %v2848_v20  ;;  %v2860_v26 = vadd.f32 %v859_v19, %v818_v23  ;;  %v1010_v47 = vsel %vm620_vm0, %v2848_v20, 0.0 }
 0x116   : > { %981 = vadd.xlane.f32.xlu0 %v980_v2  ;;  %925 = vst.msk [vmem:[%s2638_s22 + $0xf8] sm:$0xff] %vm620_vm0, %v2855_v22  ;;  %v1019_v52 = vsel %vm620_vm0, %v2855_v22, 0.0 }
 0x117   : > { %923 = vst.msk [vmem:[%s2638_s22 + $0xe8] sm:$0xff] %vm620_vm0, %v2860_v26  ;;  %v1013_v50 = vsel %vm620_vm0, %v2860_v26, 0.0 }
 0x118   : > { %984 = vadd.xlane.f32.xlu1 %v983_v27 }
 0x11a   : > { %987 = vadd.xlane.f32.xlu0 %v986_v29 }
 0x11c   : > { %990 = vadd.xlane.f32.xlu1 %v989_v31 }
 0x11e   : > { %993 = vadd.xlane.f32.xlu0 %v992_v34 }
 0x120   : > { %996 = vadd.xlane.f32.xlu1 %v995_v36 }
 0x122   : > { %999 = vadd.xlane.f32.xlu0 %v998_v37 }
 0x124   : > { %1002 = vadd.xlane.f32.xlu1 %v1001_v40 }
 0x126   : > { %1005 = vadd.xlane.f32.xlu0 %v1004_v42 }
 0x128   : > { %1008 = vadd.xlane.f32.xlu1 %v1007_v45 }
 0x12a   : > { %1011 = vadd.xlane.f32.xlu0 %v1010_v47 }
 0x12c   : > { %1014 = vadd.xlane.f32.xlu1 %v1013_v50 }
 0x12e   : > { %1017 = vadd.xlane.f32.xlu0 %v1016_v51 }
 0x130   : > { %1020 = vadd.xlane.f32.xlu1 %v1019_v52 }
 0x17e   : > { %v934_v54 = vpop.xlane.xlu1 %933 }
 0x17f   : > { %v1025_v57 = vmul.f32 0.0625, %v934_v54  ;;  %v928_v58 = vpop.xlane.xlu0 %927 }
 0x180   : > { %v1023_v61 = vmul.f32 0.0625, %v928_v58 }
 0x181   : > { %v2898_v62 = vsub.f32 %v2641_v25, %v1025_v57 }
 0x182   : > { %v2901_v0 = vsub.f32 %v2644_v28, %v1023_v61  ;;  %v937_v6 = vpop.xlane.xlu1 %936 }
 0x183   : > { %v1026_v7 = vmul.f32 0.0625, %v937_v6  ;;  %v931_v11 = vpop.xlane.xlu0 %930  ;;  %v1089_v25 = vmul.f32 %v2898_v62, %v2898_v62 }
 0x184   : > { %v1024_v10 = vmul.f32 0.0625, %v931_v11  ;;  %v1087_v13 = vmul.f32 %v2901_v0, %v2901_v0 }
 0x185   : > { %v2906_v14 = vsub.f32 %v2649_v30, %v1026_v7  ;;  %v1125_v27 = vsel %vm620_vm0, %v1089_v25, 0.0 }
 0x186   : > { %v2909_v16 = vsub.f32 %v2656_v33, %v1024_v10  ;;  %v1119_v18 = vsel %vm620_vm0, %v1087_v13, 0.0 }
 0x187   : > { %v940_v28 = vpop.xlane.xlu0 %939  ;;  %1120 = vadd.xlane.f32.xlu0 %v1119_v18  ;;  %v1090_v23 = vmul.f32 %v2906_v14, %v2906_v14 }
 0x188   : > { %v1027_v19 = vmul.f32 0.0625, %v940_v28  ;;  %v1088_v21 = vmul.f32 %v2909_v16, %v2909_v16 }
 0x189   : > { %v943_v2 = vpop.xlane.xlu1 %942  ;;  %v1128_v42 = vsel %vm620_vm0, %v1090_v23, 0.0 }
 0x18a   : > { %v2919_v30 = vsub.f32 %v2676_v44, %v1027_v19  ;;  %v1028_v33 = vmul.f32 0.0625, %v943_v2  ;;  %v1122_v29 = vsel %vm620_vm0, %v1088_v21, 0.0 }
 0x18b   : > { %v946_v31 = vpop.xlane.xlu0 %945  ;;  %1126 = vadd.xlane.f32.xlu0 %v1125_v27  ;;  %1123 = vadd.xlane.f32.xlu1 %v1122_v29 }
 0x18c   : > { %v2924_v34 = vsub.f32 %v2687_v49, %v1028_v33  ;;  %v1029_v36 = vmul.f32 0.0625, %v946_v31  ;;  %v1091_v37 = vmul.f32 %v2919_v30, %v2919_v30 }
 0x18d   : > { %v949_v40 = vpop.xlane.xlu1 %948 }
 0x18e   : > { %v2930_v44 = vsub.f32 %v2673_v41, %v1029_v36  ;;  %v1030_v45 = vmul.f32 0.0625, %v949_v40  ;;  %v1131_v47 = vsel %vm620_vm0, %v1091_v37, 0.0  ;;  %v1092_v50 = vmul.f32 %v2924_v34, %v2924_v34 }
 0x18f   : > { %v952_v51 = vpop.xlane.xlu0 %951  ;;  %1132 = vadd.xlane.f32.xlu0 %v1131_v47  ;;  %1129 = vadd.xlane.f32.xlu1 %v1128_v42 }
 0x190   : > { %v2936_v49 = vsub.f32 %v2681_v46, %v1030_v45  ;;  %v1031_v52 = vmul.f32 0.0625, %v952_v51  ;;  %v1093_v53 = vmul.f32 %v2930_v44, %v2930_v44  ;;  %v1134_v41 = vsel %vm620_vm0, %v1092_v50, 0.0 }
 0x191   : > { %v955_v54 = vpop.xlane.xlu1 %954 }
 0x192   : > { %v2942_v57 = vsub.f32 %v2724_v9, %v1031_v52  ;;  %v1032_v58 = vmul.f32 0.0625, %v955_v54  ;;  %v1137_v61 = vsel %vm620_vm0, %v1093_v53, 0.0  ;;  %v1094_v6 = vmul.f32 %v2936_v49, %v2936_v49 }
 0x193   : > { %v958_v7 = vpop.xlane.xlu0 %957  ;;  %1138 = vadd.xlane.f32.xlu0 %v1137_v61  ;;  %1135 = vadd.xlane.f32.xlu1 %v1134_v41 }
 0x194   : > { %v2948_v46 = vsub.f32 %v2743_v15, %v1032_v58  ;;  %v1033_v11 = vmul.f32 0.0625, %v958_v7  ;;  %v1095_v10 = vmul.f32 %v2942_v57, %v2942_v57  ;;  %v1140_v9 = vsel %vm620_vm0, %v1094_v6, 0.0 }
 0x195   : > { %v961_v13 = vpop.xlane.xlu1 %960 }
 0x196   : > { %v2954_v18 = vsub.f32 %v2716_v5, %v1033_v11  ;;  %v1034_v25 = vmul.f32 0.0625, %v961_v13  ;;  %v1143_v28 = vsel %vm620_vm0, %v1095_v10, 0.0  ;;  %v1096_v19 = vmul.f32 %v2948_v46, %v2948_v46 }
 0x197   : > { %1144 = vadd.xlane.f32.xlu0 %v1143_v28  ;;  %v964_v21 = vpop.xlane.xlu0 %963  ;;  %1141 = vadd.xlane.f32.xlu1 %v1140_v9 }
 0x198   : > { %v2960_v15 = vsub.f32 %v2734_v12, %v1034_v25  ;;  %v1035_v2 = vmul.f32 0.0625, %v964_v21  ;;  %v1097_v23 = vmul.f32 %v2954_v18, %v2954_v18  ;;  %v1146_v5 = vsel %vm620_vm0, %v1096_v19, 0.0 }
 0x199   : > { %v967_v33 = vpop.xlane.xlu1 %966 }
 0x19a   : > { %v2966_v27 = vsub.f32 %v2780_v39, %v1035_v2  ;;  %v1036_v29 = vmul.f32 0.0625, %v967_v33  ;;  %v1149_v31 = vsel %vm620_vm0, %v1097_v23, 0.0  ;;  %v1098_v36 = vmul.f32 %v2960_v15, %v2960_v15 }
 0x19b   : > { %1150 = vadd.xlane.f32.xlu0 %v1149_v31  ;;  %v970_v37 = vpop.xlane.xlu0 %969  ;;  %1147 = vadd.xlane.f32.xlu1 %v1146_v5 }
 0x19c   : > { %v2972_v12 = vsub.f32 %v2799_v48, %v1036_v29  ;;  %v1037_v40 = vmul.f32 0.0625, %v970_v37  ;;  %v1099_v42 = vmul.f32 %v2966_v27, %v2966_v27  ;;  %v1152_v39 = vsel %vm620_vm0, %v1098_v36, 0.0 }
 0x19d   : > { %v973_v45 = vpop.xlane.xlu1 %972 }
 0x19e   : > { %v2978_v47 = vsub.f32 %v2772_v35, %v1037_v40  ;;  %v1038_v50 = vmul.f32 0.0625, %v973_v45  ;;  %v1155_v51 = vsel %vm620_vm0, %v1099_v42, 0.0  ;;  %v1100_v52 = vmul.f32 %v2972_v12, %v2972_v12 }
 0x19f   : > { %1156 = vadd.xlane.f32.xlu0 %v1155_v51  ;;  %v976_v53 = vpop.xlane.xlu0 %975  ;;  %1153 = vadd.xlane.f32.xlu1 %v1152_v39 }
 0x1a0   : > { %v2984_v48 = vsub.f32 %v2790_v43, %v1038_v50  ;;  %v1039_v54 = vmul.f32 0.0625, %v976_v53  ;;  %v1101_v41 = vmul.f32 %v2978_v47, %v2978_v47  ;;  %v1158_v35 = vsel %vm620_vm0, %v1100_v52, 0.0 }
 0x1a1   : > { %v979_v58 = vpop.xlane.xlu1 %978 }
 0x1a2   : > { %v2990_v61 = vsub.f32 %v2706_v60, %v1039_v54  ;;  %v1040_v6 = vmul.f32 0.0625, %v979_v58  ;;  %v1161_v7 = vsel %vm620_vm0, %v1101_v41, 0.0  ;;  %v1102_v11 = vmul.f32 %v2984_v48, %v2984_v48 }
 0x1a3   : > { %1162 = vadd.xlane.f32.xlu0 %v1161_v7  ;;  %v982_v10 = vpop.xlane.xlu0 %981  ;;  %1159 = vadd.xlane.f32.xlu1 %v1158_v35 }
 0x1a4   : > { %v2996_v43 = vsub.f32 %v2722_v8, %v1040_v6  ;;  %v1041_v13 = vmul.f32 0.0625, %v982_v10  ;;  %v1103_v9 = vmul.f32 %v2990_v61, %v2990_v61  ;;  %v1164_v60 = vsel %vm620_vm0, %v1102_v11, 0.0 }
 0x1a5   : > { %v985_v25 = vpop.xlane.xlu1 %984 }
 0x1a6   : > { %v3002_v28 = vsub.f32 %v2702_v56, %v1041_v13  ;;  %v1042_v19 = vmul.f32 0.0625, %v985_v25  ;;  %v1167_v21 = vsel %vm620_vm0, %v1103_v9, 0.0  ;;  %v1104_v2 = vmul.f32 %v2996_v43, %v2996_v43 }
 0x1a7   : > { %1168 = vadd.xlane.f32.xlu0 %v1167_v21  ;;  %v988_v23 = vpop.xlane.xlu0 %987  ;;  %1165 = vadd.xlane.f32.xlu1 %v1164_v60 }
 0x1a8   : > { %v3008_v8 = vsub.f32 %v2714_v3, %v1042_v19  ;;  %v1043_v33 = vmul.f32 0.0625, %v988_v23  ;;  %v1105_v5 = vmul.f32 %v3002_v28, %v3002_v28  ;;  %v1170_v56 = vsel %vm620_vm0, %v1104_v2, 0.0 }
 0x1a9   : > { %v991_v29 = vpop.xlane.xlu1 %990 }
 0x1aa   : > { %v3014_v31 = vsub.f32 %v2762_v24, %v1043_v33  ;;  %v1044_v36 = vmul.f32 0.0625, %v991_v29  ;;  %v1173_v37 = vsel %vm620_vm0, %v1105_v5, 0.0  ;;  %v1106_v40 = vmul.f32 %v3008_v8, %v3008_v8 }
 0x1ab   : > { %1174 = vadd.xlane.f32.xlu0 %v1173_v37  ;;  %v994_v42 = vpop.xlane.xlu0 %993  ;;  %1171 = vadd.xlane.f32.xlu1 %v1170_v56 }
 0x1ac   : > { %v3020_v3 = vsub.f32 %v2778_v38, %v1044_v36  ;;  %v1045_v45 = vmul.f32 0.0625, %v994_v42  ;;  %v1107_v39 = vmul.f32 %v3014_v31, %v3014_v31  ;;  %v1176_v24 = vsel %vm620_vm0, %v1106_v40, 0.0 }
 0x1ad   : > { %v997_v50 = vpop.xlane.xlu1 %996 }
 0x1ae   : > { %v3026_v51 = vsub.f32 %v2758_v1, %v1045_v45  ;;  %v1046_v52 = vmul.f32 0.0625, %v997_v50  ;;  %v1179_v53 = vsel %vm620_vm0, %v1107_v39, 0.0  ;;  %v1108_v54 = vmul.f32 %v3020_v3, %v3020_v3 }
 0x1af   : > { %1180 = vadd.xlane.f32.xlu0 %v1179_v53  ;;  %v1000_v41 = vpop.xlane.xlu0 %999  ;;  %1177 = vadd.xlane.f32.xlu1 %v1176_v24 }
 0x1b0   : > { %v3032_v38 = vsub.f32 %v2770_v32, %v1046_v52  ;;  %v1047_v58 = vmul.f32 0.0625, %v1000_v41  ;;  %v1109_v35 = vmul.f32 %v3026_v51, %v3026_v51  ;;  %v1182_v1 = vsel %vm620_vm0, %v1108_v54, 0.0 }
 0x1b1   : > { %v1003_v6 = vpop.xlane.xlu1 %1002 }
 0x1b2   : > { %v3038_v7 = vsub.f32 %v2816_v59, %v1047_v58  ;;  %v1048_v11 = vmul.f32 0.0625, %v1003_v6  ;;  %v1185_v10 = vsel %vm620_vm0, %v1109_v35, 0.0  ;;  %v1110_v13 = vmul.f32 %v3032_v38, %v3032_v38 }
 0x1b3   : > { %1186 = vadd.xlane.f32.xlu0 %v1185_v10  ;;  %v1006_v9 = vpop.xlane.xlu0 %1005  ;;  %1183 = vadd.xlane.f32.xlu1 %v1182_v1  ;;  %v2342_v10 = vld [vmem:[%s3395_s9 + $0x8] sm:$0xff]  }
 0x1b4   : > { %v3044_v32 = vsub.f32 %v2828_v4, %v1048_v11  ;;  %v1049_v25 = vmul.f32 0.0625, %v1006_v9  ;;  %v1111_v60 = vmul.f32 %v3038_v7, %v3038_v7  ;;  %v1188_v59 = vsel %vm620_vm0, %v1110_v13, 0.0  ;;  %v2343_v13 = vld [vmem:[%s3395_s9 + $0x10] sm:$0xff]  }
 0x1b5   : > { %v1009_v19 = vpop.xlane.xlu1 %1008 }
 0x1b6   : > { %v3050_v21 = vsub.f32 %v2813_v55, %v1049_v25  ;;  %v1050_v2 = vmul.f32 0.0625, %v1009_v19  ;;  %v1191_v23 = vsel %vm620_vm0, %v1111_v60, 0.0  ;;  %v1112_v33 = vmul.f32 %v3044_v32, %v3044_v32 }
 0x1b7   : > { %1192 = vadd.xlane.f32.xlu0 %v1191_v23  ;;  %v1012_v5 = vpop.xlane.xlu0 %1011  ;;  %1189 = vadd.xlane.f32.xlu1 %v1188_v59 }
 0x1b8   : > { %v3056_v4 = vsub.f32 %v2823_v63, %v1050_v2  ;;  %v1051_v29 = vmul.f32 0.0625, %v1012_v5  ;;  %v1113_v56 = vmul.f32 %v3050_v21, %v3050_v21  ;;  %v1194_v55 = vsel %vm620_vm0, %v1112_v33, 0.0 }
 0x1b9   : > { %v1015_v36 = vpop.xlane.xlu1 %1014 }
 0x1ba   : > { %v3062_v37 = vsub.f32 %v2848_v20, %v1051_v29  ;;  %v1052_v40 = vmul.f32 0.0625, %v1015_v36  ;;  %v1197_v42 = vsel %vm620_vm0, %v1113_v56, 0.0  ;;  %v1114_v45 = vmul.f32 %v3056_v4, %v3056_v4 }
 0x1bb   : > { %1198 = vadd.xlane.f32.xlu0 %v1197_v42  ;;  %v1018_v39 = vpop.xlane.xlu0 %1017  ;;  %1195 = vadd.xlane.f32.xlu1 %v1194_v55 }
 0x1bc   : > { %v3068_v63 = vsub.f32 %v2860_v26, %v1052_v40  ;;  %v1053_v50 = vmul.f32 0.0625, %v1018_v39  ;;  %v1115_v24 = vmul.f32 %v3062_v37, %v3062_v37  ;;  %v1200_v20 = vsel %vm620_vm0, %v1114_v45, 0.0 }
 0x1bd   : > { %v1021_v52 = vpop.xlane.xlu1 %1020 }
 0x1be   : > { %v3074_v53 = vsub.f32 %v2845_v17, %v1053_v50  ;;  %v1054_v54 = vmul.f32 0.0625, %v1021_v52  ;;  %v1203_v41 = vsel %vm620_vm0, %v1115_v24, 0.0  ;;  %v1116_v58 = vmul.f32 %v3068_v63, %v3068_v63 }
 0x1bf   : > { %1204 = vadd.xlane.f32.xlu0 %v1203_v41  ;;  %1201 = vadd.xlane.f32.xlu1 %v1200_v20 }
 0x1c0   : > { %v3080_v26 = vsub.f32 %v2855_v22, %v1054_v54  ;;  %v1117_v35 = vmul.f32 %v3074_v53, %v3074_v53  ;;  %v1206_v1 = vsel %vm620_vm0, %v1116_v58, 0.0  ;;  %v2341_v22 = vld [vmem:[%s3395_s9] sm:$0xff]  }
 0x1c1   : > { %2289 = vmatprep.subr.bf16.mxu0 %v2341_v22 }
 0x1c2   : > { %v1209_v6 = vsel %vm620_vm0, %v1117_v35, 0.0  ;;  %v1118_v17 = vmul.f32 %v3080_v26, %v3080_v26  ;;  %2290 = vmatpush3.bf16.msra.mxu0 %v2341_v22 }
 0x1c3   : > { %1210 = vadd.xlane.f32.xlu0 %v1209_v6  ;;  %1207 = vadd.xlane.f32.xlu1 %v1206_v1 }
 0x1c4   : > { %v1212_v11 = vsel %vm620_vm0, %v1118_v17, 0.0  ;;  %2291 = vmatprep.subr.bf16.mxu0 %v2342_v10 }
 0x1c6   : > { %2292 = vmatpush3.bf16.msra.mxu0 %v2342_v10 }
 0x1c7   : > { %1213 = vadd.xlane.f32.xlu1 %v1212_v11  ;;  %2293 = vmatprep.subr.bf16.mxu0 %v2343_v13  ;;  %v3102_v11 = vld [vmem:[%s3391_s5] ss:$0 sm:$0xff] }
 0x1ca   : > { %2294 = vmatpush3.bf16.msra.mxu0 %v2343_v13 }
 0x214   : > { %v1121_v9 = vpop.xlane.xlu0 %1120 }
 0x215   : > { %v1215_v25 = vmul.f32 0.0625, %v1121_v9 }
 0x217   : > { %v1247_v60 = vadd.f32 1e-05, %v1215_v25 }
 0x218   : > { %v1127_v19 = vpop.xlane.xlu0 %1126  ;;  %v1124_v59 = vpop.xlane.xlu1 %1123 }
 0x219   : > { %2345 = vrsqrt.f32 %v1247_v60  ;;  %v1217_v2 = vmul.f32 0.0625, %v1127_v19  ;;  %v1216_v23 = vmul.f32 0.0625, %v1124_v59 }
 0x21b   : > { %v1249_v33 = vadd.f32 1e-05, %v1217_v2  ;;  %v1248_v5 = vadd.f32 1e-05, %v1216_v23 }
 0x21c   : > { %v1133_v29 = vpop.xlane.xlu0 %1132  ;;  %v1130_v56 = vpop.xlane.xlu1 %1129 }
 0x21d   : > { %2347 = vrsqrt.f32 %v1249_v33  ;;  %v1219_v36 = vmul.f32 0.0625, %v1133_v29  ;;  %v1218_v55 = vmul.f32 0.0625, %v1130_v56  ;;  %v3110_v33 = vld [vmem:[%s3392_s6] ss:$0 sm:$0xff] }
 0x21e   : > { %2349 = vrsqrt.f32 %v1248_v5 }
 0x21f   : > { %v1251_v40 = vadd.f32 1e-05, %v1219_v36  ;;  %v1250_v42 = vadd.f32 1e-05, %v1218_v55 }
 0x220   : > { %v1139_v45 = vpop.xlane.xlu0 %1138  ;;  %v1136_v39 = vpop.xlane.xlu1 %1135 }
 0x221   : > { %2351 = vrsqrt.f32 %v1251_v40  ;;  %v1221_v50 = vmul.f32 0.0625, %v1139_v45  ;;  %v1220_v24 = vmul.f32 0.0625, %v1136_v39 }
 0x222   : > { %2353 = vrsqrt.f32 %v1250_v42 }
 0x223   : > { %v2346_v52 = vpop.eup %2345  ;;  %v1253_v20 = vadd.f32 1e-05, %v1221_v50  ;;  %v1252_v54 = vadd.f32 1e-05, %v1220_v24 }
 0x224   : > { %v1145_v41 = vpop.xlane.xlu0 %1144  ;;  %v1142_v58 = vpop.xlane.xlu1 %1141  ;;  %v1311_v1 = vmul.f32 %v2346_v52, %v2901_v0 }
 0x225   : > { %2355 = vrsqrt.f32 %v1253_v20  ;;  %v1223_v35 = vmul.f32 0.0625, %v1145_v41  ;;  %v1222_v6 = vmul.f32 0.0625, %v1142_v58 }
 0x226   : > { %2357 = vrsqrt.f32 %v1252_v54  ;;  %v1350_v0 = vmul.f32 %v3102_v11, %v1311_v1 }
 0x227   : > { %v2348_v17 = vpop.eup %2347  ;;  %v1255_v22 = vadd.f32 1e-05, %v1223_v35  ;;  %v1254_v10 = vadd.f32 1e-05, %v1222_v6 }
 0x228   : > { %v2350_v13 = vpop.eup %2349  ;;  %v1313_v9 = vmul.f32 %v2348_v17, %v2898_v62  ;;  %v1151_v25 = vpop.xlane.xlu0 %1150  ;;  %v1389_v50 = vadd.f32 %v3110_v33, %v1350_v0 }
 0x229   : > { %v1148_v60 = vpop.xlane.xlu1 %1147  ;;  %v1312_v19 = vmul.f32 %v2350_v13, %v2909_v16  ;;  %2359 = vrsqrt.f32 %v1255_v22  ;;  %v1225_v59 = vmul.f32 0.0625, %v1151_v25 }
 0x22a   : > { %v1224_v2 = vmul.f32 0.0625, %v1148_v60  ;;  %2361 = vrsqrt.f32 %v1254_v10  ;;  %v1352_v36 = vmul.f32 %v3102_v11, %v1313_v9 }
 0x22b   : > { %v2352_v23 = vpop.eup %2351  ;;  %v1257_v5 = vadd.f32 1e-05, %v1225_v59  ;;  %v1351_v62 = vmul.f32 %v3102_v11, %v1312_v19 }
 0x22c   : > { %v1256_v29 = vadd.f32 1e-05, %v1224_v2  ;;  %v2354_v56 = vpop.eup %2353  ;;  %v1157_v16 = vpop.xlane.xlu0 %1156  ;;  %v1315_v39 = vmul.f32 %v2352_v23, %v2919_v30  ;;  %v1391_v35 = vadd.f32 %v3110_v33, %v1352_v36 }
 0x22d   : > { %v1154_v55 = vpop.xlane.xlu1 %1153  ;;  %v1314_v40 = vmul.f32 %v2354_v56, %v2906_v14  ;;  %2363 = vrsqrt.f32 %v1257_v5  ;;  %v1227_v42 = vmul.f32 0.0625, %v1157_v16  ;;  %v1390_v24 = vadd.f32 %v3110_v33, %v1351_v62 }
 0x22e   : > { %v1226_v45 = vmul.f32 0.0625, %v1154_v55  ;;  %2365 = vrsqrt.f32 %v1256_v29  ;;  %v1354_v9 = vmul.f32 %v3102_v11, %v1315_v39 }
 0x22f   : > { %v2356_v52 = vpop.eup %2355  ;;  %v1353_v20 = vmul.f32 %v3102_v11, %v1314_v40  ;;  %v1259_v54 = vadd.f32 1e-05, %v1227_v42  ;;  %v1421_v14 = vpack.c.bf16 %v1390_v24, %v1389_v50 }
 0x230   : > { %v1258_v41 = vadd.f32 1e-05, %v1226_v45  ;;  %v2358_v58 = vpop.eup %2357  ;;  %v1163_v6 = vpop.xlane.xlu0 %1162  ;;  %v1317_v10 = vmul.f32 %v2356_v52, %v2930_v44  ;;  %v1393_v56 = vadd.f32 %v3110_v33, %v1354_v9 }
 0x231   : > { %v1160_v1 = vpop.xlane.xlu1 %1159  ;;  %v1392_v17 = vadd.f32 %v3110_v33, %v1353_v20  ;;  %v1316_v30 = vmul.f32 %v2358_v58, %v2924_v34  ;;  %2367 = vrsqrt.f32 %v1259_v54  ;;  %v1229_v22 = vmul.f32 0.0625, %v1163_v6  ;;  %2257 = vmatprep.mubr.msk.bf16.mxu1 %vm620_vm0, %v1421_v14 }
 0x232   : > { %2369 = vrsqrt.f32 %v1258_v41  ;;  %v1228_v13 = vmul.f32 0.0625, %v1160_v1  ;;  %v1356_v16 = vmul.f32 %v3102_v11, %v1317_v10 }
 0x233   : > { %v2360_v25 = vpop.eup %2359  ;;  %v1261_v60 = vadd.f32 1e-05, %v1229_v22  ;;  %v1422_v19 = vpack.c.bf16 %v1392_v17, %v1391_v35  ;;  %v1355_v59 = vmul.f32 %v3102_v11, %v1316_v30 }
 0x234   : > { %v2362_v2 = vpop.eup %2361  ;;  %v1319_v0 = vmul.f32 %v2360_v25, %v2942_v57  ;;  %v1260_v23 = vadd.f32 1e-05, %v1228_v13  ;;  %v1169_v34 = vpop.xlane.xlu0 %1168  ;;  %v1395_v58 = vadd.f32 %v3110_v33, %v1356_v16 }
 0x235   : > { %v1166_v5 = vpop.xlane.xlu1 %1165  ;;  %v1318_v29 = vmul.f32 %v2362_v2, %v2936_v49  ;;  %2371 = vrsqrt.f32 %v1261_v60  ;;  %v1231_v44 = vmul.f32 0.0625, %v1169_v34  ;;  %2258 = vmatmul.mubr.msk.bf16.vlgmr.msra.gmra.mrb[16].mxu1 %vm620_vm0, %v1422_v19  ;;  %v1394_v36 = vadd.f32 %v3110_v33, %v1355_v59 }
 0x236   : > { %v1230_v62 = vmul.f32 0.0625, %v1166_v5  ;;  %2373 = vrsqrt.f32 %v1260_v23  ;;  %v1358_v24 = vmul.f32 %v3102_v11, %v1319_v0 }
 0x237   : > { %v2364_v55 = vpop.eup %2363  ;;  %v1263_v40 = vadd.f32 1e-05, %v1231_v44  ;;  %v1357_v42 = vmul.f32 %v3102_v11, %v1318_v29  ;;  %v1423_v49 = vpack.c.bf16 %v1394_v36, %v1393_v56 }
 0x238   : > { %v1262_v57 = vadd.f32 1e-05, %v1230_v62  ;;  %v2366_v45 = vpop.eup %2365  ;;  %v1175_v39 = vpop.xlane.xlu0 %1174  ;;  %v1321_v41 = vmul.f32 %v2364_v55, %v2954_v18  ;;  %v1397_v13 = vadd.f32 %v3110_v33, %v1358_v24 }
 0x239   : > { %v1172_v50 = vpop.xlane.xlu1 %1171  ;;  %v1320_v52 = vmul.f32 %v2366_v45, %v2948_v46  ;;  %2375 = vrsqrt.f32 %v1263_v40  ;;  %v1233_v20 = vmul.f32 0.0625, %v1175_v39  ;;  %2261 = vmatprep.mubr.msk.bf16.mxu1 %vm620_vm0, %v1423_v49  ;;  %v1396_v35 = vadd.f32 %v3110_v33, %v1357_v42 }
 0x23a   : > { %v1232_v54 = vmul.f32 0.0625, %v1172_v50  ;;  %2377 = vrsqrt.f32 %v1262_v57  ;;  %v1360_v59 = vmul.f32 %v3102_v11, %v1321_v41 }
 0x23b   : > { %v2368_v6 = vpop.eup %2367  ;;  %v1265_v14 = vadd.f32 1e-05, %v1233_v20  ;;  %v1359_v17 = vmul.f32 %v3102_v11, %v1320_v52  ;;  %v1424_v46 = vpack.c.bf16 %v1396_v35, %v1395_v58 }
 0x23c   : > { %v1264_v1 = vadd.f32 1e-05, %v1232_v54  ;;  %v2370_v30 = vpop.eup %2369  ;;  %v1181_v22 = vpop.xlane.xlu0 %1180  ;;  %v1323_v60 = vmul.f32 %v2368_v6, %v2966_v27  ;;  %v1399_v16 = vadd.f32 %v3110_v33, %v1360_v59 }
 0x23d   : > { %v1178_v10 = vpop.xlane.xlu1 %1177  ;;  %v1322_v18 = vmul.f32 %v2370_v30, %v2960_v15  ;;  %2379 = vrsqrt.f32 %v1265_v14  ;;  %v1235_v9 = vmul.f32 0.0625, %v1181_v22  ;;  %2262 = vmatmul.mubr.msk.bf16.gmra.mrb[20].mxu1 %vm620_vm0, %v1424_v46  ;;  %v1398_v19 = vadd.f32 %v3110_v33, %v1359_v17 }
 0x23e   : > { %v1234_v25 = vmul.f32 0.0625, %v1178_v10  ;;  %2381 = vrsqrt.f32 %v1264_v1  ;;  %v1362_v40 = vmul.f32 %v3102_v11, %v1323_v60 }
 0x23f   : > { %v2372_v2 = vpop.eup %2371  ;;  %v1267_v0 = vadd.f32 1e-05, %v1235_v9  ;;  %v1361_v34 = vmul.f32 %v3102_v11, %v1322_v18  ;;  %v1425_v44 = vpack.c.bf16 %v1398_v19, %v1397_v13 }
 0x240   : > { %v1266_v23 = vadd.f32 1e-05, %v1234_v25  ;;  %v2374_v5 = vpop.eup %2373  ;;  %v1325_v15 = vmul.f32 %v2372_v2, %v2978_v47  ;;  %v1187_v29 = vpop.xlane.xlu0 %1186  ;;  %v1401_v58 = vadd.f32 %v3110_v33, %v1362_v40 }
 0x241   : > { %v1184_v62 = vpop.xlane.xlu1 %1183  ;;  %v1324_v27 = vmul.f32 %v2374_v5, %v2972_v12  ;;  %2383 = vrsqrt.f32 %v1267_v0  ;;  %v1237_v56 = vmul.f32 0.0625, %v1187_v29  ;;  %2265 = vmatprep.mubr.msk.bf16.mxu1 %vm620_vm0, %v1425_v44  ;;  %v1400_v55 = vadd.f32 %v3110_v33, %v1361_v34 }
 0x242   : > { %v1236_v36 = vmul.f32 0.0625, %v1184_v62  ;;  %2385 = vrsqrt.f32 %v1266_v23  ;;  %v1364_v24 = vmul.f32 %v3102_v11, %v1325_v15 }
 0x243   : > { %v2376_v57 = vpop.eup %2375  ;;  %v1269_v42 = vadd.f32 1e-05, %v1237_v56  ;;  %v1363_v45 = vmul.f32 %v3102_v11, %v1324_v27  ;;  %v1426_v12 = vpack.c.bf16 %v1400_v55, %v1399_v16 }
 0x244   : > { %v1268_v47 = vadd.f32 1e-05, %v1236_v36  ;;  %v2378_v39 = vpop.eup %2377  ;;  %v1193_v49 = vpop.xlane.xlu0 %1192  ;;  %v1327_v41 = vmul.f32 %v2376_v57, %v2990_v61  ;;  %v1403_v10 = vadd.f32 %v3110_v33, %v1364_v24 }
 0x245   : > { %v1190_v50 = vpop.xlane.xlu1 %1189  ;;  %v1326_v52 = vmul.f32 %v2378_v39, %v2984_v48  ;;  %2387 = vrsqrt.f32 %v1269_v42  ;;  %v1239_v20 = vmul.f32 0.0625, %v1193_v49  ;;  %2266 = vmatmul.mubr.msk.bf16.gmra.mrb[24].mxu1 %vm620_vm0, %v1426_v12  ;;  %v1402_v35 = vadd.f32 %v3110_v33, %v1363_v45 }
 0x246   : > { %v1238_v54 = vmul.f32 0.0625, %v1190_v50  ;;  %2389 = vrsqrt.f32 %v1268_v47  ;;  %v1366_v60 = vmul.f32 %v3102_v11, %v1327_v41 }
 0x247   : > { %v2380_v6 = vpop.eup %2379  ;;  %v1271_v14 = vadd.f32 1e-05, %v1239_v20  ;;  %v1365_v17 = vmul.f32 %v3102_v11, %v1326_v52  ;;  %v1427_v48 = vpack.c.bf16 %v1402_v35, %v1401_v58 }
 0x248   : > { %v1270_v1 = vadd.f32 1e-05, %v1238_v54  ;;  %v2382_v30 = vpop.eup %2381  ;;  %v1199_v22 = vpop.xlane.xlu0 %1198  ;;  %v1329_v9 = vmul.f32 %v2380_v6, %v3002_v28  ;;  %v1405_v62 = vadd.f32 %v3110_v33, %v1366_v60 }
 0x249   : > { %v1196_v46 = vpop.xlane.xlu1 %1195  ;;  %v1328_v61 = vmul.f32 %v2382_v30, %v2996_v43  ;;  %2391 = vrsqrt.f32 %v1271_v14  ;;  %v1241_v13 = vmul.f32 0.0625, %v1199_v22  ;;  %2269 = vmatprep.mubr.msk.bf16.mxu1 %vm620_vm0, %v1427_v48  ;;  %v1404_v25 = vadd.f32 %v3110_v33, %v1365_v17 }
 0x24a   : > { %v1240_v18 = vmul.f32 0.0625, %v1196_v46  ;;  %2393 = vrsqrt.f32 %v1270_v1  ;;  %v1368_v56 = vmul.f32 %v3102_v11, %v1329_v9 }
 0x24b   : > { %v2384_v19 = vpop.eup %2383  ;;  %v1273_v59 = vadd.f32 1e-05, %v1241_v13  ;;  %v1367_v0 = vmul.f32 %v3102_v11, %v1328_v61  ;;  %v1428_v5 = vpack.c.bf16 %v1404_v25, %v1403_v10 }
 0x24c   : > { %v1272_v2 = vadd.f32 1e-05, %v1240_v18  ;;  %v2386_v23 = vpop.eup %2385  ;;  %v1331_v43 = vmul.f32 %v2384_v19, %v3014_v31  ;;  %v1205_v34 = vpop.xlane.xlu0 %1204  ;;  %v1407_v50 = vadd.f32 %v3110_v33, %v1368_v56 }
 0x24d   : > { %v1202_v15 = vpop.xlane.xlu1 %1201  ;;  %v1330_v28 = vmul.f32 %v2386_v23, %v3008_v8  ;;  %2395 = vrsqrt.f32 %v1273_v59  ;;  %v1243_v29 = vmul.f32 0.0625, %v1205_v34  ;;  %2270 = vmatmul.mubr.msk.bf16.gmra.mrb[28].mxu1 %vm620_vm0, %v1428_v5  ;;  %v1406_v27 = vadd.f32 %v3110_v33, %v1367_v0 }
 0x24e   : > { %v1242_v44 = vmul.f32 0.0625, %v1202_v15  ;;  %2397 = vrsqrt.f32 %v1272_v2  ;;  %v1370_v45 = vmul.f32 %v3102_v11, %v1331_v43 }
 0x24f   : > { %v2388_v36 = vpop.eup %2387  ;;  %v1275_v16 = vadd.f32 1e-05, %v1243_v29  ;;  %v1369_v55 = vmul.f32 %v3102_v11, %v1330_v28  ;;  %v1429_v42 = vpack.c.bf16 %v1406_v27, %v1405_v62 }
 0x250   : > { %v1274_v31 = vadd.f32 1e-05, %v1242_v44  ;;  %v2390_v40 = vpop.eup %2389  ;;  %v1333_v8 = vmul.f32 %v2388_v36, %v3026_v51  ;;  %v1211_v57 = vpop.xlane.xlu0 %1210  ;;  %v1409_v6 = vadd.f32 %v3110_v33, %v1370_v45 }
 0x251   : > { %v1208_v47 = vpop.xlane.xlu1 %1207  ;;  %v1332_v39 = vmul.f32 %v2390_v40, %v3020_v3  ;;  %2399 = vrsqrt.f32 %v1275_v16  ;;  %v1245_v49 = vmul.f32 0.0625, %v1211_v57  ;;  %2273 = vmatprep.mubr.msk.bf16.mxu1 %vm620_vm0, %v1429_v42  ;;  %v1408_v24 = vadd.f32 %v3110_v33, %v1369_v55 }
 0x252   : > { %v1244_v12 = vmul.f32 0.0625, %v1208_v47  ;;  %2401 = vrsqrt.f32 %v1274_v31  ;;  %v1372_v14 = vmul.f32 %v3102_v11, %v1333_v8 }
 0x253   : > { %v2392_v52 = vpop.eup %2391  ;;  %v1277_v20 = vadd.f32 1e-05, %v1245_v49  ;;  %v1371_v54 = vmul.f32 %v3102_v11, %v1332_v39  ;;  %v1430_v35 = vpack.c.bf16 %v1408_v24, %v1407_v50 }
 0x254   : > { %v1276_v51 = vadd.f32 1e-05, %v1244_v12  ;;  %v2394_v41 = vpop.eup %2393  ;;  %v1335_v58 = vmul.f32 %v2392_v52, %v3038_v7  ;;  %v1411_v61 = vadd.f32 %v3110_v33, %v1372_v14 }
 0x255   : > { %v1214_v3 = vpop.xlane.xlu1 %1213  ;;  %v1334_v1 = vmul.f32 %v2394_v41, %v3032_v38  ;;  %2403 = vrsqrt.f32 %v1277_v20  ;;  %v1410_v30 = vadd.f32 %v3110_v33, %v1371_v54  ;;  %2274 = vmatmul.mubr.msk.bf16.gmra.mrb[32].mxu1 %vm620_vm0, %v1430_v35 }
 0x256   : > { %v1246_v17 = vmul.f32 0.0625, %v1214_v3  ;;  %2405 = vrsqrt.f32 %v1276_v51  ;;  %v1374_v13 = vmul.f32 %v3102_v11, %v1335_v58 }
 0x257   : > { %v2396_v22 = vpop.eup %2395  ;;  %v1431_v46 = vpack.c.bf16 %v1410_v30, %v1409_v6  ;;  %v1373_v7 = vmul.f32 %v3102_v11, %v1334_v1 }
 0x258   : > { %v1278_v48 = vadd.f32 1e-05, %v1246_v17  ;;  %v2398_v10 = vpop.eup %2397  ;;  %v1337_v18 = vmul.f32 %v2396_v22, %v3050_v21  ;;  %v1413_v2 = vadd.f32 %v3110_v33, %v1374_v13 }
 0x259   : > { %v1336_v38 = vmul.f32 %v2398_v10, %v3044_v32  ;;  %2277 = vmatprep.mubr.msk.bf16.mxu1 %vm620_vm0, %v1431_v46  ;;  %v1412_v9 = vadd.f32 %v3110_v33, %v1373_v7 }
 0x25a   : > { %2407 = vrsqrt.f32 %v1278_v48  ;;  %v1376_v32 = vmul.f32 %v3102_v11, %v1337_v18 }
 0x25b   : > { %v2400_v25 = vpop.eup %2399  ;;  %v1432_v60 = vpack.c.bf16 %v1412_v9, %v1411_v61  ;;  %v1375_v19 = vmul.f32 %v3102_v11, %v1336_v38 }
 0x25c   : > { %v2402_v59 = vpop.eup %2401  ;;  %v1339_v0 = vmul.f32 %v2400_v25, %v3062_v37  ;;  %v1415_v37 = vadd.f32 %v3110_v33, %v1376_v32 }
 0x25d   : > { %v1338_v23 = vmul.f32 %v2402_v59, %v3056_v4  ;;  %v1414_v21 = vadd.f32 %v3110_v33, %v1375_v19  ;;  %2278 = vmatmul.mubr.msk.bf16.gmra.mrb[36].mxu1 %vm620_vm0, %v1432_v60 }
 0x25e   : > { %v1378_v44 = vmul.f32 %v3102_v11, %v1339_v0 }
 0x25f   : > { %v2404_v43 = vpop.eup %2403  ;;  %v1433_v34 = vpack.c.bf16 %v1414_v21, %v1413_v2  ;;  %v1377_v5 = vmul.f32 %v3102_v11, %v1338_v23 }
 0x260   : > { %v2406_v15 = vpop.eup %2405  ;;  %v1341_v28 = vmul.f32 %v2404_v43, %v3074_v53  ;;  %v1417_v53 = vadd.f32 %v3110_v33, %v1378_v44 }
 0x261   : > { %v1340_v29 = vmul.f32 %v2406_v15, %v3068_v63  ;;  %2281 = vmatprep.mubr.msk.bf16.mxu1 %vm620_vm0, %v1433_v34  ;;  %v1416_v4 = vadd.f32 %v3110_v33, %v1377_v5 }
 0x262   : > { %v1380_v16 = vmul.f32 %v3102_v11, %v1341_v28 }
 0x263   : > { %v1434_v27 = vpack.c.bf16 %v1416_v4, %v1415_v37  ;;  %v1379_v56 = vmul.f32 %v3102_v11, %v1340_v29 }
 0x264   : > { %v2408_v62 = vpop.eup %2407  ;;  %v1419_v40 = vadd.f32 %v3110_v33, %v1380_v16 }
 0x265   : > { %v1342_v36 = vmul.f32 %v2408_v62, %v3080_v26  ;;  %v1418_v63 = vadd.f32 %v3110_v33, %v1379_v56  ;;  %2282 = vmatmul.mubr.msk.bf16.gmra.mrb[40].mxu1 %vm620_vm0, %v1434_v27  ;;  %v2344_v26 = vld [vmem:[%s3395_s9 + $0x18] sm:$0xff]  }
 0x266   : > { %2295 = vmatprep.subr.bf16.mxu0 %v2344_v26 }
 0x267   : > { %v1381_v31 = vmul.f32 %v3102_v11, %v1342_v36  ;;  %v1435_v55 = vpack.c.bf16 %v1418_v63, %v1417_v53  ;;  %2296 = vmatpush3.bf16.msra.mxu0 %v2344_v26  ;;  %v3226_v11 = vld [vmem:[%s3394_s8] ss:$0 sm:$0xff] }
 0x269   : > { %v1420_v8 = vadd.f32 %v3110_v33, %v1381_v31  ;;  %2285 = vmatprep.mubr.msk.bf16.mxu1 %vm620_vm0, %v1435_v55 }
 0x26b   : > { %v1436_v57 = vpack.c.bf16 %v1420_v8, %v1419_v40 }
 0x26d   : > { %2286 = vmatmul.mubr.msk.bf16.gmra.mrb[44].mxu1 %vm620_vm0, %v1436_v57 }
 0x308   : > { %v2259_v42 = vpop.f32.mrb[16].mxu1 }
 0x309   : > { %v1543_v47 = vadd.f32 %v2259_v42, %v3226_v11  ;;  %v1534_v33 = vpop.f32.mrb[17].mxu1 }
 0x30a   : > { %v1535_v45 = vadd.f32 %v3226_v11, %v1534_v33  ;;  %v2260_v39 = vpop.f32.mrb[18].mxu1 }
 0x30b   : > { %v1546_v49 = vadd.f32 %v2260_v39, %v3226_v11  ;;  %v1537_v12 = vpop.f32.mrb[19].mxu1  ;;  %v1663_v24 = vmax.f32 %v1543_v47, 0.0 }
 0x30c   : > { %v1538_v50 = vadd.f32 %v3226_v11, %v1537_v12  ;;  %v1661_v20 = vmax.f32 %v1535_v45, 0.0 }
 0x30d   : > { %v1664_v52 = vmax.f32 %v1546_v49, 0.0 }
 0x30e   : > { %v1662_v51 = vmax.f32 %v1538_v50, 0.0 }
 0x30f   : > { %v1694_v54 = vpack.c.bf16 %v1664_v52, %v1663_v24 }
 0x310   : > { %v1693_v41 = vpack.c.bf16 %v1662_v51, %v1661_v20  ;;  %v2263_v58 = vpop.f32.mrb[20].mxu1 }
 0x311   : > { %v1559_v35 = vadd.f32 %v2263_v58, %v3226_v11  ;;  %v1550_v3 = vpop.f32.mrb[21].mxu1 }
 0x312   : > { %2297 = vmatprep.mubr.msk.bf16.mxu0 %vm1748_vm1, %v1693_v41  ;;  %v1551_v6 = vadd.f32 %v3226_v11, %v1550_v3  ;;  %v2264_v14 = vpop.f32.mrb[22].mxu1 }
 0x313   : > { %2298 = vmatmul.mubr.msk.bf16.vlgmr.msra.gmra.mrb[16].mxu0 %vm1748_vm1, %v1694_v54  ;;  %v1562_v1 = vadd.f32 %v2264_v14, %v3226_v11  ;;  %v1553_v17 = vpop.f32.mrb[23].mxu1  ;;  %v1667_v22 = vmax.f32 %v1559_v35, 0.0 }
 0x314   : > { %v1554_v30 = vadd.f32 %v3226_v11, %v1553_v17  ;;  %v1665_v46 = vmax.f32 %v1551_v6, 0.0 }
 0x315   : > { %v1668_v48 = vmax.f32 %v1562_v1, 0.0 }
 0x316   : > { %v1666_v7 = vmax.f32 %v1554_v30, 0.0 }
 0x317   : > { %v1696_v10 = vpack.c.bf16 %v1668_v48, %v1667_v22 }
 0x318   : > { %v1695_v61 = vpack.c.bf16 %v1666_v7, %v1665_v46  ;;  %v2267_v13 = vpop.f32.mrb[24].mxu1 }
 0x319   : > { %v1575_v18 = vadd.f32 %v2267_v13, %v3226_v11  ;;  %v1566_v38 = vpop.f32.mrb[25].mxu1 }
 0x31a   : > { %v1567_v9 = vadd.f32 %v3226_v11, %v1566_v38  ;;  %v2268_v25 = vpop.f32.mrb[26].mxu1  ;;  %2301 = vmatprep.mubr.msk.bf16.mxu0 %vm1748_vm1, %v1695_v61 }
 0x31b   : > { %v1578_v60 = vadd.f32 %v2268_v25, %v3226_v11  ;;  %v1569_v19 = vpop.f32.mrb[27].mxu1  ;;  %2302 = vmatmul.mubr.msk.bf16.gmra.mrb[20].mxu0 %vm1748_vm1, %v1696_v10  ;;  %v1671_v2 = vmax.f32 %v1575_v18, 0.0 }
 0x31c   : > { %v1570_v59 = vadd.f32 %v3226_v11, %v1569_v19  ;;  %v1669_v23 = vmax.f32 %v1567_v9, 0.0 }
 0x31d   : > { %v1672_v0 = vmax.f32 %v1578_v60, 0.0 }
 0x31e   : > { %v1670_v21 = vmax.f32 %v1570_v59, 0.0 }
 0x31f   : > { %v1698_v32 = vpack.c.bf16 %v1672_v0, %v1671_v2 }
 0x320   : > { %v1697_v43 = vpack.c.bf16 %v1670_v21, %v1669_v23  ;;  %v2271_v34 = vpop.f32.mrb[28].mxu1 }
 0x321   : > { %v1591_v5 = vadd.f32 %v2271_v34, %v3226_v11  ;;  %v1582_v15 = vpop.f32.mrb[29].mxu1 }
 0x322   : > { %v1583_v28 = vadd.f32 %v3226_v11, %v1582_v15  ;;  %v2272_v29 = vpop.f32.mrb[30].mxu1  ;;  %2305 = vmatprep.mubr.msk.bf16.mxu0 %vm1748_vm1, %v1697_v43 }
 0x323   : > { %v1594_v37 = vadd.f32 %v2272_v29, %v3226_v11  ;;  %v1585_v4 = vpop.f32.mrb[31].mxu1  ;;  %2306 = vmatmul.mubr.msk.bf16.gmra.mrb[24].mxu0 %vm1748_vm1, %v1698_v32  ;;  %v1675_v62 = vmax.f32 %v1591_v5, 0.0 }
 0x324   : > { %v1586_v44 = vadd.f32 %v3226_v11, %v1585_v4  ;;  %v1673_v56 = vmax.f32 %v1583_v28, 0.0 }
 0x325   : > { %v1676_v27 = vmax.f32 %v1594_v37, 0.0 }
 0x326   : > { %v1674_v36 = vmax.f32 %v1586_v44, 0.0  ;;  %v3279_v44 = vld [vmem:[%s3396_s10] ss:$0 sm:$0xff] }
 0x327   : > { %v1700_v16 = vpack.c.bf16 %v1676_v27, %v1675_v62 }
 0x328   : > { %v1699_v53 = vpack.c.bf16 %v1674_v36, %v1673_v56  ;;  %v2275_v63 = vpop.f32.mrb[32].mxu1 }
 0x329   : > { %v1607_v31 = vadd.f32 %v2275_v63, %v3226_v11  ;;  %v1598_v55 = vpop.f32.mrb[33].mxu1 }
 0x32a   : > { %v1599_v40 = vadd.f32 %v3226_v11, %v1598_v55  ;;  %v2276_v8 = vpop.f32.mrb[34].mxu1  ;;  %2309 = vmatprep.mubr.msk.bf16.mxu0 %vm1748_vm1, %v1699_v53 }
 0x32b   : > { %v1610_v57 = vadd.f32 %v2276_v8, %v3226_v11  ;;  %v1601_v26 = vpop.f32.mrb[35].mxu1  ;;  %2310 = vmatmul.mubr.msk.bf16.gmra.mrb[28].mxu0 %vm1748_vm1, %v1700_v16  ;;  %v1679_v47 = vmax.f32 %v1607_v31, 0.0 }
 0x32c   : > { %v1602_v42 = vadd.f32 %v3226_v11, %v1601_v26  ;;  %v1677_v45 = vmax.f32 %v1599_v40, 0.0 }
 0x32d   : > { %v1680_v33 = vmax.f32 %v1610_v57, 0.0 }
 0x32e   : > { %v1678_v39 = vmax.f32 %v1602_v42, 0.0 }
 0x32f   : > { %v1702_v49 = vpack.c.bf16 %v1680_v33, %v1679_v47 }
 0x330   : > { %v1701_v12 = vpack.c.bf16 %v1678_v39, %v1677_v45  ;;  %v2279_v50 = vpop.f32.mrb[36].mxu1 }
 0x331   : > { %v1623_v24 = vadd.f32 %v2279_v50, %v3226_v11  ;;  %v1614_v52 = vpop.f32.mrb[37].mxu1 }
 0x332   : > { %v1615_v20 = vadd.f32 %v3226_v11, %v1614_v52  ;;  %v2280_v51 = vpop.f32.mrb[38].mxu1  ;;  %2313 = vmatprep.mubr.msk.bf16.mxu0 %vm1748_vm1, %v1701_v12 }
 0x333   : > { %v1626_v54 = vadd.f32 %v2280_v51, %v3226_v11  ;;  %v1617_v41 = vpop.f32.mrb[39].mxu1  ;;  %2314 = vmatmul.mubr.msk.bf16.gmra.mrb[32].mxu0 %vm1748_vm1, %v1702_v49  ;;  %v1683_v35 = vmax.f32 %v1623_v24, 0.0 }
 0x334   : > { %v1618_v58 = vadd.f32 %v3226_v11, %v1617_v41  ;;  %v1681_v6 = vmax.f32 %v1615_v20, 0.0 }
 0x335   : > { %v1684_v3 = vmax.f32 %v1626_v54, 0.0 }
 0x336   : > { %v1682_v14 = vmax.f32 %v1618_v58, 0.0 }
 0x337   : > { %v1704_v1 = vpack.c.bf16 %v1684_v3, %v1683_v35 }
 0x338   : > { %v1703_v17 = vpack.c.bf16 %v1682_v14, %v1681_v6  ;;  %v2283_v30 = vpop.f32.mrb[40].mxu1 }
 0x339   : > { %v1639_v22 = vadd.f32 %v2283_v30, %v3226_v11  ;;  %v1630_v48 = vpop.f32.mrb[41].mxu1 }
 0x33a   : > { %v1631_v46 = vadd.f32 %v3226_v11, %v1630_v48  ;;  %v2284_v7 = vpop.f32.mrb[42].mxu1  ;;  %2317 = vmatprep.mubr.msk.bf16.mxu0 %vm1748_vm1, %v1703_v17 }
 0x33b   : > { %v1642_v10 = vadd.f32 %v2284_v7, %v3226_v11  ;;  %v1633_v61 = vpop.f32.mrb[43].mxu1  ;;  %2318 = vmatmul.mubr.msk.bf16.gmra.mrb[36].mxu0 %vm1748_vm1, %v1704_v1  ;;  %v1687_v18 = vmax.f32 %v1639_v22, 0.0 }
 0x33c   : > { %v1634_v13 = vadd.f32 %v3226_v11, %v1633_v61  ;;  %v1685_v9 = vmax.f32 %v1631_v46, 0.0 }
 0x33d   : > { %v1688_v38 = vmax.f32 %v1642_v10, 0.0 }
 0x33e   : > { %v1686_v25 = vmax.f32 %v1634_v13, 0.0 }
 0x33f   : > { %v1706_v60 = vpack.c.bf16 %v1688_v38, %v1687_v18 }
 0x340   : > { %v1705_v19 = vpack.c.bf16 %v1686_v25, %v1685_v9  ;;  %v2287_v59 = vpop.f32.mrb[44].mxu1 }
 0x341   : > { %v1655_v2 = vadd.f32 %v2287_v59, %v3226_v11  ;;  %v1646_v0 = vpop.f32.mrb[45].mxu1 }
 0x342   : > { %v1647_v23 = vadd.f32 %v3226_v11, %v1646_v0  ;;  %v2288_v21 = vpop.f32.mrb[46].mxu1  ;;  %2321 = vmatprep.mubr.msk.bf16.mxu0 %vm1748_vm1, %v1705_v19 }
 0x343   : > { %v1658_v32 = vadd.f32 %v2288_v21, %v3226_v11  ;;  %v1649_v43 = vpop.f32.mrb[47].mxu1  ;;  %2322 = vmatmul.mubr.msk.bf16.gmra.mrb[40].mxu0 %vm1748_vm1, %v1706_v60  ;;  %v1691_v5 = vmax.f32 %v1655_v2, 0.0 }
 0x344   : > { %v1650_v34 = vadd.f32 %v3226_v11, %v1649_v43  ;;  %v1689_v28 = vmax.f32 %v1647_v23, 0.0 }
 0x345   : > { %v1692_v15 = vmax.f32 %v1658_v32, 0.0 }
 0x346   : > { %v1690_v29 = vmax.f32 %v1650_v34, 0.0 }
 0x347   : > { %v1708_v37 = vpack.c.bf16 %v1692_v15, %v1691_v5 }
 0x348   : > { %v1707_v4 = vpack.c.bf16 %v1690_v29, %v1689_v28 }
 0x34a   : > { %2325 = vmatprep.mubr.msk.bf16.mxu0 %vm1748_vm1, %v1707_v4 }
 0x34b   : > { %2326 = vmatmul.mubr.msk.bf16.gmra.mrb[44].mxu0 %vm1748_vm1, %v1708_v37 }
 0x3e6   : > { %v2299_v11 = vpop.f32.mrb[16].mxu0 }
 0x3e7   : > { %v1840_v62 = vadd.f32 %v2299_v11, %v3279_v44  ;;  %v1831_v27 = vpop.f32.mrb[17].mxu0 }
 0x3e8   : > { %v1832_v56 = vadd.f32 %v3279_v44, %v1831_v27  ;;  %v2300_v36 = vpop.f32.mrb[18].mxu0 }
 0x3e9   : > { %1960 = vst.msk [vmem:[%s3285_s27 + $0x10] sm:$0xff] %vm620_vm0, %v1840_v62  ;;  %v1843_v16 = vadd.f32 %v2300_v36, %v3279_v44  ;;  %v1834_v53 = vpop.f32.mrb[19].mxu0 }
 0x3ea   : > { %1958 = vst.msk [vmem:[%s3285_s27] sm:$0xff] %vm620_vm0, %v1832_v56  ;;  %v1835_v63 = vadd.f32 %v3279_v44, %v1834_v53 }
 0x3eb   : > { %1961 = vst.msk [vmem:[%s3285_s27 + $0x18] sm:$0xff] %vm620_vm0, %v1843_v16 }
 0x3ec   : > { %1959 = vst.msk [vmem:[%s3285_s27 + $0x8] sm:$0xff] %vm620_vm0, %v1835_v63 }
 0x3ee   : > { %v2303_v31 = vpop.f32.mrb[20].mxu0 }
 0x3ef   : > { %v1856_v55 = vadd.f32 %v2303_v31, %v3279_v44  ;;  %v1847_v40 = vpop.f32.mrb[21].mxu0 }
 0x3f0   : > { %v1848_v8 = vadd.f32 %v3279_v44, %v1847_v40  ;;  %v2304_v57 = vpop.f32.mrb[22].mxu0 }
 0x3f1   : > { %1964 = vst.msk [vmem:[%s3285_s27 + $0x30] sm:$0xff] %vm620_vm0, %v1856_v55  ;;  %v1859_v26 = vadd.f32 %v2304_v57, %v3279_v44  ;;  %v1850_v42 = vpop.f32.mrb[23].mxu0 }
 0x3f2   : > { %1962 = vst.msk [vmem:[%s3285_s27 + $0x20] sm:$0xff] %vm620_vm0, %v1848_v8  ;;  %v1851_v47 = vadd.f32 %v3279_v44, %v1850_v42 }
 0x3f3   : > { %1965 = vst.msk [vmem:[%s3285_s27 + $0x38] sm:$0xff] %vm620_vm0, %v1859_v26 }
 0x3f4   : > { %1963 = vst.msk [vmem:[%s3285_s27 + $0x28] sm:$0xff] %vm620_vm0, %v1851_v47 }
 0x3f6   : > { %v2307_v33 = vpop.f32.mrb[24].mxu0 }
 0x3f7   : > { %v1872_v45 = vadd.f32 %v2307_v33, %v3279_v44  ;;  %v1863_v39 = vpop.f32.mrb[25].mxu0 }
 0x3f8   : > { %v1864_v49 = vadd.f32 %v3279_v44, %v1863_v39  ;;  %v2308_v12 = vpop.f32.mrb[26].mxu0 }
 0x3f9   : > { %1968 = vst.msk [vmem:[%s3285_s27 + $0x50] sm:$0xff] %vm620_vm0, %v1872_v45  ;;  %v1875_v50 = vadd.f32 %v2308_v12, %v3279_v44  ;;  %v1866_v24 = vpop.f32.mrb[27].mxu0 }
 0x3fa   : > { %1966 = vst.msk [vmem:[%s3285_s27 + $0x40] sm:$0xff] %vm620_vm0, %v1864_v49  ;;  %v1867_v52 = vadd.f32 %v3279_v44, %v1866_v24 }
 0x3fb   : > { %1969 = vst.msk [vmem:[%s3285_s27 + $0x58] sm:$0xff] %vm620_vm0, %v1875_v50 }
 0x3fc   : > { %1967 = vst.msk [vmem:[%s3285_s27 + $0x48] sm:$0xff] %vm620_vm0, %v1867_v52 }
 0x3fe   : > { %v2311_v20 = vpop.f32.mrb[28].mxu0 }
 0x3ff   : > { %v1888_v51 = vadd.f32 %v2311_v20, %v3279_v44  ;;  %v1879_v54 = vpop.f32.mrb[29].mxu0 }
 0x400   : > { %v1880_v41 = vadd.f32 %v3279_v44, %v1879_v54  ;;  %v2312_v58 = vpop.f32.mrb[30].mxu0 }
 0x401   : > { %1972 = vst.msk [vmem:[%s3285_s27 + $0x70] sm:$0xff] %vm620_vm0, %v1888_v51  ;;  %v1891_v35 = vadd.f32 %v2312_v58, %v3279_v44  ;;  %v1882_v3 = vpop.f32.mrb[31].mxu0 }
 0x402   : > { %1970 = vst.msk [vmem:[%s3285_s27 + $0x60] sm:$0xff] %vm620_vm0, %v1880_v41  ;;  %v1883_v6 = vadd.f32 %v3279_v44, %v1882_v3 }
 0x403   : > { %1973 = vst.msk [vmem:[%s3285_s27 + $0x78] sm:$0xff] %vm620_vm0, %v1891_v35 }
 0x404   : > { %1971 = vst.msk [vmem:[%s3285_s27 + $0x68] sm:$0xff] %vm620_vm0, %v1883_v6 }
 0x406   : > { %v2315_v14 = vpop.f32.mrb[32].mxu0 }
 0x407   : > { %v1904_v1 = vadd.f32 %v2315_v14, %v3279_v44  ;;  %v1895_v17 = vpop.f32.mrb[33].mxu0 }
 0x408   : > { %v1896_v30 = vadd.f32 %v3279_v44, %v1895_v17  ;;  %v2316_v22 = vpop.f32.mrb[34].mxu0 }
 0x409   : > { %1976 = vst.msk [vmem:[%s3285_s27 + $0x90] sm:$0xff] %vm620_vm0, %v1904_v1  ;;  %v1907_v48 = vadd.f32 %v2316_v22, %v3279_v44  ;;  %v1898_v46 = vpop.f32.mrb[35].mxu0 }
 0x40a   : > { %1974 = vst.msk [vmem:[%s3285_s27 + $0x80] sm:$0xff] %vm620_vm0, %v1896_v30  ;;  %v1899_v7 = vadd.f32 %v3279_v44, %v1898_v46 }
 0x40b   : > { %1977 = vst.msk [vmem:[%s3285_s27 + $0x98] sm:$0xff] %vm620_vm0, %v1907_v48 }
 0x40c   : > { %1975 = vst.msk [vmem:[%s3285_s27 + $0x88] sm:$0xff] %vm620_vm0, %v1899_v7 }
 0x40e   : > { %v2319_v10 = vpop.f32.mrb[36].mxu0 }
 0x40f   : > { %v1920_v61 = vadd.f32 %v2319_v10, %v3279_v44  ;;  %v1911_v13 = vpop.f32.mrb[37].mxu0 }
 0x410   : > { %v1912_v18 = vadd.f32 %v3279_v44, %v1911_v13  ;;  %v2320_v38 = vpop.f32.mrb[38].mxu0 }
 0x411   : > { %1980 = vst.msk [vmem:[%s3285_s27 + $0xb0] sm:$0xff] %vm620_vm0, %v1920_v61  ;;  %v1923_v9 = vadd.f32 %v2320_v38, %v3279_v44  ;;  %v1914_v25 = vpop.f32.mrb[39].mxu0 }
 0x412   : > { %1978 = vst.msk [vmem:[%s3285_s27 + $0xa0] sm:$0xff] %vm620_vm0, %v1912_v18  ;;  %v1915_v60 = vadd.f32 %v3279_v44, %v1914_v25 }
 0x413   : > { %1981 = vst.msk [vmem:[%s3285_s27 + $0xb8] sm:$0xff] %vm620_vm0, %v1923_v9 }
 0x414   : > { %1979 = vst.msk [vmem:[%s3285_s27 + $0xa8] sm:$0xff] %vm620_vm0, %v1915_v60 }
 0x416   : > { %v2323_v19 = vpop.f32.mrb[40].mxu0 }
 0x417   : > { %v1936_v59 = vadd.f32 %v2323_v19, %v3279_v44  ;;  %v1927_v2 = vpop.f32.mrb[41].mxu0 }
 0x418   : > { %v1928_v0 = vadd.f32 %v3279_v44, %v1927_v2  ;;  %v2324_v23 = vpop.f32.mrb[42].mxu0 }
 0x419   : > { %1984 = vst.msk [vmem:[%s3285_s27 + $0xd0] sm:$0xff] %vm620_vm0, %v1936_v59  ;;  %v1939_v21 = vadd.f32 %v2324_v23, %v3279_v44  ;;  %v1930_v32 = vpop.f32.mrb[43].mxu0 }
 0x41a   : > { %1982 = vst.msk [vmem:[%s3285_s27 + $0xc0] sm:$0xff] %vm620_vm0, %v1928_v0  ;;  %v1931_v43 = vadd.f32 %v3279_v44, %v1930_v32 }
 0x41b   : > { %1985 = vst.msk [vmem:[%s3285_s27 + $0xd8] sm:$0xff] %vm620_vm0, %v1939_v21 }
 0x41c   : > { %1983 = vst.msk [vmem:[%s3285_s27 + $0xc8] sm:$0xff] %vm620_vm0, %v1931_v43 }
 0x41e   : > { %v2327_v34 = vpop.f32.mrb[44].mxu0 }
 0x41f   : > { %v1952_v5 = vadd.f32 %v2327_v34, %v3279_v44  ;;  %v1943_v15 = vpop.f32.mrb[45].mxu0 }
 0x420   : > { %v1944_v28 = vadd.f32 %v3279_v44, %v1943_v15  ;;  %v2328_v29 = vpop.f32.mrb[46].mxu0 }
 0x421   : > { %1988 = vst.msk [vmem:[%s3285_s27 + $0xf0] sm:$0xff] %vm620_vm0, %v1952_v5  ;;  %v1955_v37 = vadd.f32 %v2328_v29, %v3279_v44  ;;  %v1946_v4 = vpop.f32.mrb[47].mxu0 }
 0x422   : > { %1986 = vst.msk [vmem:[%s3285_s27 + $0xe0] sm:$0xff] %vm620_vm0, %v1944_v28  ;;  %v1947_v11 = vadd.f32 %v3279_v44, %v1946_v4 }
 0x423   : > { %1989 = vst.msk [vmem:[%s3285_s27 + $0xf8] sm:$0xff] %vm620_vm0, %v1955_v37 }
 0x424   : > { %1987 = vst.msk [vmem:[%s3285_s27 + $0xe8] sm:$0xff] %vm620_vm0, %v1947_v11 }
 0x425 PF: > { %s23_s21 = sadd.s32 1, %s2415_s21  }
 0x426   : > { %p20_p4 = scmp.ge.s32.totalorder %s23_s21, 4  }
 0x428   :  { %22 = sbr.rel (!%p20_p4) target bundleno = 1 (0x1), region = 109 }

</bundles_post_ra>
